<compile_context>
chip_gen: v7x
topology: tpu7x:2x2x1
jax: 0.10.0
libtpu: 0.0.40
codegen_flags: <defaults>
</compile_context>

<pallas_src>
import numpy as np

import jax
import jax.numpy as jnp
from jax.experimental import pallas as pl
from jax.experimental.pallas import tpu as pltpu


KSIZE = 5            # every LeNet-5 convolution is 5x5, stride 1, valid padding
IMAGES_PER_STEP = 4  # lane-batch factor: 4 images * 32 cols = 128 lanes for conv1


# ----------------------------------------------------------------------------
# Fused Pallas kernel: full LeNet-5 forward for G images per grid step.
# All inputs laid out so the image index runs along the lane (column) axis.
# ----------------------------------------------------------------------------
def _lenet5_kernel(x_ref,
                   l1_ref, r1_ref, b1_ref, pl1_ref, pr1_ref,
                   l2_ref, r2_ref, b2_ref, pl2_ref, pr2_ref,
                   w3_ref, s3_ref, b3_ref, w4_ref, b4_ref, w5_ref, b5_ref,
                   out_ref):
    def mm(a, b):
        return jnp.dot(a, b, preferred_element_type=jnp.float32)

    a0 = x_ref[0]                                      # (32, G*32) this group

    # conv1 (1 -> 6, 5x5) + tanh:  rows = (c_out, row), cols = (image, col)
    acc = mm(l1_ref[0], mm(a0, r1_ref[0]))
    for dj in range(1, KSIZE):
        acc = acc + mm(l1_ref[dj], mm(a0, r1_ref[dj]))
    a1 = jnp.tanh(acc + b1_ref[...])                   # (6*28, G*28)

    # AvgPool2d(2) as a pooling-matrix sandwich
    p1 = mm(pl1_ref[...], mm(a1, pr1_ref[...]))        # (6*14, G*14)

    # conv2 (6 -> 16, 5x5) + tanh
    acc = mm(l2_ref[0], mm(p1, r2_ref[0]))
    for dj in range(1, KSIZE):
        acc = acc + mm(l2_ref[dj], mm(p1, r2_ref[dj]))
    a2 = jnp.tanh(acc + b2_ref[...])                   # (16*10, G*10)

    # AvgPool2d(2)
    p2 = mm(pl2_ref[...], mm(a2, pr2_ref[...]))        # (16*5, G*5)

    # conv3 (16 -> 120, 5x5 over the whole 5x5 map) == dense layer.
    # s3[j] is a (G*5, G) selector picking column j of each image's 5x5 map.
    acc = mm(w3_ref[0], mm(p2, s3_ref[0]))
    for j in range(1, KSIZE):
        acc = acc + mm(w3_ref[j], mm(p2, s3_ref[j]))
    a3 = jnp.tanh(acc + b3_ref[...])                   # (120, G)

    # classifier: Linear(120 -> 84) + tanh, Linear(84 -> n_classes)
    a4 = jnp.tanh(mm(w4_ref[...], a3) + b4_ref[...])   # (84, G)
    out_ref[0] = mm(w5_ref[...], a4) + b5_ref[...]     # (n_classes, G)


# ----------------------------------------------------------------------------
# One-time parameter repacking (host side, numpy): conv -> structured matmuls.
# ----------------------------------------------------------------------------
def _conv_left(w, h_in):
    """L[dj]: (CO*Ho, CI*H) with L[dj][co*Ho+i, ci*H+i+di] = w[co, ci, di, dj]."""
    c_out, c_in, k, _ = w.shape
    h_out = h_in - k + 1
    left = np.zeros((k, c_out * h_out, c_in * h_in), np.float32)
    for dj in range(k):
        for co in range(c_out):
            for i in range(h_out):
                for ci in range(c_in):
                    for di in range(k):
                        left[dj, co * h_out + i, ci * h_in + i + di] = w[co, ci, di, dj]
    return left


def _conv_right(w_in, k):
    """R[dj]: (W, Wo) column-shift selector, (A @ R[dj])[:, j] = A[:, j + dj]."""
    w_out = w_in - k + 1
    right = np.zeros((k, w_in, w_out), np.float32)
    for dj in range(k):
        for j in range(w_out):
            right[dj, j + dj, j] = 1.0
    return right


def _pool_left(channels, h_in):
    """(C*H/2, C*H): averages row pairs within each channel block (factor 0.5)."""
    h_out = h_in // 2
    left = np.zeros((channels * h_out, channels * h_in), np.float32)
    for c in range(channels):
        for i in range(h_out):
            left[c * h_out + i, c * h_in + 2 * i] = 0.5
            left[c * h_out + i, c * h_in + 2 * i + 1] = 0.5
    return left


def _pool_right(w_in):
    """(W, W/2): averages column pairs (factor 0.5)."""
    w_out = w_in // 2
    right = np.zeros((w_in, w_out), np.float32)
    for j in range(w_out):
        right[2 * j, j] = 0.5
        right[2 * j + 1, j] = 0.5
    return right


def _block_diag(mat, g):
    """Repeat `mat` g times on the block diagonal (one block per lane-batched image)."""
    return np.kron(np.eye(g, dtype=np.float32), mat.astype(np.float32))


def _col_selector(g, k):
    """S[j]: (g*k, g) with S[j][gg*k + j, gg] = 1 -> picks column j of each image."""
    sel = np.zeros((k, g * k, g), np.float32)
    for j in range(k):
        for gg in range(g):
            sel[j, gg * k + j, gg] = 1.0
    return sel


def prepare_lenet5(params, images_per_step=IMAGES_PER_STEP):
    """Repack PyTorch-layout LeNet-5 params into the fused-kernel layout (once)."""
    g = int(images_per_step)
    as_np = lambda k: np.asarray(params[k], np.float32)
    w1, b1 = as_np("c1_w"), as_np("c1_b")
    w2, b2 = as_np("c2_w"), as_np("c2_b")
    w3, b3 = as_np("c3_w"), as_np("c3_b")
    f1w, f1b = as_np("fc1_w"), as_np("fc1_b")
    f2w, f2b = as_np("fc2_w"), as_np("fc2_b")

    r1 = _conv_right(32, KSIZE)
    r2 = _conv_right(14, KSIZE)

    packed = {
        # conv1: 32x32 -> 28x28, then pool to 14x14
        "l1": _conv_left(w1, 32),
        "r1": np.stack([_block_diag(r1[d], g) for d in range(KSIZE)]),
        "b1": np.repeat(b1, 28).reshape(-1, 1),
        "pl1": _pool_left(6, 28),
        "pr1": _block_diag(_pool_right(28), g),
        # conv2: 14x14 -> 10x10, then pool to 5x5
        "l2": _conv_left(w2, 14),
        "r2": np.stack([_block_diag(r2[d], g) for d in range(KSIZE)]),
        "b2": np.repeat(b2, 10).reshape(-1, 1),
        "pl2": _pool_left(16, 10),
        "pr2": _block_diag(_pool_right(10), g),
        # conv3 consumes the whole 5x5 map: stacked (kw, 120, ci*5 + kh)
        "w3": np.transpose(w3, (3, 0, 1, 2)).reshape(KSIZE, 120, 16 * KSIZE),
        "s3": _col_selector(g, KSIZE),
        "b3": b3.reshape(-1, 1),
        # classifier weights stay in PyTorch (out, in) layout; applied column-wise
        "w4": f1w,
        "b4": f1b.reshape(-1, 1),
        "w5": f2w,
        "b5": f2b.reshape(-1, 1),
    }
    return {k: jnp.asarray(v, jnp.float32) for k, v in packed.items()}


# ----------------------------------------------------------------------------
# Forward wrapper (single pallas_call).
# ----------------------------------------------------------------------------
_PARAM_ORDER = ("l1", "r1", "b1", "pl1", "pr1",
                "l2", "r2", "b2", "pl2", "pr2",
                "w3", "s3", "b3", "w4", "b4", "w5", "b5")


def lenet5_forward(kparams, x):
    """LeNet-5 forward. x: (B, 1, 32, 32) NCHW -> logits (B, n_classes)."""
    batch = x.shape[0]
    g = kparams["r1"].shape[1] // 32           # images per grid step (static)
    n_classes = kparams["w5"].shape[0]

    x2d = x.reshape(batch, 32, 32).astype(jnp.float32)   # in_channels == 1
    pad = (-batch) % g
    if pad:
        x2d = jnp.concatenate(
            [x2d, jnp.zeros((pad, 32, 32), jnp.float32)], axis=0)
    steps = (batch + pad) // g
    # Lane-batch: columns of each step's tile are [img0 cols | img1 cols | ...]
    xg = (x2d.reshape(steps, g, 32, 32)
              .transpose(0, 2, 1, 3)
              .reshape(steps, 32, g * 32))

    def _whole(arr):
        ndim = arr.ndim
        return pl.BlockSpec(arr.shape, lambda i, _n=ndim: (0,) * _n)

    weights = [kparams[name] for name in _PARAM_ORDER]
    in_specs = [pl.BlockSpec((1, 32, g * 32), lambda i: (i, 0, 0))]
    in_specs += [_whole(w) for w in weights]

    out = pl.pallas_call(
        _lenet5_kernel,
        out_shape=jax.ShapeDtypeStruct((steps, n_classes, g), jnp.float32),
        grid=(steps,),
        in_specs=in_specs,
        out_specs=pl.BlockSpec((1, n_classes, g), lambda i: (i, 0, 0)),
        compiler_params=pltpu.CompilerParams(
            dimension_semantics=("parallel",)),
    )(xg, *weights)

    logits = out.transpose(0, 2, 1).reshape(steps * g, n_classes)
    return logits[:batch]


# ----------------------------------------------------------------------------
# Deterministic init (PyTorch-style uniform bounds) and a pure-XLA reference.
# ----------------------------------------------------------------------------
def init_lenet5_params(key, n_classes):
    def uni(k, shape, fan_in):
        bound = 1.0 / np.sqrt(float(fan_in))
        return jax.random.uniform(k, shape, jnp.float32, -bound, bound)

    ks = jax.random.split(key, 10)
    return {
        "c1_w": uni(ks[0], (6, 1, 5, 5), 1 * 25),
        "c1_b": uni(ks[1], (6,), 1 * 25),
        "c2_w": uni(ks[2], (16, 6, 5, 5), 6 * 25),
        "c2_b": uni(ks[3], (16,), 6 * 25),
        "c3_w": uni(ks[4], (120, 16, 5, 5), 16 * 25),
        "c3_b": uni(ks[5], (120,), 16 * 25),
        "fc1_w": uni(ks[6], (84, 120), 120),
        "fc1_b": uni(ks[7], (84,), 120),
        "fc2_w": uni(ks[8], (n_classes, 84), 84),
        "fc2_b": uni(ks[9], (n_classes,), 84),
    }


def lenet5_reference(params, x):
    """Pure-JAX reference mirroring the PyTorch module, for validation."""
    hi = jax.lax.Precision.HIGHEST

    def conv_tanh(t, w, b):
        y = jax.lax.conv_general_dilated(
            t, w, window_strides=(1, 1), padding="VALID",
            dimension_numbers=("NCHW", "OIHW", "NCHW"), precision=hi)
        return jnp.tanh(y + b.reshape(1, -1, 1, 1))

    def avg_pool(t):
        return 0.25 * (t[:, :, 0::2, 0::2] + t[:, :, 0::2, 1::2]
                       + t[:, :, 1::2, 0::2] + t[:, :, 1::2, 1::2])

    t = conv_tanh(x, params["c1_w"], params["c1_b"])
    t = avg_pool(t)
    t = conv_tanh(t, params["c2_w"], params["c2_b"])
    t = avg_pool(t)
    t = conv_tanh(t, params["c3_w"], params["c3_b"])
    t = t.reshape(t.shape[0], -1)
    t = jnp.tanh(jnp.dot(t, params["fc1_w"].T, precision=hi) + params["fc1_b"])
    return jnp.dot(t, params["fc2_w"].T, precision=hi) + params["fc2_b"]


# ----------------------------------------------------------------------------
if __name__ == "__main__":
    n_classes = 10
    batch = 2

    key = jax.random.PRNGKey(0)
    k_params, k_x = jax.random.split(key)
    params = init_lenet5_params(k_params, n_classes)
    kparams = prepare_lenet5(params)            # one-time kernel-layout repack

    # Classic LeNet-5 input: 32x32 single-channel images, NCHW.
    x = jax.random.normal(k_x, (batch, 1, 32, 32), dtype=jnp.float32)

    fwd = jax.jit(lenet5_forward)
    logits = jax.block_until_ready(fwd(kparams, x))

    assert logits.shape == (batch, n_classes), logits.shape
    assert bool(jnp.all(jnp.isfinite(logits)))

    # Validate the fused kernel against the pure-XLA reference of the module.
    ref = jax.block_until_ready(jax.jit(lenet5_reference)(params, x))
    max_err = float(jnp.max(jnp.abs(logits - ref)))
    assert max_err < 1e-2, f"kernel/reference mismatch: max_err={max_err}"

    print("KERNEL_OK")
</pallas_src>

<mosaic_0001>
module attributes {stable_mosaic.version = 11 : i64} {
  func.func @_lenet5_kernel(%arg0: i32, %arg1: memref<1x32x128xf32, #tpu.memory_space<vmem>>, %arg2: memref<5x168x32xf32, #tpu.memory_space<vmem>>, %arg3: memref<5x128x112xf32, #tpu.memory_space<vmem>>, %arg4: memref<168x1xf32, #tpu.memory_space<vmem>>, %arg5: memref<84x168xf32, #tpu.memory_space<vmem>>, %arg6: memref<112x56xf32, #tpu.memory_space<vmem>>, %arg7: memref<5x160x84xf32, #tpu.memory_space<vmem>>, %arg8: memref<5x56x40xf32, #tpu.memory_space<vmem>>, %arg9: memref<160x1xf32, #tpu.memory_space<vmem>>, %arg10: memref<80x160xf32, #tpu.memory_space<vmem>>, %arg11: memref<40x20xf32, #tpu.memory_space<vmem>>, %arg12: memref<5x120x80xf32, #tpu.memory_space<vmem>>, %arg13: memref<5x20x4xf32, #tpu.memory_space<vmem>>, %arg14: memref<120x1xf32, #tpu.memory_space<vmem>>, %arg15: memref<84x120xf32, #tpu.memory_space<vmem>>, %arg16: memref<84x1xf32, #tpu.memory_space<vmem>>, %arg17: memref<10x84xf32, #tpu.memory_space<vmem>>, %arg18: memref<10x1xf32, #tpu.memory_space<vmem>>, %arg19: memref<1x10x4xf32, #tpu.memory_space<vmem>>) attributes {dimension_semantics = [#tpu.dimension_semantics<parallel>], iteration_bounds = array<i64: 1>, scalar_prefetch = 0 : i64, scratch_operands = 0 : i64, tpu.core_type = #tpu.core_type<tc>, window_params = [{transform_indices = @transform_0, window_bounds = array<i64: 1, 32, 128>}, {pipeline_mode = #tpu.pipeline_mode<synchronous>, transform_indices = @transform_1, window_bounds = array<i64: 5, 168, 32>}, {pipeline_mode = #tpu.pipeline_mode<synchronous>, transform_indices = @transform_2, window_bounds = array<i64: 5, 128, 112>}, {pipeline_mode = #tpu.pipeline_mode<synchronous>, transform_indices = @transform_3, window_bounds = array<i64: 168, 1>}, {pipeline_mode = #tpu.pipeline_mode<synchronous>, transform_indices = @transform_4, window_bounds = array<i64: 84, 168>}, {pipeline_mode = #tpu.pipeline_mode<synchronous>, transform_indices = @transform_5, window_bounds = array<i64: 112, 56>}, {pipeline_mode = #tpu.pipeline_mode<synchronous>, transform_indices = @transform_6, window_bounds = array<i64: 5, 160, 84>}, {pipeline_mode = #tpu.pipeline_mode<synchronous>, transform_indices = @transform_7, window_bounds = array<i64: 5, 56, 40>}, {pipeline_mode = #tpu.pipeline_mode<synchronous>, transform_indices = @transform_8, window_bounds = array<i64: 160, 1>}, {pipeline_mode = #tpu.pipeline_mode<synchronous>, transform_indices = @transform_9, window_bounds = array<i64: 80, 160>}, {pipeline_mode = #tpu.pipeline_mode<synchronous>, transform_indices = @transform_10, window_bounds = array<i64: 40, 20>}, {pipeline_mode = #tpu.pipeline_mode<synchronous>, transform_indices = @transform_11, window_bounds = array<i64: 5, 120, 80>}, {pipeline_mode = #tpu.pipeline_mode<synchronous>, transform_indices = @transform_12, window_bounds = array<i64: 5, 20, 4>}, {pipeline_mode = #tpu.pipeline_mode<synchronous>, transform_indices = @transform_13, window_bounds = array<i64: 120, 1>}, {pipeline_mode = #tpu.pipeline_mode<synchronous>, transform_indices = @transform_14, window_bounds = array<i64: 84, 120>}, {pipeline_mode = #tpu.pipeline_mode<synchronous>, transform_indices = @transform_15, window_bounds = array<i64: 84, 1>}, {pipeline_mode = #tpu.pipeline_mode<synchronous>, transform_indices = @transform_16, window_bounds = array<i64: 10, 84>}, {pipeline_mode = #tpu.pipeline_mode<synchronous>, transform_indices = @transform_17, window_bounds = array<i64: 10, 1>}, {transform_indices = @transform_18, window_bounds = array<i64: 1, 10, 4>}]} {
    %c0 = arith.constant 0 : index
    %c0_0 = arith.constant 0 : index
    %c0_1 = arith.constant 0 : index
    %0 = vector.load %arg1[%c0, %c0_0, %c0_1] : memref<1x32x128xf32, #tpu.memory_space<vmem>>, vector<1x32x128xf32>
    %1 = vector.shape_cast %0 : vector<1x32x128xf32> to vector<32x128xf32>
    %c0_2 = arith.constant 0 : index
    %c0_3 = arith.constant 0 : index
    %c0_4 = arith.constant 0 : index
    %2 = vector.load %arg2[%c0_2, %c0_3, %c0_4] : memref<5x168x32xf32, #tpu.memory_space<vmem>>, vector<1x168x32xf32>
    %3 = vector.shape_cast %2 : vector<1x168x32xf32> to vector<168x32xf32>
    %c0_5 = arith.constant 0 : index
    %c0_6 = arith.constant 0 : index
    %c0_7 = arith.constant 0 : index
    %4 = vector.load %arg3[%c0_5, %c0_6, %c0_7] : memref<5x128x112xf32, #tpu.memory_space<vmem>>, vector<1x128x112xf32>
    %5 = vector.shape_cast %4 : vector<1x128x112xf32> to vector<128x112xf32>
    %cst = arith.constant dense<0.000000e+00> : vector<32x112xf32>
    %6 = tpu.matmul %1, %5, %cst {dimension_numbers = #tpu.dot_dimension_numbers<[1], [0], [0], [1], [0, 0, 1, 1], [], []>} : vector<32x128xf32>, vector<128x112xf32>, vector<32x112xf32> -> vector<32x112xf32>
    %cst_8 = arith.constant dense<0.000000e+00> : vector<168x112xf32>
    %7 = tpu.matmul %3, %6, %cst_8 {dimension_numbers = #tpu.dot_dimension_numbers<[1], [0], [0], [1], [0, 0, 1, 1], [], []>} : vector<168x32xf32>, vector<32x112xf32>, vector<168x112xf32> -> vector<168x112xf32>
    %c1 = arith.constant 1 : index
    %c0_9 = arith.constant 0 : index
    %c0_10 = arith.constant 0 : index
    %8 = vector.load %arg2[%c1, %c0_9, %c0_10] : memref<5x168x32xf32, #tpu.memory_space<vmem>>, vector<1x168x32xf32>
    %9 = vector.shape_cast %8 : vector<1x168x32xf32> to vector<168x32xf32>
    %c1_11 = arith.constant 1 : index
    %c0_12 = arith.constant 0 : index
    %c0_13 = arith.constant 0 : index
    %10 = vector.load %arg3[%c1_11, %c0_12, %c0_13] : memref<5x128x112xf32, #tpu.memory_space<vmem>>, vector<1x128x112xf32>
    %11 = vector.shape_cast %10 : vector<1x128x112xf32> to vector<128x112xf32>
    %cst_14 = arith.constant dense<0.000000e+00> : vector<32x112xf32>
    %12 = tpu.matmul %1, %11, %cst_14 {dimension_numbers = #tpu.dot_dimension_numbers<[1], [0], [0], [1], [0, 0, 1, 1], [], []>} : vector<32x128xf32>, vector<128x112xf32>, vector<32x112xf32> -> vector<32x112xf32>
    %cst_15 = arith.constant dense<0.000000e+00> : vector<168x112xf32>
    %13 = tpu.matmul %9, %12, %cst_15 {dimension_numbers = #tpu.dot_dimension_numbers<[1], [0], [0], [1], [0, 0, 1, 1], [], []>} : vector<168x32xf32>, vector<32x112xf32>, vector<168x112xf32> -> vector<168x112xf32>
    %14 = arith.addf %7, %13 : vector<168x112xf32>
    %c2 = arith.constant 2 : index
    %c0_16 = arith.constant 0 : index
    %c0_17 = arith.constant 0 : index
    %15 = vector.load %arg2[%c2, %c0_16, %c0_17] : memref<5x168x32xf32, #tpu.memory_space<vmem>>, vector<1x168x32xf32>
    %16 = vector.shape_cast %15 : vector<1x168x32xf32> to vector<168x32xf32>
    %c2_18 = arith.constant 2 : index
    %c0_19 = arith.constant 0 : index
    %c0_20 = arith.constant 0 : index
    %17 = vector.load %arg3[%c2_18, %c0_19, %c0_20] : memref<5x128x112xf32, #tpu.memory_space<vmem>>, vector<1x128x112xf32>
    %18 = vector.shape_cast %17 : vector<1x128x112xf32> to vector<128x112xf32>
    %cst_21 = arith.constant dense<0.000000e+00> : vector<32x112xf32>
    %19 = tpu.matmul %1, %18, %cst_21 {dimension_numbers = #tpu.dot_dimension_numbers<[1], [0], [0], [1], [0, 0, 1, 1], [], []>} : vector<32x128xf32>, vector<128x112xf32>, vector<32x112xf32> -> vector<32x112xf32>
    %cst_22 = arith.constant dense<0.000000e+00> : vector<168x112xf32>
    %20 = tpu.matmul %16, %19, %cst_22 {dimension_numbers = #tpu.dot_dimension_numbers<[1], [0], [0], [1], [0, 0, 1, 1], [], []>} : vector<168x32xf32>, vector<32x112xf32>, vector<168x112xf32> -> vector<168x112xf32>
    %21 = arith.addf %14, %20 : vector<168x112xf32>
    %c3 = arith.constant 3 : index
    %c0_23 = arith.constant 0 : index
    %c0_24 = arith.constant 0 : index
    %22 = vector.load %arg2[%c3, %c0_23, %c0_24] : memref<5x168x32xf32, #tpu.memory_space<vmem>>, vector<1x168x32xf32>
    %23 = vector.shape_cast %22 : vector<1x168x32xf32> to vector<168x32xf32>
    %c3_25 = arith.constant 3 : index
    %c0_26 = arith.constant 0 : index
    %c0_27 = arith.constant 0 : index
    %24 = vector.load %arg3[%c3_25, %c0_26, %c0_27] : memref<5x128x112xf32, #tpu.memory_space<vmem>>, vector<1x128x112xf32>
    %25 = vector.shape_cast %24 : vector<1x128x112xf32> to vector<128x112xf32>
    %cst_28 = arith.constant dense<0.000000e+00> : vector<32x112xf32>
    %26 = tpu.matmul %1, %25, %cst_28 {dimension_numbers = #tpu.dot_dimension_numbers<[1], [0], [0], [1], [0, 0, 1, 1], [], []>} : vector<32x128xf32>, vector<128x112xf32>, vector<32x112xf32> -> vector<32x112xf32>
    %cst_29 = arith.constant dense<0.000000e+00> : vector<168x112xf32>
    %27 = tpu.matmul %23, %26, %cst_29 {dimension_numbers = #tpu.dot_dimension_numbers<[1], [0], [0], [1], [0, 0, 1, 1], [], []>} : vector<168x32xf32>, vector<32x112xf32>, vector<168x112xf32> -> vector<168x112xf32>
    %28 = arith.addf %21, %27 : vector<168x112xf32>
    %c4 = arith.constant 4 : index
    %c0_30 = arith.constant 0 : index
    %c0_31 = arith.constant 0 : index
    %29 = vector.load %arg2[%c4, %c0_30, %c0_31] : memref<5x168x32xf32, #tpu.memory_space<vmem>>, vector<1x168x32xf32>
    %30 = vector.shape_cast %29 : vector<1x168x32xf32> to vector<168x32xf32>
    %c4_32 = arith.constant 4 : index
    %c0_33 = arith.constant 0 : index
    %c0_34 = arith.constant 0 : index
    %31 = vector.load %arg3[%c4_32, %c0_33, %c0_34] : memref<5x128x112xf32, #tpu.memory_space<vmem>>, vector<1x128x112xf32>
    %32 = vector.shape_cast %31 : vector<1x128x112xf32> to vector<128x112xf32>
    %cst_35 = arith.constant dense<0.000000e+00> : vector<32x112xf32>
    %33 = tpu.matmul %1, %32, %cst_35 {dimension_numbers = #tpu.dot_dimension_numbers<[1], [0], [0], [1], [0, 0, 1, 1], [], []>} : vector<32x128xf32>, vector<128x112xf32>, vector<32x112xf32> -> vector<32x112xf32>
    %cst_36 = arith.constant dense<0.000000e+00> : vector<168x112xf32>
    %34 = tpu.matmul %30, %33, %cst_36 {dimension_numbers = #tpu.dot_dimension_numbers<[1], [0], [0], [1], [0, 0, 1, 1], [], []>} : vector<168x32xf32>, vector<32x112xf32>, vector<168x112xf32> -> vector<168x112xf32>
    %35 = arith.addf %28, %34 : vector<168x112xf32>
    %c0_37 = arith.constant 0 : index
    %c0_38 = arith.constant 0 : index
    %36 = vector.load %arg4[%c0_37, %c0_38] : memref<168x1xf32, #tpu.memory_space<vmem>>, vector<168x1xf32>
    %37 = vector.broadcast %36 : vector<168x1xf32> to vector<168x112xf32>
    %38 = arith.addf %35, %37 : vector<168x112xf32>
    %39 = math.tanh %38 : vector<168x112xf32>
    %c0_39 = arith.constant 0 : index
    %c0_40 = arith.constant 0 : index
    %40 = vector.load %arg5[%c0_39, %c0_40] : memref<84x168xf32, #tpu.memory_space<vmem>>, vector<84x168xf32>
    %c0_41 = arith.constant 0 : index
    %c0_42 = arith.constant 0 : index
    %41 = vector.load %arg6[%c0_41, %c0_42] : memref<112x56xf32, #tpu.memory_space<vmem>>, vector<112x56xf32>
    %cst_43 = arith.constant dense<0.000000e+00> : vector<168x56xf32>
    %42 = tpu.matmul %39, %41, %cst_43 {dimension_numbers = #tpu.dot_dimension_numbers<[1], [0], [0], [1], [0, 0, 1, 1], [], []>} : vector<168x112xf32>, vector<112x56xf32>, vector<168x56xf32> -> vector<168x56xf32>
    %cst_44 = arith.constant dense<0.000000e+00> : vector<84x56xf32>
    %43 = tpu.matmul %40, %42, %cst_44 {dimension_numbers = #tpu.dot_dimension_numbers<[1], [0], [0], [1], [0, 0, 1, 1], [], []>} : vector<84x168xf32>, vector<168x56xf32>, vector<84x56xf32> -> vector<84x56xf32>
    %c0_45 = arith.constant 0 : index
    %c0_46 = arith.constant 0 : index
    %c0_47 = arith.constant 0 : index
    %44 = vector.load %arg7[%c0_45, %c0_46, %c0_47] : memref<5x160x84xf32, #tpu.memory_space<vmem>>, vector<1x160x84xf32>
    %45 = vector.shape_cast %44 : vector<1x160x84xf32> to vector<160x84xf32>
    %c0_48 = arith.constant 0 : index
    %c0_49 = arith.constant 0 : index
    %c0_50 = arith.constant 0 : index
    %46 = vector.load %arg8[%c0_48, %c0_49, %c0_50] : memref<5x56x40xf32, #tpu.memory_space<vmem>>, vector<1x56x40xf32>
    %47 = vector.shape_cast %46 : vector<1x56x40xf32> to vector<56x40xf32>
    %cst_51 = arith.constant dense<0.000000e+00> : vector<84x40xf32>
    %48 = tpu.matmul %43, %47, %cst_51 {dimension_numbers = #tpu.dot_dimension_numbers<[1], [0], [0], [1], [0, 0, 1, 1], [], []>} : vector<84x56xf32>, vector<56x40xf32>, vector<84x40xf32> -> vector<84x40xf32>
    %cst_52 = arith.constant dense<0.000000e+00> : vector<160x40xf32>
    %49 = tpu.matmul %45, %48, %cst_52 {dimension_numbers = #tpu.dot_dimension_numbers<[1], [0], [0], [1], [0, 0, 1, 1], [], []>} : vector<160x84xf32>, vector<84x40xf32>, vector<160x40xf32> -> vector<160x40xf32>
    %c1_53 = arith.constant 1 : index
    %c0_54 = arith.constant 0 : index
    %c0_55 = arith.constant 0 : index
    %50 = vector.load %arg7[%c1_53, %c0_54, %c0_55] : memref<5x160x84xf32, #tpu.memory_space<vmem>>, vector<1x160x84xf32>
    %51 = vector.shape_cast %50 : vector<1x160x84xf32> to vector<160x84xf32>
    %c1_56 = arith.constant 1 : index
    %c0_57 = arith.constant 0 : index
    %c0_58 = arith.constant 0 : index
    %52 = vector.load %arg8[%c1_56, %c0_57, %c0_58] : memref<5x56x40xf32, #tpu.memory_space<vmem>>, vector<1x56x40xf32>
    %53 = vector.shape_cast %52 : vector<1x56x40xf32> to vector<56x40xf32>
    %cst_59 = arith.constant dense<0.000000e+00> : vector<84x40xf32>
    %54 = tpu.matmul %43, %53, %cst_59 {dimension_numbers = #tpu.dot_dimension_numbers<[1], [0], [0], [1], [0, 0, 1, 1], [], []>} : vector<84x56xf32>, vector<56x40xf32>, vector<84x40xf32> -> vector<84x40xf32>
    %cst_60 = arith.constant dense<0.000000e+00> : vector<160x40xf32>
    %55 = tpu.matmul %51, %54, %cst_60 {dimension_numbers = #tpu.dot_dimension_numbers<[1], [0], [0], [1], [0, 0, 1, 1], [], []>} : vector<160x84xf32>, vector<84x40xf32>, vector<160x40xf32> -> vector<160x40xf32>
    %56 = arith.addf %49, %55 : vector<160x40xf32>
    %c2_61 = arith.constant 2 : index
    %c0_62 = arith.constant 0 : index
    %c0_63 = arith.constant 0 : index
    %57 = vector.load %arg7[%c2_61, %c0_62, %c0_63] : memref<5x160x84xf32, #tpu.memory_space<vmem>>, vector<1x160x84xf32>
    %58 = vector.shape_cast %57 : vector<1x160x84xf32> to vector<160x84xf32>
    %c2_64 = arith.constant 2 : index
    %c0_65 = arith.constant 0 : index
    %c0_66 = arith.constant 0 : index
    %59 = vector.load %arg8[%c2_64, %c0_65, %c0_66] : memref<5x56x40xf32, #tpu.memory_space<vmem>>, vector<1x56x40xf32>
    %60 = vector.shape_cast %59 : vector<1x56x40xf32> to vector<56x40xf32>
    %cst_67 = arith.constant dense<0.000000e+00> : vector<84x40xf32>
    %61 = tpu.matmul %43, %60, %cst_67 {dimension_numbers = #tpu.dot_dimension_numbers<[1], [0], [0], [1], [0, 0, 1, 1], [], []>} : vector<84x56xf32>, vector<56x40xf32>, vector<84x40xf32> -> vector<84x40xf32>
    %cst_68 = arith.constant dense<0.000000e+00> : vector<160x40xf32>
    %62 = tpu.matmul %58, %61, %cst_68 {dimension_numbers = #tpu.dot_dimension_numbers<[1], [0], [0], [1], [0, 0, 1, 1], [], []>} : vector<160x84xf32>, vector<84x40xf32>, vector<160x40xf32> -> vector<160x40xf32>
    %63 = arith.addf %56, %62 : vector<160x40xf32>
    %c3_69 = arith.constant 3 : index
    %c0_70 = arith.constant 0 : index
    %c0_71 = arith.constant 0 : index
    %64 = vector.load %arg7[%c3_69, %c0_70, %c0_71] : memref<5x160x84xf32, #tpu.memory_space<vmem>>, vector<1x160x84xf32>
    %65 = vector.shape_cast %64 : vector<1x160x84xf32> to vector<160x84xf32>
    %c3_72 = arith.constant 3 : index
    %c0_73 = arith.constant 0 : index
    %c0_74 = arith.constant 0 : index
    %66 = vector.load %arg8[%c3_72, %c0_73, %c0_74] : memref<5x56x40xf32, #tpu.memory_space<vmem>>, vector<1x56x40xf32>
    %67 = vector.shape_cast %66 : vector<1x56x40xf32> to vector<56x40xf32>
    %cst_75 = arith.constant dense<0.000000e+00> : vector<84x40xf32>
    %68 = tpu.matmul %43, %67, %cst_75 {dimension_numbers = #tpu.dot_dimension_numbers<[1], [0], [0], [1], [0, 0, 1, 1], [], []>} : vector<84x56xf32>, vector<56x40xf32>, vector<84x40xf32> -> vector<84x40xf32>
    %cst_76 = arith.constant dense<0.000000e+00> : vector<160x40xf32>
    %69 = tpu.matmul %65, %68, %cst_76 {dimension_numbers = #tpu.dot_dimension_numbers<[1], [0], [0], [1], [0, 0, 1, 1], [], []>} : vector<160x84xf32>, vector<84x40xf32>, vector<160x40xf32> -> vector<160x40xf32>
    %70 = arith.addf %63, %69 : vector<160x40xf32>
    %c4_77 = arith.constant 4 : index
    %c0_78 = arith.constant 0 : index
    %c0_79 = arith.constant 0 : index
    %71 = vector.load %arg7[%c4_77, %c0_78, %c0_79] : memref<5x160x84xf32, #tpu.memory_space<vmem>>, vector<1x160x84xf32>
    %72 = vector.shape_cast %71 : vector<1x160x84xf32> to vector<160x84xf32>
    %c4_80 = arith.constant 4 : index
    %c0_81 = arith.constant 0 : index
    %c0_82 = arith.constant 0 : index
    %73 = vector.load %arg8[%c4_80, %c0_81, %c0_82] : memref<5x56x40xf32, #tpu.memory_space<vmem>>, vector<1x56x40xf32>
    %74 = vector.shape_cast %73 : vector<1x56x40xf32> to vector<56x40xf32>
    %cst_83 = arith.constant dense<0.000000e+00> : vector<84x40xf32>
    %75 = tpu.matmul %43, %74, %cst_83 {dimension_numbers = #tpu.dot_dimension_numbers<[1], [0], [0], [1], [0, 0, 1, 1], [], []>} : vector<84x56xf32>, vector<56x40xf32>, vector<84x40xf32> -> vector<84x40xf32>
    %cst_84 = arith.constant dense<0.000000e+00> : vector<160x40xf32>
    %76 = tpu.matmul %72, %75, %cst_84 {dimension_numbers = #tpu.dot_dimension_numbers<[1], [0], [0], [1], [0, 0, 1, 1], [], []>} : vector<160x84xf32>, vector<84x40xf32>, vector<160x40xf32> -> vector<160x40xf32>
    %77 = arith.addf %70, %76 : vector<160x40xf32>
    %c0_85 = arith.constant 0 : index
    %c0_86 = arith.constant 0 : index
    %78 = vector.load %arg9[%c0_85, %c0_86] : memref<160x1xf32, #tpu.memory_space<vmem>>, vector<160x1xf32>
    %79 = vector.broadcast %78 : vector<160x1xf32> to vector<160x40xf32>
    %80 = arith.addf %77, %79 : vector<160x40xf32>
    %81 = math.tanh %80 : vector<160x40xf32>
    %c0_87 = arith.constant 0 : index
    %c0_88 = arith.constant 0 : index
    %82 = vector.load %arg10[%c0_87, %c0_88] : memref<80x160xf32, #tpu.memory_space<vmem>>, vector<80x160xf32>
    %c0_89 = arith.constant 0 : index
    %c0_90 = arith.constant 0 : index
    %83 = vector.load %arg11[%c0_89, %c0_90] : memref<40x20xf32, #tpu.memory_space<vmem>>, vector<40x20xf32>
    %cst_91 = arith.constant dense<0.000000e+00> : vector<160x20xf32>
    %84 = tpu.matmul %81, %83, %cst_91 {dimension_numbers = #tpu.dot_dimension_numbers<[1], [0], [0], [1], [0, 0, 1, 1], [], []>} : vector<160x40xf32>, vector<40x20xf32>, vector<160x20xf32> -> vector<160x20xf32>
    %cst_92 = arith.constant dense<0.000000e+00> : vector<80x20xf32>
    %85 = tpu.matmul %82, %84, %cst_92 {dimension_numbers = #tpu.dot_dimension_numbers<[1], [0], [0], [1], [0, 0, 1, 1], [], []>} : vector<80x160xf32>, vector<160x20xf32>, vector<80x20xf32> -> vector<80x20xf32>
    %c0_93 = arith.constant 0 : index
    %c0_94 = arith.constant 0 : index
    %c0_95 = arith.constant 0 : index
    %86 = vector.load %arg12[%c0_93, %c0_94, %c0_95] : memref<5x120x80xf32, #tpu.memory_space<vmem>>, vector<1x120x80xf32>
    %87 = vector.shape_cast %86 : vector<1x120x80xf32> to vector<120x80xf32>
    %c0_96 = arith.constant 0 : index
    %c0_97 = arith.constant 0 : index
    %c0_98 = arith.constant 0 : index
    %88 = vector.load %arg13[%c0_96, %c0_97, %c0_98] : memref<5x20x4xf32, #tpu.memory_space<vmem>>, vector<1x20x4xf32>
    %89 = vector.shape_cast %88 : vector<1x20x4xf32> to vector<20x4xf32>
    %cst_99 = arith.constant dense<0.000000e+00> : vector<80x4xf32>
    %90 = tpu.matmul %85, %89, %cst_99 {dimension_numbers = #tpu.dot_dimension_numbers<[1], [0], [0], [1], [0, 0, 1, 1], [], []>} : vector<80x20xf32>, vector<20x4xf32>, vector<80x4xf32> -> vector<80x4xf32>
    %cst_100 = arith.constant dense<0.000000e+00> : vector<120x4xf32>
    %91 = tpu.matmul %87, %90, %cst_100 {dimension_numbers = #tpu.dot_dimension_numbers<[1], [0], [0], [1], [0, 0, 1, 1], [], []>} : vector<120x80xf32>, vector<80x4xf32>, vector<120x4xf32> -> vector<120x4xf32>
    %c1_101 = arith.constant 1 : index
    %c0_102 = arith.constant 0 : index
    %c0_103 = arith.constant 0 : index
    %92 = vector.load %arg12[%c1_101, %c0_102, %c0_103] : memref<5x120x80xf32, #tpu.memory_space<vmem>>, vector<1x120x80xf32>
    %93 = vector.shape_cast %92 : vector<1x120x80xf32> to vector<120x80xf32>
    %c1_104 = arith.constant 1 : index
    %c0_105 = arith.constant 0 : index
    %c0_106 = arith.constant 0 : index
    %94 = vector.load %arg13[%c1_104, %c0_105, %c0_106] : memref<5x20x4xf32, #tpu.memory_space<vmem>>, vector<1x20x4xf32>
    %95 = vector.shape_cast %94 : vector<1x20x4xf32> to vector<20x4xf32>
    %cst_107 = arith.constant dense<0.000000e+00> : vector<80x4xf32>
    %96 = tpu.matmul %85, %95, %cst_107 {dimension_numbers = #tpu.dot_dimension_numbers<[1], [0], [0], [1], [0, 0, 1, 1], [], []>} : vector<80x20xf32>, vector<20x4xf32>, vector<80x4xf32> -> vector<80x4xf32>
    %cst_108 = arith.constant dense<0.000000e+00> : vector<120x4xf32>
    %97 = tpu.matmul %93, %96, %cst_108 {dimension_numbers = #tpu.dot_dimension_numbers<[1], [0], [0], [1], [0, 0, 1, 1], [], []>} : vector<120x80xf32>, vector<80x4xf32>, vector<120x4xf32> -> vector<120x4xf32>
    %98 = arith.addf %91, %97 : vector<120x4xf32>
    %c2_109 = arith.constant 2 : index
    %c0_110 = arith.constant 0 : index
    %c0_111 = arith.constant 0 : index
    %99 = vector.load %arg12[%c2_109, %c0_110, %c0_111] : memref<5x120x80xf32, #tpu.memory_space<vmem>>, vector<1x120x80xf32>
    %100 = vector.shape_cast %99 : vector<1x120x80xf32> to vector<120x80xf32>
    %c2_112 = arith.constant 2 : index
    %c0_113 = arith.constant 0 : index
    %c0_114 = arith.constant 0 : index
    %101 = vector.load %arg13[%c2_112, %c0_113, %c0_114] : memref<5x20x4xf32, #tpu.memory_space<vmem>>, vector<1x20x4xf32>
    %102 = vector.shape_cast %101 : vector<1x20x4xf32> to vector<20x4xf32>
    %cst_115 = arith.constant dense<0.000000e+00> : vector<80x4xf32>
    %103 = tpu.matmul %85, %102, %cst_115 {dimension_numbers = #tpu.dot_dimension_numbers<[1], [0], [0], [1], [0, 0, 1, 1], [], []>} : vector<80x20xf32>, vector<20x4xf32>, vector<80x4xf32> -> vector<80x4xf32>
    %cst_116 = arith.constant dense<0.000000e+00> : vector<120x4xf32>
    %104 = tpu.matmul %100, %103, %cst_116 {dimension_numbers = #tpu.dot_dimension_numbers<[1], [0], [0], [1], [0, 0, 1, 1], [], []>} : vector<120x80xf32>, vector<80x4xf32>, vector<120x4xf32> -> vector<120x4xf32>
    %105 = arith.addf %98, %104 : vector<120x4xf32>
    %c3_117 = arith.constant 3 : index
    %c0_118 = arith.constant 0 : index
    %c0_119 = arith.constant 0 : index
    %106 = vector.load %arg12[%c3_117, %c0_118, %c0_119] : memref<5x120x80xf32, #tpu.memory_space<vmem>>, vector<1x120x80xf32>
    %107 = vector.shape_cast %106 : vector<1x120x80xf32> to vector<120x80xf32>
    %c3_120 = arith.constant 3 : index
    %c0_121 = arith.constant 0 : index
    %c0_122 = arith.constant 0 : index
    %108 = vector.load %arg13[%c3_120, %c0_121, %c0_122] : memref<5x20x4xf32, #tpu.memory_space<vmem>>, vector<1x20x4xf32>
    %109 = vector.shape_cast %108 : vector<1x20x4xf32> to vector<20x4xf32>
    %cst_123 = arith.constant dense<0.000000e+00> : vector<80x4xf32>
    %110 = tpu.matmul %85, %109, %cst_123 {dimension_numbers = #tpu.dot_dimension_numbers<[1], [0], [0], [1], [0, 0, 1, 1], [], []>} : vector<80x20xf32>, vector<20x4xf32>, vector<80x4xf32> -> vector<80x4xf32>
    %cst_124 = arith.constant dense<0.000000e+00> : vector<120x4xf32>
    %111 = tpu.matmul %107, %110, %cst_124 {dimension_numbers = #tpu.dot_dimension_numbers<[1], [0], [0], [1], [0, 0, 1, 1], [], []>} : vector<120x80xf32>, vector<80x4xf32>, vector<120x4xf32> -> vector<120x4xf32>
    %112 = arith.addf %105, %111 : vector<120x4xf32>
    %c4_125 = arith.constant 4 : index
    %c0_126 = arith.constant 0 : index
    %c0_127 = arith.constant 0 : index
    %113 = vector.load %arg12[%c4_125, %c0_126, %c0_127] : memref<5x120x80xf32, #tpu.memory_space<vmem>>, vector<1x120x80xf32>
    %114 = vector.shape_cast %113 : vector<1x120x80xf32> to vector<120x80xf32>
    %c4_128 = arith.constant 4 : index
    %c0_129 = arith.constant 0 : index
    %c0_130 = arith.constant 0 : index
    %115 = vector.load %arg13[%c4_128, %c0_129, %c0_130] : memref<5x20x4xf32, #tpu.memory_space<vmem>>, vector<1x20x4xf32>
    %116 = vector.shape_cast %115 : vector<1x20x4xf32> to vector<20x4xf32>
    %cst_131 = arith.constant dense<0.000000e+00> : vector<80x4xf32>
    %117 = tpu.matmul %85, %116, %cst_131 {dimension_numbers = #tpu.dot_dimension_numbers<[1], [0], [0], [1], [0, 0, 1, 1], [], []>} : vector<80x20xf32>, vector<20x4xf32>, vector<80x4xf32> -> vector<80x4xf32>
    %cst_132 = arith.constant dense<0.000000e+00> : vector<120x4xf32>
    %118 = tpu.matmul %114, %117, %cst_132 {dimension_numbers = #tpu.dot_dimension_numbers<[1], [0], [0], [1], [0, 0, 1, 1], [], []>} : vector<120x80xf32>, vector<80x4xf32>, vector<120x4xf32> -> vector<120x4xf32>
    %119 = arith.addf %112, %118 : vector<120x4xf32>
    %c0_133 = arith.constant 0 : index
    %c0_134 = arith.constant 0 : index
    %120 = vector.load %arg14[%c0_133, %c0_134] : memref<120x1xf32, #tpu.memory_space<vmem>>, vector<120x1xf32>
    %121 = vector.broadcast %120 : vector<120x1xf32> to vector<120x4xf32>
    %122 = arith.addf %119, %121 : vector<120x4xf32>
    %123 = math.tanh %122 : vector<120x4xf32>
    %c0_135 = arith.constant 0 : index
    %c0_136 = arith.constant 0 : index
    %124 = vector.load %arg15[%c0_135, %c0_136] : memref<84x120xf32, #tpu.memory_space<vmem>>, vector<84x120xf32>
    %cst_137 = arith.constant dense<0.000000e+00> : vector<84x4xf32>
    %125 = tpu.matmul %124, %123, %cst_137 {dimension_numbers = #tpu.dot_dimension_numbers<[1], [0], [0], [1], [0, 0, 1, 1], [], []>} : vector<84x120xf32>, vector<120x4xf32>, vector<84x4xf32> -> vector<84x4xf32>
    %c0_138 = arith.constant 0 : index
    %c0_139 = arith.constant 0 : index
    %126 = vector.load %arg16[%c0_138, %c0_139] : memref<84x1xf32, #tpu.memory_space<vmem>>, vector<84x1xf32>
    %127 = vector.broadcast %126 : vector<84x1xf32> to vector<84x4xf32>
    %128 = arith.addf %125, %127 : vector<84x4xf32>
    %129 = math.tanh %128 : vector<84x4xf32>
    %c0_140 = arith.constant 0 : index
    %c0_141 = arith.constant 0 : index
    %130 = vector.load %arg17[%c0_140, %c0_141] : memref<10x84xf32, #tpu.memory_space<vmem>>, vector<10x84xf32>
    %cst_142 = arith.constant dense<0.000000e+00> : vector<10x4xf32>
    %131 = tpu.matmul %130, %129, %cst_142 {dimension_numbers = #tpu.dot_dimension_numbers<[1], [0], [0], [1], [0, 0, 1, 1], [], []>} : vector<10x84xf32>, vector<84x4xf32>, vector<10x4xf32> -> vector<10x4xf32>
    %c0_143 = arith.constant 0 : index
    %c0_144 = arith.constant 0 : index
    %132 = vector.load %arg18[%c0_143, %c0_144] : memref<10x1xf32, #tpu.memory_space<vmem>>, vector<10x1xf32>
    %133 = vector.broadcast %132 : vector<10x1xf32> to vector<10x4xf32>
    %134 = arith.addf %131, %133 : vector<10x4xf32>
    %c0_145 = arith.constant 0 : index
    %c0_146 = arith.constant 0 : index
    %c0_147 = arith.constant 0 : index
    %135 = vector.load %arg19[%c0_145, %c0_146, %c0_147] : memref<1x10x4xf32, #tpu.memory_space<vmem>>, vector<1x10x4xf32>
    %136 = vector.shape_cast %135 : vector<1x10x4xf32> to vector<10x4xf32>
    %137 = vector.shape_cast %134 : vector<10x4xf32> to vector<1x10x4xf32>
    tpu.vector_store %arg19[%c0_145, %c0_146, %c0_147], %137 {strides = array<i32>} : memref<1x10x4xf32, #tpu.memory_space<vmem>>, vector<1x10x4xf32>,
    return
  }
  func.func @transform_0(%arg0: i32) -> (i32, i32, i32) {
    %c0_i32 = arith.constant 0 : i32
    %c0_i32_0 = arith.constant 0 : i32
    %c0_i32_1 = arith.constant 0 : i32
    return %arg0, %c0_i32, %c0_i32_0 : i32, i32, i32
  }
  func.func @transform_1(%arg0: i32) -> (i32, i32, i32) {
    %c0_i32 = arith.constant 0 : i32
    %c0_i32_0 = arith.constant 0 : i32
    %c0_i32_1 = arith.constant 0 : i32
    %c0_i32_2 = arith.constant 0 : i32
    return %c0_i32, %c0_i32_0, %c0_i32_1 : i32, i32, i32
  }
  func.func @transform_2(%arg0: i32) -> (i32, i32, i32) {
    %c0_i32 = arith.constant 0 : i32
    %c0_i32_0 = arith.constant 0 : i32
    %c0_i32_1 = arith.constant 0 : i32
    %c0_i32_2 = arith.constant 0 : i32
    return %c0_i32, %c0_i32_0, %c0_i32_1 : i32, i32, i32
  }
  func.func @transform_3(%arg0: i32) -> (i32, i32) {
    %c0_i32 = arith.constant 0 : i32
    %c0_i32_0 = arith.constant 0 : i32
    %c0_i32_1 = arith.constant 0 : i32
    return %c0_i32, %c0_i32_0 : i32, i32
  }
  func.func @transform_4(%arg0: i32) -> (i32, i32) {
    %c0_i32 = arith.constant 0 : i32
    %c0_i32_0 = arith.constant 0 : i32
    %c0_i32_1 = arith.constant 0 : i32
    return %c0_i32, %c0_i32_0 : i32, i32
  }
  func.func @transform_5(%arg0: i32) -> (i32, i32) {
    %c0_i32 = arith.constant 0 : i32
    %c0_i32_0 = arith.constant 0 : i32
    %c0_i32_1 = arith.constant 0 : i32
    return %c0_i32, %c0_i32_0 : i32, i32
  }
  func.func @transform_6(%arg0: i32) -> (i32, i32, i32) {
    %c0_i32 = arith.constant 0 : i32
    %c0_i32_0 = arith.constant 0 : i32
    %c0_i32_1 = arith.constant 0 : i32
    %c0_i32_2 = arith.constant 0 : i32
    return %c0_i32, %c0_i32_0, %c0_i32_1 : i32, i32, i32
  }
  func.func @transform_7(%arg0: i32) -> (i32, i32, i32) {
    %c0_i32 = arith.constant 0 : i32
    %c0_i32_0 = arith.constant 0 : i32
    %c0_i32_1 = arith.constant 0 : i32
    %c0_i32_2 = arith.constant 0 : i32
    return %c0_i32, %c0_i32_0, %c0_i32_1 : i32, i32, i32
  }
  func.func @transform_8(%arg0: i32) -> (i32, i32) {
    %c0_i32 = arith.constant 0 : i32
    %c0_i32_0 = arith.constant 0 : i32
    %c0_i32_1 = arith.constant 0 : i32
    return %c0_i32, %c0_i32_0 : i32, i32
  }
  func.func @transform_9(%arg0: i32) -> (i32, i32) {
    %c0_i32 = arith.constant 0 : i32
    %c0_i32_0 = arith.constant 0 : i32
    %c0_i32_1 = arith.constant 0 : i32
    return %c0_i32, %c0_i32_0 : i32, i32
  }
  func.func @transform_10(%arg0: i32) -> (i32, i32) {
    %c0_i32 = arith.constant 0 : i32
    %c0_i32_0 = arith.constant 0 : i32
    %c0_i32_1 = arith.constant 0 : i32
    return %c0_i32, %c0_i32_0 : i32, i32
  }
  func.func @transform_11(%arg0: i32) -> (i32, i32, i32) {
    %c0_i32 = arith.constant 0 : i32
    %c0_i32_0 = arith.constant 0 : i32
    %c0_i32_1 = arith.constant 0 : i32
    %c0_i32_2 = arith.constant 0 : i32
    return %c0_i32, %c0_i32_0, %c0_i32_1 : i32, i32, i32
  }
  func.func @transform_12(%arg0: i32) -> (i32, i32, i32) {
    %c0_i32 = arith.constant 0 : i32
    %c0_i32_0 = arith.constant 0 : i32
    %c0_i32_1 = arith.constant 0 : i32
    %c0_i32_2 = arith.constant 0 : i32
    return %c0_i32, %c0_i32_0, %c0_i32_1 : i32, i32, i32
  }
  func.func @transform_13(%arg0: i32) -> (i32, i32) {
    %c0_i32 = arith.constant 0 : i32
    %c0_i32_0 = arith.constant 0 : i32
    %c0_i32_1 = arith.constant 0 : i32
    return %c0_i32, %c0_i32_0 : i32, i32
  }
  func.func @transform_14(%arg0: i32) -> (i32, i32) {
    %c0_i32 = arith.constant 0 : i32
    %c0_i32_0 = arith.constant 0 : i32
    %c0_i32_1 = arith.constant 0 : i32
    return %c0_i32, %c0_i32_0 : i32, i32
  }
  func.func @transform_15(%arg0: i32) -> (i32, i32) {
    %c0_i32 = arith.constant 0 : i32
    %c0_i32_0 = arith.constant 0 : i32
    %c0_i32_1 = arith.constant 0 : i32
    return %c0_i32, %c0_i32_0 : i32, i32
  }
  func.func @transform_16(%arg0: i32) -> (i32, i32) {
    %c0_i32 = arith.constant 0 : i32
    %c0_i32_0 = arith.constant 0 : i32
    %c0_i32_1 = arith.constant 0 : i32
    return %c0_i32, %c0_i32_0 : i32, i32
  }
  func.func @transform_17(%arg0: i32) -> (i32, i32) {
    %c0_i32 = arith.constant 0 : i32
    %c0_i32_0 = arith.constant 0 : i32
    %c0_i32_1 = arith.constant 0 : i32
    return %c0_i32, %c0_i32_0 : i32, i32
  }
  func.func @transform_18(%arg0: i32) -> (i32, i32, i32) {
    %c0_i32 = arith.constant 0 : i32
    %c0_i32_0 = arith.constant 0 : i32
    %c0_i32_1 = arith.constant 0 : i32
    return %arg0, %c0_i32, %c0_i32_0 : i32, i32, i32
  }
}

</mosaic_0001>

<bundles_post_ra>
// kernel: lenet5_forward.1
= control target key start
LH: loop header
LB: loop body
LE: loop exit
PB: predicated region body
PF: predicated region fallthrough
CT: control target
= control target key end

     0   :  { %v11225_v52 = vmov 0.0|0.0   ;;  %vm11226_vm0 = vmmov 0   ;;  %v11227_v53 = vmov 0.0   ;;  %vm309_vm1 = vcmask 261120   ;;  %s14556_s2 = inlined_call_operand.vmem [shape: f32[5,128,112], index: 2, kind: input, shape index: {}]   ;;  %s14557_s0 = inlined_call_operand.vmem [shape: f32[1,32,128], index: 0, kind: input, shape index: {}]   ;;  %s14558_s1 = inlined_call_operand.vmem [shape: f32[5,168,32], index: 1, kind: input, shape index: {}]   ;;  %s14559_s3 = inlined_call_operand.vmem [shape: f32[168,1], index: 3, kind: input, shape index: {}]   ;;  %s14560_s8 = inlined_call_operand.vmem [shape: f32[160,1], index: 8, kind: input, shape index: {}]   ;;  %s14561_s13 = inlined_call_operand.vmem [shape: f32[120,1], index: 13, kind: input, shape index: {}]   ;;  %s14562_s15 = inlined_call_operand.vmem [shape: f32[84,1], index: 15, kind: input, shape index: {}]   ;;  %s14563_s5 = inlined_call_operand.vmem [shape: f32[112,56], index: 5, kind: input, shape index: {}]   ;;  %s14564_s17 = inlined_call_operand.vmem [shape: f32[10,1], index: 17, kind: input, shape index: {}]   ;;  %s14565_s4 = inlined_call_operand.vmem [shape: f32[84,168], index: 4, kind: input, shape index: {}]   ;;  %s14566_s7 = inlined_call_operand.vmem [shape: f32[5,56,40], index: 7, kind: input, shape index: {}]   ;;  %s14567_s6 = inlined_call_operand.vmem [shape: f32[5,160,84], index: 6, kind: input, shape index: {}]   ;;  %s14568_s10 = inlined_call_operand.vmem [shape: f32[40,20], index: 10, kind: input, shape index: {}]   ;;  %s14569_s9 = inlined_call_operand.vmem [shape: f32[80,160], index: 9, kind: input, shape index: {}]   ;;  %s14570_s12 = inlined_call_operand.vmem [shape: f32[5,20,4], index: 12, kind: input, shape index: {}]   ;;  %s14571_s11 = inlined_call_operand.vmem [shape: f32[5,120,80], index: 11, kind: input, shape index: {}]   ;;  %s14572_s14 = inlined_call_operand.vmem [shape: f32[84,120], index: 14, kind: input, shape index: {}]   ;;  %s14573_s16 = inlined_call_operand.vmem [shape: f32[10,84], index: 16, kind: input, shape index: {}]   ;;  %s14574_s18 = inlined_call_operand.vmem [shape: f32[1,10,4], index: 18, kind: output, shape index: {}]  }
   0x1   :  { %14578 = sst [smem:[#allocation2_spill]] %s14556_s2  ;;  %vm2114_vm2 = vcmask 916480   ;;  %vm2348_vm3 = vcmask 326656   ;;  %vm2529_vm4 = vcmask 457728   ;;  %vm2832_vm5 = vcmask 687104  }
   0x2   :  { %14579 = sst [smem:[#allocation3_spill]] %s14557_s0  ;;  %s14581_s29 = sld [smem:[#allocation2_spill]]  ;;  %vm2893_vm6 = vcmask 1043456   ;;  %vm5054_vm7 = vcmask 162816   ;;  %vm5341_vm8 = vcmask 654336   ;;  %vm6923_vm9 = vcmask 982016  }
   0x3   :  { %14580 = sst [smem:[#allocation4_spill]] %s14558_s1  ;;  %s14582_s23 = sld [smem:[#allocation3_spill]]  ;;  %vm7188_vm10 = vcmask 25600   ;;  %vm7186_vm11 = vcmask 31744  }
   0x4   :  { %s14583_s30 = sld [smem:[#allocation4_spill]] }
   0x8   :  { %v84_v0 = vld [vmem:[%s14581_s29] sm:$0xff]  ;;  %v85_v1 = vld [vmem:[%s14581_s29 + $0x8] sm:$0xff]  ;;  %v86_v5 = vld [vmem:[%s14581_s29 + $0x10] sm:$0xff] }
   0x9   :  { %v7215_v2 = vld [vmem:[%s14581_s29 + $0x80] sm:$0xff]  ;;  %v10441_v3 = vpack.c.bf16 %v85_v1, %v84_v0  ;;  %v7216_v4 = vld [vmem:[%s14581_s29 + $0x88] sm:$0xff]  ;;  %v87_v6 = vld [vmem:[%s14581_s29 + $0x18] sm:$0xff] }
   0xa   :  { %v10473_v7 = vpack.c.bf16 %v7216_v4, %v7215_v2  ;;  %v10445_v8 = vpack.c.bf16 %v87_v6, %v86_v5  ;;  %v7217_v9 = vld [vmem:[%s14581_s29 + $0x90] sm:$0xff]  ;;  %v7218_v10 = vld [vmem:[%s14581_s29 + $0x98] sm:$0xff]  ;;  %v88_v11 = vld [vmem:[%s14581_s29 + $0x20] sm:$0xff] }
   0xb   :  { %10442 = vmatprep.subr.bf16.mxu0 %v10441_v3  ;;  %v10477_v12 = vpack.c.bf16 %v7218_v10, %v7217_v9  ;;  %v89_v13 = vld [vmem:[%s14581_s29 + $0x28] sm:$0xff]  ;;  %v7219_v14 = vld [vmem:[%s14581_s29 + $0xa0] sm:$0xff]  ;;  %v90_v18 = vld [vmem:[%s14581_s29 + $0x30] sm:$0xff] }
   0xc   :  { %v7220_v15 = vld [vmem:[%s14581_s29 + $0xa8] sm:$0xff]  ;;  %10474 = vmatprep.subr.bf16.mxu1 %v10473_v7  ;;  %10444 = vmatpush3.bf16.msra.mxu0 %v10441_v3  ;;  %v10449_v16 = vpack.c.bf16 %v89_v13, %v88_v11  ;;  %v91_v19 = vld [vmem:[%s14581_s29 + $0x38] sm:$0xff]  ;;  %v7221_v20 = vld [vmem:[%s14581_s29 + $0xb0] sm:$0xff] }
   0xd   :  { %10476 = vmatpush3.bf16.msra.mxu1 %v10473_v7  ;;  %10446 = vmatprep.subr.bf16.mxu0 %v10445_v8  ;;  %v10481_v17 = vpack.c.bf16 %v7220_v15, %v7219_v14  ;;  %v7222_v21 = vld [vmem:[%s14581_s29 + $0xb8] sm:$0xff]  ;;  %v10453_v22 = vpack.c.bf16 %v91_v19, %v90_v18  ;;  %v92_v24 = vld [vmem:[%s14581_s29 + $0x40] sm:$0xff]  ;;  %v93_v25 = vld [vmem:[%s14581_s29 + $0x48] sm:$0xff] }
   0xe   :  { %10478 = vmatprep.subr.bf16.mxu1 %v10477_v12  ;;  %v10485_v23 = vpack.c.bf16 %v7222_v21, %v7221_v20  ;;  %v11381_v26 = vld [vmem:[%s14582_s23] sm:$0xff]  ;;  %v7224_v28 = vld [vmem:[%s14581_s29 + $0xc8] sm:$0xff]  ;;  %v10457_v29 = vpack.c.bf16 %v93_v25, %v92_v24  ;;  %v94_v31 = vld [vmem:[%s14581_s29 + $0x50] sm:$0xff] }
   0xf   :  { %v7223_v27 = vld [vmem:[%s14581_s29 + $0xc0] sm:$0xff]  ;;  %8784 = vmatprep.mubr.f32.mxu0 %v11381_v26  ;;  %8822 = vmatprep.mubr.f32.mxu1 %v11381_v26  ;;  %v95_v32 = vld [vmem:[%s14581_s29 + $0x58] sm:$0xff]  ;;  %v7225_v33 = vld [vmem:[%s14581_s29 + $0xd0] sm:$0xff] }
  0x10   :  { %10448 = vmatpush3.bf16.msra.mxu0 %v10445_v8  ;;  %v10489_v30 = vpack.c.bf16 %v7224_v28, %v7223_v27  ;;  %v7226_v34 = vld [vmem:[%s14581_s29 + $0xd8] sm:$0xff]  ;;  %v10461_v35 = vpack.c.bf16 %v95_v32, %v94_v31  ;;  %v96_v37 = vld [vmem:[%s14581_s29 + $0x60] sm:$0xff]  ;;  %v97_v38 = vld [vmem:[%s14581_s29 + $0x68] sm:$0xff] }
  0x11   :  { %10480 = vmatpush3.bf16.msra.mxu1 %v10477_v12  ;;  %10450 = vmatprep.subr.bf16.mxu0 %v10449_v16  ;;  %v10493_v36 = vpack.c.bf16 %v7226_v34, %v7225_v33  ;;  %v7227_v39 = vld [vmem:[%s14581_s29 + $0xe0] sm:$0xff]  ;;  %v7228_v40 = vld [vmem:[%s14581_s29 + $0xe8] sm:$0xff]  ;;  %v10465_v41 = vpack.c.bf16 %v97_v38, %v96_v37  ;;  %v98_v43 = vld [vmem:[%s14581_s29 + $0x70] sm:$0xff] }
  0x12   :  { %10482 = vmatprep.subr.bf16.mxu1 %v10481_v17  ;;  %v10497_v42 = vpack.c.bf16 %v7228_v40, %v7227_v39  ;;  %v99_v44 = vld [vmem:[%s14581_s29 + $0x78] sm:$0xff]  ;;  %v7229_v45 = vld [vmem:[%s14581_s29 + $0xf0] sm:$0xff]  ;;  %v11430_v49 = vld [vmem:[%s14582_s23 + $0x8] sm:$0xff] }
  0x13   :  { %v7230_v46 = vld [vmem:[%s14581_s29 + $0xf8] sm:$0xff]  ;;  %v10469_v47 = vpack.c.bf16 %v99_v44, %v98_v43  ;;  %v11435_v50 = vld [vmem:[%s14582_s23 + $0x10] sm:$0xff]  ;;  %v7294_v60 = vld [vmem:[%s14581_s29 + $0x100] sm:$0xff] }
  0x14   :  { %10452 = vmatpush3.bf16.msra.mxu0 %v10449_v16  ;;  %v10501_v48 = vpack.c.bf16 %v7230_v46, %v7229_v45  ;;  %v11443_v51 = vld [vmem:[%s14582_s23 + $0x18] sm:$0xff]  ;;  %v7295_v61 = vld [vmem:[%s14581_s29 + $0x108] sm:$0xff]  ;;  %v7296_v5 = vld [vmem:[%s14581_s29 + $0x110] sm:$0xff] }
  0x15   :  { %10484 = vmatpush3.bf16.msra.mxu1 %v10481_v17  ;;  %10454 = vmatprep.subr.bf16.mxu0 %v10453_v22  ;;  %v10517_v3 = vpack.c.bf16 %v7295_v61, %v7294_v60  ;;  %v7297_v6 = vld [vmem:[%s14581_s29 + $0x118] sm:$0xff]  ;;  %v63_v7 = vld [vmem:[%s14583_s30] sm:$0xff]  ;;  %v7194_v8 = vld [vmem:[%s14583_s30 + $0xa8] sm:$0xff] }
  0x16   :  { %10486 = vmatprep.subr.bf16.mxu1 %v10485_v23  ;;  %v10521_v9 = vpack.c.bf16 %v7297_v6, %v7296_v5  ;;  %v7298_v10 = vld [vmem:[%s14581_s29 + $0x120] sm:$0xff]  ;;  %v7299_v11 = vld [vmem:[%s14581_s29 + $0x128] sm:$0xff]  ;;  %v7195_v13 = vld [vmem:[%s14583_s30 + $0xb0] sm:$0xff] }
  0x17   :  { %v64_v12 = vld [vmem:[%s14583_s30 + $0x8] sm:$0xff]  ;;  %v10525_v14 = vpack.c.bf16 %v7299_v11, %v7298_v10  ;;  %v7300_v15 = vld [vmem:[%s14581_s29 + $0x130] sm:$0xff]  ;;  %v7301_v16 = vld [vmem:[%s14581_s29 + $0x138] sm:$0xff] }
  0x18   :  { %10456 = vmatpush3.bf16.msra.mxu0 %v10453_v22  ;;  %v65_v17 = vld [vmem:[%s14583_s30 + $0x10] sm:$0xff]  ;;  %v7196_v18 = vld [vmem:[%s14583_s30 + $0xb8] sm:$0xff]  ;;  %v10529_v19 = vpack.c.bf16 %v7301_v16, %v7300_v15  ;;  %v7302_v20 = vld [vmem:[%s14581_s29 + $0x140] sm:$0xff] }
  0x19   :  { %10488 = vmatpush3.bf16.msra.mxu1 %v10485_v23  ;;  %10458 = vmatprep.subr.bf16.mxu0 %v10457_v29  ;;  %v7303_v21 = vld [vmem:[%s14581_s29 + $0x148] sm:$0xff]  ;;  %v66_v22 = vld [vmem:[%s14583_s30 + $0x18] sm:$0xff]  ;;  %v7197_v23 = vld [vmem:[%s14583_s30 + $0xc0] sm:$0xff] }
  0x1a   :  { %10490 = vmatprep.subr.bf16.mxu1 %v10489_v30  ;;  %v10533_v24 = vpack.c.bf16 %v7303_v21, %v7302_v20  ;;  %v7304_v25 = vld [vmem:[%s14581_s29 + $0x150] sm:$0xff]  ;;  %v7305_v27 = vld [vmem:[%s14581_s29 + $0x158] sm:$0xff]  ;;  %v67_v28 = vld [vmem:[%s14583_s30 + $0x20] sm:$0xff] }
  0x1b   :  { %v7306_v31 = vld [vmem:[%s14581_s29 + $0x160] sm:$0xff]  ;;  %v7307_v32 = vld [vmem:[%s14581_s29 + $0x168] sm:$0xff]  ;;  %v7199_v34 = vld [vmem:[%s14583_s30 + $0xd0] sm:$0xff] }
  0x1c   :  { %10460 = vmatpush3.bf16.msra.mxu0 %v10457_v29  ;;  %v7198_v29 = vld [vmem:[%s14583_s30 + $0xc8] sm:$0xff]  ;;  %v7309_v37 = vld [vmem:[%s14581_s29 + $0x178] sm:$0xff]  ;;  %v69_v38 = vld [vmem:[%s14583_s30 + $0x30] sm:$0xff] }
  0x1d   :  { %10492 = vmatpush3.bf16.msra.mxu1 %v10489_v30  ;;  %10462 = vmatprep.subr.bf16.mxu0 %v10461_v35  ;;  %v10537_v30 = vpack.c.bf16 %v7305_v27, %v7304_v25  ;;  %v68_v33 = vld [vmem:[%s14583_s30 + $0x28] sm:$0xff]  ;;  %v7200_v39 = vld [vmem:[%s14583_s30 + $0xd8] sm:$0xff]  ;;  %v7201_v44 = vld [vmem:[%s14583_s30 + $0xe0] sm:$0xff] }
  0x1e   :  { %10494 = vmatprep.subr.bf16.mxu1 %v10493_v36  ;;  %v70_v43 = vld [vmem:[%s14583_s30 + $0x38] sm:$0xff]  ;;  %v71_v46 = vld [vmem:[%s14583_s30 + $0x40] sm:$0xff]  ;;  %v7206_v60 = vld [vmem:[%s14583_s30 + $0x108] sm:$0xff] }
  0x1f   :  { %v76_v61 = vld [vmem:[%s14583_s30 + $0x68] sm:$0xff]  ;;  %v7211_v6 = vld [vmem:[%s14583_s30 + $0x130] sm:$0xff]  ;;  %v7213_v10 = vld [vmem:[%s14583_s30 + $0x140] sm:$0xff] }
  0x20   :  { %10464 = vmatpush3.bf16.msra.mxu0 %v10461_v35  ;;  %v10541_v35 = vpack.c.bf16 %v7307_v32, %v7306_v31  ;;  %v80_v5 = vld [vmem:[%s14583_s30 + $0x88] sm:$0xff]  ;;  %v83_v11 = vld [vmem:[%s14583_s30 + $0xa0] sm:$0xff]  ;;  %v7359_v20 = vld [vmem:[%s14581_s29 + $0x1b8] sm:$0xff] }
  0x21   :  { %10496 = vmatpush3.bf16.msra.mxu1 %v10493_v36  ;;  %10466 = vmatprep.subr.bf16.mxu0 %v10465_v41  ;;  %v7308_v36 = vld [vmem:[%s14581_s29 + $0x170] sm:$0xff]  ;;  %v7356_v16 = vld [vmem:[%s14581_s29 + $0x1a0] sm:$0xff]  ;;  %v7367_v32 = vld [vmem:[%s14581_s29 + $0x1f8] sm:$0xff] }
  0x22   :  { %10498 = vmatprep.subr.bf16.mxu1 %v10497_v42  ;;  %v10545_v40 = vpack.c.bf16 %v7309_v37, %v7308_v36  ;;  %v7362_v25 = vld [vmem:[%s14581_s29 + $0x1d0] sm:$0xff] }
  0x23   :  { %v7366_v31 = vld [vmem:[%s14581_s29 + $0x1f0] sm:$0xff] }
  0x24   :  { %10468 = vmatpush3.bf16.msra.mxu0 %v10465_v41  ;;  %v7352_v41 = vld [vmem:[%s14581_s29 + $0x180] sm:$0xff] }
  0x25   :  { %10500 = vmatpush3.bf16.msra.mxu1 %v10497_v42  ;;  %10470 = vmatprep.subr.bf16.mxu0 %v10469_v47  ;;  %v7353_v42 = vld [vmem:[%s14581_s29 + $0x188] sm:$0xff] }
  0x26   :  { %10502 = vmatprep.subr.bf16.mxu1 %v10501_v48  ;;  %v11601_v45 = vpack.c.bf16 %v7353_v42, %v7352_v41 }
  0x28   :  { %10472 = vmatpush3.bf16.msra.mxu0 %v10469_v47  ;;  %v7202_v47 = vld [vmem:[%s14583_s30 + $0xe8] sm:$0xff] }
  0x29   :  { %10504 = vmatpush3.bf16.msra.mxu1 %v10501_v48  ;;  %10505 = vmatprep.subr.bf16.mxu0 %v11225_v52  ;;  %v72_v48 = vld [vmem:[%s14583_s30 + $0x48] sm:$0xff] }
  0x2a   :  { %10511 = vmatprep.subr.bf16.mxu1 %v11225_v52 }
  0x2b   :  { %8785 = vmatmul.mubr.f32.vlgmr.msra.gmra.mrb[0].mxu0 %v11430_v49 }
  0x2c   :  { %8823 = vmatmul.mubr.f32.vlgmr.msra.gmra.mrb[0].mxu1 %v11430_v49  ;;  %8787 = vmatprep.mubr.f32.mxu0 %v11435_v50 }
  0x2d   :  { %8825 = vmatprep.mubr.f32.mxu1 %v11435_v50 }
  0x2f   :  { %8788 = vmatmul.mubr.f32.gmra.mrb[2].mxu0 %v11443_v51 }
  0x30   :  { %8826 = vmatmul.mubr.f32.gmra.mrb[2].mxu1 %v11443_v51  ;;  %8836 = vmatprep.mubr.msk.f32.mxu0 %vm11226_vm0, %v11227_v53 }
  0x31   :  { %8907 = vmatprep.mubr.msk.f32.mxu1 %vm11226_vm0, %v11227_v53 }
  0xfe   :  { %v8786_v54 = vpop.f32.mrb[0].mxu0 }
  0xff   :  { %v8824_v55 = vpop.f32.mrb[0].mxu1  ;;  %v166_v56 = vpop.f32.mrb[1].mxu0 }
 0x100   :  { %v10512_v57 = vpack.c.bf16 %v8786_v54, %v166_v56  ;;  %v290_v58 = vpop.f32.mrb[1].mxu1  ;;  %v7203_v54 = vld [vmem:[%s14583_s30 + $0xf0] sm:$0xff]  ;;  %v7204_v56 = vld [vmem:[%s14583_s30 + $0xf8] sm:$0xff] }
 0x101   :  { %v10506_v59 = vpack.c.bf16 %v8824_v55, %v290_v58  ;;  %v73_v55 = vld [vmem:[%s14583_s30 + $0x50] sm:$0xff]  ;;  %v7205_v58 = vld [vmem:[%s14583_s30 + $0x100] sm:$0xff] }
 0x102   :  { %v8789_v62 = vpop.f32.mrb[2].mxu0  ;;  %10513 = vmatpush3.bf16.msra.mxu1 %v10512_v57  ;;  %v74_v57 = vld [vmem:[%s14583_s30 + $0x58] sm:$0xff] }
 0x103   :  { %v8827_v63 = vpop.f32.mrb[2].mxu1  ;;  %10507 = vmatpush3.bf16.msra.mxu0 %v10506_v59  ;;  %v176_v0 = vpop.f32.mrb[3].mxu0  ;;  %10514 = vmatprep.subr.bf16.mxu1 %v11225_v52  ;;  %v75_v59 = vld [vmem:[%s14583_s30 + $0x60] sm:$0xff] }
 0x104   :  { %v10515_v1 = vpack.c.bf16 %v8789_v62, %v176_v0  ;;  %v300_v2 = vpop.f32.mrb[3].mxu1  ;;  %10508 = vmatprep.subr.bf16.mxu0 %v11225_v52  ;;  %v7207_v62 = vld [vmem:[%s14583_s30 + $0x110] sm:$0xff]  ;;  %v7208_v0 = vld [vmem:[%s14583_s30 + $0x118] sm:$0xff] }
 0x105   :  { %v10509_v4 = vpack.c.bf16 %v8827_v63, %v300_v2  ;;  %v77_v63 = vld [vmem:[%s14583_s30 + $0x70] sm:$0xff]  ;;  %v7209_v2 = vld [vmem:[%s14583_s30 + $0x120] sm:$0xff] }
 0x106   :  { %10516 = vmatpush3.bf16.msra.mxu1 %v10515_v1  ;;  %v78_v1 = vld [vmem:[%s14583_s30 + $0x78] sm:$0xff] }
 0x107   :  { %10510 = vmatpush3.bf16.msra.mxu0 %v10509_v4  ;;  %10549 = vmatprep.subr.bf16.mxu1 %v11225_v52  ;;  %v7210_v4 = vld [vmem:[%s14583_s30 + $0x128] sm:$0xff] }
 0x108   :  { %10518 = vmatprep.subr.bf16.mxu0 %v10517_v3 }
 0x109   :  { %8908 = vmatmul.mubr.msk.f32.vlgmr.msra.gmra.mrb[4].mxu1 %vm309_vm1, %v63_v7  ;;  %v81_v7 = vld [vmem:[%s14583_s30 + $0x90] sm:$0xff] }
 0x10a   :  { %8837 = vmatmul.mubr.msk.f32.vlgmr.msra.gmra.mrb[4].mxu0 %vm309_vm1, %v7194_v8  ;;  %8910 = vmatprep.mubr.msk.f32.mxu1 %vm11226_vm0, %v11227_v53  ;;  %v7212_v8 = vld [vmem:[%s14583_s30 + $0x138] sm:$0xff] }
 0x10b   :  { %8839 = vmatprep.mubr.msk.f32.mxu0 %vm11226_vm0, %v11227_v53  ;;  %10520 = vmatpush3.bf16.msra.mxu0 %v10517_v3  ;;  %v79_v3 = vld [vmem:[%s14583_s30 + $0x80] sm:$0xff] }
 0x10c   :  { %10522 = vmatprep.subr.bf16.mxu0 %v10521_v9 }
 0x10d   :  { %8911 = vmatmul.mubr.msk.f32.gmra.mrb[6].mxu1 %vm309_vm1, %v64_v12  ;;  %v7214_v12 = vld [vmem:[%s14583_s30 + $0x148] sm:$0xff] }
 0x10e   :  { %8840 = vmatmul.mubr.msk.f32.gmra.mrb[6].mxu0 %vm309_vm1, %v7195_v13  ;;  %8913 = vmatprep.mubr.msk.f32.mxu1 %vm11226_vm0, %v11227_v53  ;;  %v7354_v13 = vld [vmem:[%s14581_s29 + $0x190] sm:$0xff] }
 0x10f   :  { %8842 = vmatprep.mubr.msk.f32.mxu0 %vm11226_vm0, %v11227_v53  ;;  %10524 = vmatpush3.bf16.msra.mxu0 %v10521_v9  ;;  %v82_v9 = vld [vmem:[%s14583_s30 + $0x98] sm:$0xff] }
 0x110   :  { %10526 = vmatprep.subr.bf16.mxu0 %v10525_v14 }
 0x111   :  { %8914 = vmatmul.mubr.msk.f32.gmra.mrb[8].mxu1 %vm309_vm1, %v65_v17  ;;  %v7357_v17 = vld [vmem:[%s14581_s29 + $0x1a8] sm:$0xff] }
 0x112   :  { %8843 = vmatmul.mubr.msk.f32.gmra.mrb[8].mxu0 %vm309_vm1, %v7196_v18  ;;  %8916 = vmatprep.mubr.msk.f32.mxu1 %vm11226_vm0, %v11227_v53  ;;  %v10563_v18 = vpack.c.bf16 %v7357_v17, %v7356_v16 }
 0x113   :  { %8845 = vmatprep.mubr.msk.f32.mxu0 %vm11226_vm0, %v11227_v53  ;;  %10528 = vmatpush3.bf16.msra.mxu0 %v10525_v14  ;;  %v7355_v14 = vld [vmem:[%s14581_s29 + $0x198] sm:$0xff] }
 0x114   :  { %10530 = vmatprep.subr.bf16.mxu0 %v10529_v19  ;;  %v10559_v15 = vpack.c.bf16 %v7355_v14, %v7354_v13 }
 0x115   :  { %8917 = vmatmul.mubr.msk.f32.gmra.mrb[10].mxu1 %vm309_vm1, %v66_v22  ;;  %v7360_v22 = vld [vmem:[%s14581_s29 + $0x1c0] sm:$0xff] }
 0x116   :  { %8846 = vmatmul.mubr.msk.f32.gmra.mrb[10].mxu0 %vm309_vm1, %v7197_v23  ;;  %8919 = vmatprep.mubr.msk.f32.mxu1 %vm11226_vm0, %v11227_v53  ;;  %v7361_v23 = vld [vmem:[%s14581_s29 + $0x1c8] sm:$0xff] }
 0x117   :  { %8848 = vmatprep.mubr.msk.f32.mxu0 %vm11226_vm0, %v11227_v53  ;;  %10532 = vmatpush3.bf16.msra.mxu0 %v10529_v19  ;;  %v7358_v19 = vld [vmem:[%s14581_s29 + $0x1b0] sm:$0xff] }
 0x118   :  { %10534 = vmatprep.subr.bf16.mxu0 %v10533_v24  ;;  %v10567_v21 = vpack.c.bf16 %v7359_v20, %v7358_v19 }
 0x119   :  { %8920 = vmatmul.mubr.msk.f32.gmra.mrb[12].mxu1 %vm309_vm1, %v67_v28  ;;  %v7364_v28 = vld [vmem:[%s14581_s29 + $0x1e0] sm:$0xff] }
 0x11a   :  { %8849 = vmatmul.mubr.msk.f32.gmra.mrb[12].mxu0 %vm309_vm1, %v7198_v29  ;;  %8922 = vmatprep.mubr.msk.f32.mxu1 %vm11226_vm0, %v11227_v53  ;;  %v7365_v29 = vld [vmem:[%s14581_s29 + $0x1e8] sm:$0xff] }
 0x11b   :  { %8851 = vmatprep.mubr.msk.f32.mxu0 %vm11226_vm0, %v11227_v53  ;;  %10536 = vmatpush3.bf16.msra.mxu0 %v10533_v24  ;;  %v10571_v24 = vpack.c.bf16 %v7361_v23, %v7360_v22 }
 0x11c   :  { %10538 = vmatprep.subr.bf16.mxu0 %v10537_v30 }
 0x11d   :  { %8923 = vmatmul.mubr.msk.f32.gmra.mrb[14].mxu1 %vm309_vm1, %v68_v33  ;;  %v10583_v33 = vpack.c.bf16 %v7367_v32, %v7366_v31 }
 0x11e   :  { %8852 = vmatmul.mubr.msk.f32.gmra.mrb[14].mxu0 %vm309_vm1, %v7199_v34  ;;  %8925 = vmatprep.mubr.msk.f32.mxu1 %vm11226_vm0, %v11227_v53 }
 0x11f   :  { %8854 = vmatprep.mubr.msk.f32.mxu0 %vm11226_vm0, %v11227_v53  ;;  %10540 = vmatpush3.bf16.msra.mxu0 %v10537_v30  ;;  %v10579_v30 = vpack.c.bf16 %v7365_v29, %v7364_v28 }
 0x120   :  { %10542 = vmatprep.subr.bf16.mxu0 %v10541_v35 }
 0x121   :  { %8926 = vmatmul.mubr.msk.f32.gmra.mrb[16].mxu1 %vm309_vm1, %v69_v38 }
 0x122   :  { %8855 = vmatmul.mubr.msk.f32.gmra.mrb[16].mxu0 %vm309_vm1, %v7200_v39  ;;  %8928 = vmatprep.mubr.msk.f32.mxu1 %vm11226_vm0, %v11227_v53 }
 0x123   :  { %8857 = vmatprep.mubr.msk.f32.mxu0 %vm11226_vm0, %v11227_v53  ;;  %10544 = vmatpush3.bf16.msra.mxu0 %v10541_v35 }
 0x124   :  { %10546 = vmatprep.subr.bf16.mxu0 %v10545_v40 }
 0x125   :  { %8929 = vmatmul.mubr.msk.f32.gmra.mrb[18].mxu1 %vm309_vm1, %v70_v43 }
 0x126   :  { %8858 = vmatmul.mubr.msk.f32.gmra.mrb[18].mxu0 %vm309_vm1, %v7201_v44  ;;  %8931 = vmatprep.mubr.msk.f32.mxu1 %vm11226_vm0, %v11227_v53 }
 0x127   :  { %8860 = vmatprep.mubr.msk.f32.mxu0 %vm11226_vm0, %v11227_v53  ;;  %10548 = vmatpush3.bf16.msra.mxu0 %v10545_v40 }
 0x128   :  { %10556 = vmatprep.subr.bf16.mxu0 %v11601_v45 }
 0x129   :  { %8932 = vmatmul.mubr.msk.f32.gmra.mrb[20].mxu1 %vm309_vm1, %v71_v46 }
 0x12a   :  { %8861 = vmatmul.mubr.msk.f32.gmra.mrb[20].mxu0 %vm309_vm1, %v7202_v47  ;;  %8934 = vmatprep.mubr.msk.f32.mxu1 %vm11226_vm0, %v11227_v53 }
 0x12b   :  { %8863 = vmatprep.mubr.msk.f32.mxu0 %vm11226_vm0, %v11227_v53 }
 0x12d   :  { %8935 = vmatmul.mubr.msk.f32.gmra.mrb[22].mxu1 %vm309_vm1, %v72_v48 }
 0x12e   :  { %8864 = vmatmul.mubr.msk.f32.gmra.mrb[22].mxu0 %vm309_vm1, %v7203_v54  ;;  %8937 = vmatprep.mubr.msk.f32.mxu1 %vm11226_vm0, %v11227_v53 }
 0x12f   :  { %8866 = vmatprep.mubr.msk.f32.mxu0 %vm11226_vm0, %v11227_v53 }
 0x131   :  { %8938 = vmatmul.mubr.msk.f32.gmra.mrb[24].mxu1 %vm309_vm1, %v73_v55 }
 0x132   :  { %8867 = vmatmul.mubr.msk.f32.gmra.mrb[24].mxu0 %vm309_vm1, %v7204_v56  ;;  %8940 = vmatprep.mubr.msk.f32.mxu1 %vm11226_vm0, %v11227_v53 }
 0x133   :  { %8869 = vmatprep.mubr.msk.f32.mxu0 %vm11226_vm0, %v11227_v53 }
 0x135   :  { %8941 = vmatmul.mubr.msk.f32.gmra.mrb[26].mxu1 %vm309_vm1, %v74_v57 }
 0x136   :  { %8870 = vmatmul.mubr.msk.f32.gmra.mrb[26].mxu0 %vm309_vm1, %v7205_v58  ;;  %8943 = vmatprep.mubr.msk.f32.mxu1 %vm11226_vm0, %v11227_v53 }
 0x137   :  { %8872 = vmatprep.mubr.msk.f32.mxu0 %vm11226_vm0, %v11227_v53 }
 0x139   :  { %8944 = vmatmul.mubr.msk.f32.gmra.mrb[28].mxu1 %vm309_vm1, %v75_v59 }
 0x13a   :  { %8873 = vmatmul.mubr.msk.f32.gmra.mrb[28].mxu0 %vm309_vm1, %v7206_v60  ;;  %8946 = vmatprep.mubr.msk.f32.mxu1 %vm11226_vm0, %v11227_v53 }
 0x13b   :  { %8875 = vmatprep.mubr.msk.f32.mxu0 %vm11226_vm0, %v11227_v53 }
 0x13d   :  { %8947 = vmatmul.mubr.msk.f32.gmra.mrb[30].mxu1 %vm309_vm1, %v76_v61 }
 0x13e   :  { %8876 = vmatmul.mubr.msk.f32.gmra.mrb[30].mxu0 %vm309_vm1, %v7207_v62  ;;  %8949 = vmatprep.mubr.msk.f32.mxu1 %vm11226_vm0, %v11227_v53 }
 0x13f   :  { %8878 = vmatprep.mubr.msk.f32.mxu0 %vm11226_vm0, %v11227_v53 }
 0x141   :  { %8950 = vmatmul.mubr.msk.f32.gmra.mrb[32].mxu1 %vm309_vm1, %v77_v63 }
 0x142   :  { %8879 = vmatmul.mubr.msk.f32.gmra.mrb[32].mxu0 %vm309_vm1, %v7208_v0  ;;  %8952 = vmatprep.mubr.msk.f32.mxu1 %vm11226_vm0, %v11227_v53 }
 0x143   :  { %8881 = vmatprep.mubr.msk.f32.mxu0 %vm11226_vm0, %v11227_v53 }
 0x145   :  { %8953 = vmatmul.mubr.msk.f32.gmra.mrb[34].mxu1 %vm309_vm1, %v78_v1 }
 0x146   :  { %8882 = vmatmul.mubr.msk.f32.gmra.mrb[34].mxu0 %vm309_vm1, %v7209_v2  ;;  %8955 = vmatprep.mubr.msk.f32.mxu1 %vm11226_vm0, %v11227_v53 }
 0x147   :  { %8884 = vmatprep.mubr.msk.f32.mxu0 %vm11226_vm0, %v11227_v53 }
 0x149   :  { %8956 = vmatmul.mubr.msk.f32.gmra.mrb[36].mxu1 %vm309_vm1, %v79_v3 }
 0x14a   :  { %8885 = vmatmul.mubr.msk.f32.gmra.mrb[36].mxu0 %vm309_vm1, %v7210_v4  ;;  %8958 = vmatprep.mubr.msk.f32.mxu1 %vm11226_vm0, %v11227_v53 }
 0x14b   :  { %8887 = vmatprep.mubr.msk.f32.mxu0 %vm11226_vm0, %v11227_v53 }
 0x14d   :  { %8959 = vmatmul.mubr.msk.f32.gmra.mrb[38].mxu1 %vm309_vm1, %v80_v5 }
 0x14e   :  { %8888 = vmatmul.mubr.msk.f32.gmra.mrb[38].mxu0 %vm309_vm1, %v7211_v6  ;;  %8961 = vmatprep.mubr.msk.f32.mxu1 %vm11226_vm0, %v11227_v53 }
 0x14f   :  { %8890 = vmatprep.mubr.msk.f32.mxu0 %vm11226_vm0, %v11227_v53 }
 0x151   :  { %8962 = vmatmul.mubr.msk.f32.gmra.mrb[40].mxu1 %vm309_vm1, %v81_v7 }
 0x152   :  { %8891 = vmatmul.mubr.msk.f32.gmra.mrb[40].mxu0 %vm309_vm1, %v7212_v8  ;;  %8964 = vmatprep.mubr.msk.f32.mxu1 %vm11226_vm0, %v11227_v53 }
 0x153   :  { %8893 = vmatprep.mubr.msk.f32.mxu0 %vm11226_vm0, %v11227_v53 }
 0x155   :  { %8965 = vmatmul.mubr.msk.f32.gmra.mrb[42].mxu1 %vm309_vm1, %v82_v9 }
 0x156   :  { %8894 = vmatmul.mubr.msk.f32.gmra.mrb[42].mxu0 %vm309_vm1, %v7213_v10  ;;  %8967 = vmatprep.mubr.msk.f32.mxu1 %vm11226_vm0, %v11227_v53 }
 0x157   :  { %8896 = vmatprep.mubr.msk.f32.mxu0 %vm11226_vm0, %v11227_v53 }
 0x159   :  { %8968 = vmatmul.mubr.msk.f32.gmra.mrb[44].mxu1 %vm309_vm1, %v83_v11 }
 0x15a   :  { %8897 = vmatmul.mubr.msk.f32.gmra.mrb[44].mxu0 %vm309_vm1, %v7214_v12  ;;  %9016 = vmatprep.mubr.msk.f32.mxu1 %vm11226_vm0, %v11227_v53 }
 0x15b   :  { %9002 = vmatprep.mubr.f32.mxu0 %v11381_v26 }
 0x15e   :  { %9003 = vmatmul.mubr.f32.vlgmr.msra.gmra.mrb[46].mxu0 %v11430_v49 }
 0x15f   :  { %10558 = vmatpush3.bf16.msra.mxu0 %v11601_v45  ;;  %9005 = vmatprep.mubr.f32.mxu0 %v11435_v50 }
 0x160   :  { %10560 = vmatprep.subr.bf16.mxu0 %v10559_v15 }
 0x162   :  { %9006 = vmatmul.mubr.f32.gmra.mrb[48].mxu0 %v11443_v51 }
 0x163   :  { %10562 = vmatpush3.bf16.msra.mxu0 %v10559_v15  ;;  %9111 = vmatprep.mubr.f32.mxu0 %v11381_v26  ;;  %v7363_v26 = vld [vmem:[%s14581_s29 + $0x1d8] sm:$0xff] }
 0x164   :  { %10564 = vmatprep.subr.bf16.mxu0 %v10563_v18  ;;  %v10575_v27 = vpack.c.bf16 %v7363_v26, %v7362_v25 }
 0x167   :  { %10566 = vmatpush3.bf16.msra.mxu0 %v10563_v18 }
 0x168   :  { %10568 = vmatprep.subr.bf16.mxu0 %v10567_v21 }
 0x16b   :  { %10570 = vmatpush3.bf16.msra.mxu0 %v10567_v21 }
 0x16c   :  { %10572 = vmatprep.subr.bf16.mxu0 %v10571_v24 }
 0x16f   :  { %10574 = vmatpush3.bf16.msra.mxu0 %v10571_v24 }
 0x170   :  { %10576 = vmatprep.subr.bf16.mxu0 %v10575_v27 }
 0x173   :  { %10578 = vmatpush3.bf16.msra.mxu0 %v10575_v27 }
 0x174   :  { %10580 = vmatprep.subr.bf16.mxu0 %v10579_v30 }
 0x177   :  { %10582 = vmatpush3.bf16.msra.mxu0 %v10579_v30 }
 0x178   :  { %10584 = vmatprep.subr.bf16.mxu0 %v10583_v33 }
 0x17b   :  { %10586 = vmatpush3.bf16.msra.mxu0 %v10583_v33 }
 0x17c   :  { %10587 = vmatprep.subr.bf16.mxu0 %v11225_v52 }
 0x17e   :  { %9112 = vmatmul.mubr.f32.vlgmr.msra.gmra.mrb[50].mxu0 %v11430_v49 }
 0x17f   :  { %9114 = vmatprep.mubr.f32.mxu0 %v11435_v50 }
 0x182   :  { %9115 = vmatmul.mubr.f32.gmra.mrb[52].mxu0 %v11443_v51 }
 0x183   :  { %9125 = vmatprep.mubr.msk.f32.mxu0 %vm11226_vm0, %v11227_v53 }
 0x1dc   :  { %v672_v34 = vpop.f32.mrb[4].mxu1 }
 0x1dd   :  { %v439_v35 = vpop.f32.mrb[4].mxu0  ;;  %v8909_v36 = vpop.f32.mrb[5].mxu1 }
 0x1de   :  { %v11818_v37 = vadd.f32 %v672_v34, %v439_v35  ;;  %v8838_v38 = vpop.f32.mrb[5].mxu0 }
 0x1e0   :  { %v677_v39 = vpop.f32.mrb[6].mxu1 }
 0x1e1   :  { %v444_v40 = vpop.f32.mrb[6].mxu0  ;;  %v8912_v41 = vpop.f32.mrb[7].mxu1 }
 0x1e2   :  { %v11820_v42 = vadd.f32 %v677_v39, %v444_v40  ;;  %v8841_v43 = vpop.f32.mrb[7].mxu0 }
 0x1e4   :  { %v682_v49 = vpop.f32.mrb[8].mxu1 }
 0x1e5   :  { %v449_v44 = vpop.f32.mrb[8].mxu0  ;;  %v8915_v50 = vpop.f32.mrb[9].mxu1 }
 0x1e6   :  { %v11822_v45 = vadd.f32 %v682_v49, %v449_v44  ;;  %v8844_v51 = vpop.f32.mrb[9].mxu0 }
 0x1e8   :  { %v687_v46 = vpop.f32.mrb[10].mxu1 }
 0x1e9   :  { %v454_v47 = vpop.f32.mrb[10].mxu0  ;;  %v8918_v48 = vpop.f32.mrb[11].mxu1 }
 0x1ea   :  { %v11824_v54 = vadd.f32 %v687_v46, %v454_v47  ;;  %v8847_v55 = vpop.f32.mrb[11].mxu0 }
 0x1ec   :  { %v692_v56 = vpop.f32.mrb[12].mxu1 }
 0x1ed   :  { %v459_v57 = vpop.f32.mrb[12].mxu0  ;;  %v8921_v58 = vpop.f32.mrb[13].mxu1 }
 0x1ee   :  { %v11826_v59 = vadd.f32 %v692_v56, %v459_v57  ;;  %v8850_v60 = vpop.f32.mrb[13].mxu0 }
 0x1f0   :  { %v697_v61 = vpop.f32.mrb[14].mxu1 }
 0x1f1   :  { %v464_v62 = vpop.f32.mrb[14].mxu0  ;;  %v8924_v63 = vpop.f32.mrb[15].mxu1 }
 0x1f2   :  { %v11828_v0 = vadd.f32 %v697_v61, %v464_v62  ;;  %v8853_v1 = vpop.f32.mrb[15].mxu0 }
 0x1f4   :  { %v702_v2 = vpop.f32.mrb[16].mxu1 }
 0x1f5   :  { %v469_v3 = vpop.f32.mrb[16].mxu0  ;;  %v8927_v4 = vpop.f32.mrb[17].mxu1 }
 0x1f6   :  { %v11830_v5 = vadd.f32 %v702_v2, %v469_v3  ;;  %v8856_v6 = vpop.f32.mrb[17].mxu0 }
 0x1f8   :  { %v707_v7 = vpop.f32.mrb[18].mxu1 }
 0x1f9   :  { %v474_v8 = vpop.f32.mrb[18].mxu0  ;;  %v8930_v9 = vpop.f32.mrb[19].mxu1 }
 0x1fa   :  { %v11832_v10 = vadd.f32 %v707_v7, %v474_v8  ;;  %v8859_v11 = vpop.f32.mrb[19].mxu0 }
 0x1fc   :  { %v712_v12 = vpop.f32.mrb[20].mxu1 }
 0x1fd   :  { %v479_v13 = vpop.f32.mrb[20].mxu0  ;;  %v8933_v14 = vpop.f32.mrb[21].mxu1 }
 0x1fe   :  { %v11834_v15 = vadd.f32 %v712_v12, %v479_v13  ;;  %v8862_v16 = vpop.f32.mrb[21].mxu0 }
 0x200   :  { %v717_v17 = vpop.f32.mrb[22].mxu1 }
 0x201   :  { %v484_v18 = vpop.f32.mrb[22].mxu0  ;;  %v8936_v19 = vpop.f32.mrb[23].mxu1 }
 0x202   :  { %v11836_v20 = vadd.f32 %v717_v17, %v484_v18  ;;  %v8865_v21 = vpop.f32.mrb[23].mxu0 }
 0x204   :  { %v722_v22 = vpop.f32.mrb[24].mxu1 }
 0x205   :  { %v489_v23 = vpop.f32.mrb[24].mxu0  ;;  %v8939_v24 = vpop.f32.mrb[25].mxu1 }
 0x206   :  { %v11838_v25 = vadd.f32 %v722_v22, %v489_v23  ;;  %v8868_v26 = vpop.f32.mrb[25].mxu0 }
 0x208   :  { %v727_v27 = vpop.f32.mrb[26].mxu1 }
 0x209   :  { %v494_v28 = vpop.f32.mrb[26].mxu0  ;;  %v8942_v29 = vpop.f32.mrb[27].mxu1 }
 0x20a   :  { %v11840_v30 = vadd.f32 %v727_v27, %v494_v28  ;;  %v8871_v31 = vpop.f32.mrb[27].mxu0  ;;  %v7410_v29 = vld [vmem:[%s14581_s29 + $0x200] sm:$0xff] }
 0x20b   :  { %v7411_v31 = vld [vmem:[%s14581_s29 + $0x208] sm:$0xff] }
 0x20c   :  { %v732_v32 = vpop.f32.mrb[28].mxu1 }
 0x20d   :  { %v499_v33 = vpop.f32.mrb[28].mxu0  ;;  %v8945_v34 = vpop.f32.mrb[29].mxu1 }
 0x20e   :  { %v11842_v35 = vadd.f32 %v732_v32, %v499_v33  ;;  %v8874_v36 = vpop.f32.mrb[29].mxu0  ;;  %v10593_v34 = vpack.c.bf16 %v7411_v31, %v7410_v29  ;;  %v7331_v29 = vld [vmem:[%s14583_s30 + $0x1f8] sm:$0xff]  ;;  %v7281_v31 = vld [vmem:[%s14583_s30 + $0x190] sm:$0xff] }
 0x210   :  { %v737_v38 = vpop.f32.mrb[30].mxu1 }
 0x211   :  { %v504_v39 = vpop.f32.mrb[30].mxu0  ;;  %v8948_v40 = vpop.f32.mrb[31].mxu1 }
 0x212   :  { %v11844_v41 = vadd.f32 %v737_v38, %v504_v39  ;;  %v8877_v43 = vpop.f32.mrb[31].mxu0  ;;  %v7412_v38 = vld [vmem:[%s14581_s29 + $0x210] sm:$0xff]  ;;  %v7413_v39 = vld [vmem:[%s14581_s29 + $0x218] sm:$0xff] }
 0x213   :  { %v7273_v40 = vld [vmem:[%s14583_s30 + $0x150] sm:$0xff]  ;;  %v10597_v43 = vpack.c.bf16 %v7413_v39, %v7412_v38  ;;  %v7284_v39 = vld [vmem:[%s14583_s30 + $0x1a8] sm:$0xff] }
 0x214   :  { %v742_v49 = vpop.f32.mrb[32].mxu1  ;;  %v7334_v38 = vld [vmem:[%s14583_s30 + $0x210] sm:$0xff] }
 0x215   :  { %v509_v44 = vpop.f32.mrb[32].mxu0  ;;  %v8951_v50 = vpop.f32.mrb[33].mxu1 }
 0x216   :  { %v11846_v51 = vadd.f32 %v742_v49, %v509_v44  ;;  %v8880_v46 = vpop.f32.mrb[33].mxu0  ;;  %v7414_v49 = vld [vmem:[%s14581_s29 + $0x220] sm:$0xff]  ;;  %v7415_v44 = vld [vmem:[%s14581_s29 + $0x228] sm:$0xff]  ;;  %v7274_v50 = vld [vmem:[%s14583_s30 + $0x158] sm:$0xff] }
 0x217   :  { %v10601_v46 = vpack.c.bf16 %v7415_v44, %v7414_v49  ;;  %v7336_v49 = vld [vmem:[%s14583_s30 + $0x220] sm:$0xff]  ;;  %v7286_v44 = vld [vmem:[%s14583_s30 + $0x1b8] sm:$0xff] }
 0x218   :  { %v747_v47 = vpop.f32.mrb[34].mxu1 }
 0x219   :  { %v514_v48 = vpop.f32.mrb[34].mxu0  ;;  %v8954_v55 = vpop.f32.mrb[35].mxu1 }
 0x21a   :  { %v11848_v56 = vadd.f32 %v747_v47, %v514_v48  ;;  %v8883_v57 = vpop.f32.mrb[35].mxu0  ;;  %v7416_v47 = vld [vmem:[%s14581_s29 + $0x230] sm:$0xff]  ;;  %v7417_v48 = vld [vmem:[%s14581_s29 + $0x238] sm:$0xff]  ;;  %v7275_v55 = vld [vmem:[%s14583_s30 + $0x160] sm:$0xff] }
 0x21b   :  { %v10605_v57 = vpack.c.bf16 %v7417_v48, %v7416_v47  ;;  %v7338_v47 = vld [vmem:[%s14583_s30 + $0x230] sm:$0xff]  ;;  %v7288_v48 = vld [vmem:[%s14583_s30 + $0x1c8] sm:$0xff] }
 0x21c   :  { %v752_v58 = vpop.f32.mrb[36].mxu1 }
 0x21d   :  { %v519_v60 = vpop.f32.mrb[36].mxu0  ;;  %v8957_v61 = vpop.f32.mrb[37].mxu1 }
 0x21e   :  { %v11850_v62 = vadd.f32 %v752_v58, %v519_v60  ;;  %v8886_v63 = vpop.f32.mrb[37].mxu0  ;;  %v7418_v58 = vld [vmem:[%s14581_s29 + $0x240] sm:$0xff]  ;;  %v7419_v60 = vld [vmem:[%s14581_s29 + $0x248] sm:$0xff] }
 0x21f   :  { %v7276_v61 = vld [vmem:[%s14583_s30 + $0x168] sm:$0xff]  ;;  %v10609_v63 = vpack.c.bf16 %v7419_v60, %v7418_v58  ;;  %v7340_v58 = vld [vmem:[%s14583_s30 + $0x240] sm:$0xff]  ;;  %v7290_v60 = vld [vmem:[%s14583_s30 + $0x1d8] sm:$0xff] }
 0x220   :  { %v757_v1 = vpop.f32.mrb[38].mxu1 }
 0x221   :  { %v524_v2 = vpop.f32.mrb[38].mxu0  ;;  %v8960_v3 = vpop.f32.mrb[39].mxu1 }
 0x222   :  { %v11852_v4 = vadd.f32 %v757_v1, %v524_v2  ;;  %v8889_v6 = vpop.f32.mrb[39].mxu0  ;;  %v7420_v1 = vld [vmem:[%s14581_s29 + $0x250] sm:$0xff]  ;;  %v7421_v2 = vld [vmem:[%s14581_s29 + $0x258] sm:$0xff] }
 0x223   :  { %v7277_v3 = vld [vmem:[%s14583_s30 + $0x170] sm:$0xff]  ;;  %v10613_v6 = vpack.c.bf16 %v7421_v2, %v7420_v1  ;;  %v7292_v2 = vld [vmem:[%s14583_s30 + $0x1e8] sm:$0xff] }
 0x224   :  { %v762_v7 = vpop.f32.mrb[40].mxu1  ;;  %v7342_v1 = vld [vmem:[%s14583_s30 + $0x250] sm:$0xff] }
 0x225   :  { %v529_v8 = vpop.f32.mrb[40].mxu0  ;;  %v8963_v9 = vpop.f32.mrb[41].mxu1 }
 0x226   :  { %v11854_v11 = vadd.f32 %v762_v7, %v529_v8  ;;  %v8892_v12 = vpop.f32.mrb[41].mxu0  ;;  %v7422_v7 = vld [vmem:[%s14581_s29 + $0x260] sm:$0xff]  ;;  %v7423_v8 = vld [vmem:[%s14581_s29 + $0x268] sm:$0xff]  ;;  %v7278_v9 = vld [vmem:[%s14583_s30 + $0x178] sm:$0xff] }
 0x227   :  { %v10617_v12 = vpack.c.bf16 %v7423_v8, %v7422_v7  ;;  %v7344_v7 = vld [vmem:[%s14583_s30 + $0x260] sm:$0xff] }
 0x228   :  { %v767_v13 = vpop.f32.mrb[42].mxu1  ;;  %v11221_v8 = vld [vmem:[%s14582_s23] sm:$0xff] }
 0x229   :  { %v534_v14 = vpop.f32.mrb[42].mxu0  ;;  %v8966_v16 = vpop.f32.mrb[43].mxu1 }
 0x22a   :  { %v11856_v17 = vadd.f32 %v767_v13, %v534_v14  ;;  %v8895_v18 = vpop.f32.mrb[43].mxu0  ;;  %v7424_v13 = vld [vmem:[%s14581_s29 + $0x270] sm:$0xff]  ;;  %v7425_v14 = vld [vmem:[%s14581_s29 + $0x278] sm:$0xff] }
 0x22b   :  { %v7279_v18 = vld [vmem:[%s14583_s30 + $0x180] sm:$0xff] }
 0x22c   :  { %v772_v19 = vpop.f32.mrb[44].mxu1 }
 0x22d   :  { %v539_v21 = vpop.f32.mrb[44].mxu0  ;;  %v8969_v22 = vpop.f32.mrb[45].mxu1 }
 0x22e   :  { %v11858_v23 = vadd.f32 %v772_v19, %v539_v21  ;;  %v8898_v24 = vpop.f32.mrb[45].mxu0  ;;  %v10621_v22 = vpack.c.bf16 %v7425_v14, %v7424_v13  ;;  %v11223_v13 = vld [vmem:[%s14582_s23 + $0x10] sm:$0xff]  ;;  %v11224_v14 = vld [vmem:[%s14582_s23 + $0x18] sm:$0xff] }
 0x231   :  { %v9004_v26 = vpop.f32.mrb[46].mxu0 }
 0x232   :  { %v881_v27 = vpop.f32.mrb[47].mxu0 }
 0x233   :  { %v10550_v28 = vpack.c.bf16 %v9004_v26, %v881_v27  ;;  %v7280_v26 = vld [vmem:[%s14583_s30 + $0x188] sm:$0xff] }
 0x235   :  { %v9007_v32 = vpop.f32.mrb[48].mxu0  ;;  %10551 = vmatpush3.bf16.msra.mxu1 %v10550_v28 }
 0x236   :  { %v891_v33 = vpop.f32.mrb[49].mxu0  ;;  %10552 = vmatprep.subr.bf16.mxu1 %v11225_v52 }
 0x237   :  { %v10553_v36 = vpack.c.bf16 %v9007_v32, %v891_v33  ;;  %v7332_v32 = vld [vmem:[%s14583_s30 + $0x200] sm:$0xff]  ;;  %v7282_v33 = vld [vmem:[%s14583_s30 + $0x198] sm:$0xff] }
 0x239   :  { %10554 = vmatpush3.bf16.msra.mxu1 %v10553_v36  ;;  %v7283_v36 = vld [vmem:[%s14583_s30 + $0x1a0] sm:$0xff] }
 0x23a   :  { %10594 = vmatprep.subr.bf16.mxu1 %v10593_v34 }
 0x23c   :  { %9017 = vmatmul.mubr.msk.f32.vlgmr.msra.gmra.mrb[46].mxu1 %vm309_vm1, %v7273_v40  ;;  %v7335_v40 = vld [vmem:[%s14583_s30 + $0x218] sm:$0xff] }
 0x23d   :  { %9019 = vmatprep.mubr.msk.f32.mxu1 %vm11226_vm0, %v11227_v53  ;;  %10596 = vmatpush3.bf16.msra.mxu1 %v10593_v34  ;;  %v7333_v34 = vld [vmem:[%s14583_s30 + $0x208] sm:$0xff] }
 0x23e   :  { %10598 = vmatprep.subr.bf16.mxu1 %v10597_v43 }
 0x240   :  { %9020 = vmatmul.mubr.msk.f32.gmra.mrb[48].mxu1 %vm309_vm1, %v7274_v50  ;;  %v7337_v50 = vld [vmem:[%s14583_s30 + $0x228] sm:$0xff] }
 0x241   :  { %9022 = vmatprep.mubr.msk.f32.mxu1 %vm11226_vm0, %v11227_v53  ;;  %10600 = vmatpush3.bf16.msra.mxu1 %v10597_v43  ;;  %v7285_v43 = vld [vmem:[%s14583_s30 + $0x1b0] sm:$0xff] }
 0x242   :  { %10602 = vmatprep.subr.bf16.mxu1 %v10601_v46 }
 0x244   :  { %9023 = vmatmul.mubr.msk.f32.gmra.mrb[50].mxu1 %vm309_vm1, %v7275_v55  ;;  %v7339_v55 = vld [vmem:[%s14583_s30 + $0x238] sm:$0xff] }
 0x245   :  { %9025 = vmatprep.mubr.msk.f32.mxu1 %vm11226_vm0, %v11227_v53  ;;  %10604 = vmatpush3.bf16.msra.mxu1 %v10601_v46  ;;  %v7287_v46 = vld [vmem:[%s14583_s30 + $0x1c0] sm:$0xff] }
 0x246   :  { %10606 = vmatprep.subr.bf16.mxu1 %v10605_v57 }
 0x248   :  { %9026 = vmatmul.mubr.msk.f32.gmra.mrb[52].mxu1 %vm309_vm1, %v7276_v61  ;;  %v7341_v61 = vld [vmem:[%s14583_s30 + $0x248] sm:$0xff] }
 0x249   :  { %9028 = vmatprep.mubr.msk.f32.mxu1 %vm11226_vm0, %v11227_v53  ;;  %10608 = vmatpush3.bf16.msra.mxu1 %v10605_v57  ;;  %v7289_v57 = vld [vmem:[%s14583_s30 + $0x1d0] sm:$0xff] }
 0x24a   :  { %10610 = vmatprep.subr.bf16.mxu1 %v10609_v63 }
 0x24c   :  { %9029 = vmatmul.mubr.msk.f32.gmra.mrb[54].mxu1 %vm309_vm1, %v7277_v3  ;;  %v7343_v3 = vld [vmem:[%s14583_s30 + $0x258] sm:$0xff] }
 0x24d   :  { %9031 = vmatprep.mubr.msk.f32.mxu1 %vm11226_vm0, %v11227_v53  ;;  %10612 = vmatpush3.bf16.msra.mxu1 %v10609_v63  ;;  %v7291_v63 = vld [vmem:[%s14583_s30 + $0x1e0] sm:$0xff] }
 0x24e   :  { %10614 = vmatprep.subr.bf16.mxu1 %v10613_v6 }
 0x250   :  { %9032 = vmatmul.mubr.msk.f32.gmra.mrb[56].mxu1 %vm309_vm1, %v7278_v9  ;;  %v11222_v9 = vld [vmem:[%s14582_s23 + $0x8] sm:$0xff] }
 0x251   :  { %v9113_v16 = vpop.f32.mrb[50].mxu0  ;;  %9034 = vmatprep.mubr.msk.f32.mxu1 %vm11226_vm0, %v11227_v53  ;;  %10616 = vmatpush3.bf16.msra.mxu1 %v10613_v6  ;;  %v7293_v6 = vld [vmem:[%s14583_s30 + $0x1f0] sm:$0xff] }
 0x252   :  { %v1259_v19 = vpop.f32.mrb[51].mxu0  ;;  %10618 = vmatprep.subr.bf16.mxu1 %v10617_v12 }
 0x253   :  { %v10588_v21 = vpack.c.bf16 %v9113_v16, %v1259_v19  ;;  %v7346_v16 = vld [vmem:[%s14583_s30 + $0x270] sm:$0xff]  ;;  %v7348_v19 = vld [vmem:[%s14583_s30 + $0x280] sm:$0xff] }
 0x254   :  { %9035 = vmatmul.mubr.msk.f32.gmra.mrb[58].mxu1 %vm309_vm1, %v7279_v18  ;;  %v7347_v18 = vld [vmem:[%s14583_s30 + $0x278] sm:$0xff] }
 0x255   :  { %v9116_v24 = vpop.f32.mrb[52].mxu0  ;;  %10589 = vmatpush3.bf16.msra.mxu0 %v10588_v21  ;;  %9037 = vmatprep.mubr.msk.f32.mxu1 %vm11226_vm0, %v11227_v53  ;;  %v7349_v21 = vld [vmem:[%s14583_s30 + $0x288] sm:$0xff] }
 0x256   :  { %v1269_v27 = vpop.f32.mrb[53].mxu0  ;;  %10590 = vmatprep.subr.bf16.mxu0 %v11225_v52  ;;  %10620 = vmatpush3.bf16.msra.mxu1 %v10617_v12  ;;  %v7345_v12 = vld [vmem:[%s14583_s30 + $0x268] sm:$0xff] }
 0x257   :  { %v10591_v28 = vpack.c.bf16 %v9116_v24, %v1269_v27  ;;  %10622 = vmatprep.subr.bf16.mxu1 %v10621_v22  ;;  %v7351_v24 = vld [vmem:[%s14583_s30 + $0x298] sm:$0xff]  ;;  %v1910_v27 = vld [vmem:[%s14559_s3] sm:$0xff] }
 0x258   :  { %9038 = vmatmul.mubr.msk.f32.gmra.mrb[60].mxu1 %vm309_vm1, %v7280_v26  ;;  %v11228_v26 = vmov 0  }
 0x259   :  { %10592 = vmatpush3.bf16.msra.mxu0 %v10591_v28  ;;  %9040 = vmatprep.mubr.msk.f32.mxu1 %vm11226_vm0, %v11227_v53  ;;  %v1911_v28 = vld [vmem:[%s14559_s3 + $0x8] sm:$0xff] }
 0x25a   :  { %10624 = vmatpush3.bf16.msra.mxu1 %v10621_v22  ;;  %10631 = vmatprep.subr.bf16.mxu0 %v11225_v52  ;;  %v7350_v22 = vld [vmem:[%s14583_s30 + $0x290] sm:$0xff] }
 0x25b   :  { %10625 = vmatprep.subr.bf16.mxu1 %v11225_v52  ;;  %11085 = vset.pattern.permute.xlu0 %v11228_v26 }
 0x25c   :  { %9126 = vmatmul.mubr.msk.f32.vlgmr.msra.gmra.mrb[54].mxu0 %vm309_vm1, %v7331_v29  ;;  %9041 = vmatmul.mubr.msk.f32.gmra.mrb[62].mxu1 %vm309_vm1, %v7281_v31  ;;  %v1914_v29 = vld [vmem:[%s14559_s3 + $0x20] sm:$0xff]  ;;  %v1912_v31 = vld [vmem:[%s14559_s3 + $0x10] sm:$0xff] }
 0x25d   :  { %9128 = vmatprep.mubr.msk.f32.mxu0 %vm11226_vm0, %v11227_v53  ;;  %9043 = vmatprep.mubr.msk.f32.mxu1 %vm11226_vm0, %v11227_v53 }
 0x25e   :  { %11086 = vset.pattern.permute.xlu1 %v11228_v26  ;;  %1933 = vperm.xlu0 %11085, %v1910_v27  }
 0x25f   :  { %1943 = vperm.xlu1 %11086, %v1912_v31  }
 0x260   :  { %9129 = vmatmul.mubr.msk.f32.gmra.mrb[56].mxu0 %vm309_vm1, %v7332_v32  ;;  %9044 = vmatmul.mubr.msk.f32.gmra.mrb[64].mxu1 %vm309_vm1, %v7282_v33  ;;  %v1916_v32 = vld [vmem:[%s14559_s3 + $0x30] sm:$0xff]  ;;  %v1913_v33 = vld [vmem:[%s14559_s3 + $0x18] sm:$0xff] }
 0x261   :  { %9131 = vmatprep.mubr.msk.f32.mxu0 %vm11226_vm0, %v11227_v53  ;;  %9046 = vmatprep.mubr.msk.f32.mxu1 %vm11226_vm0, %v11227_v53 }
 0x262   :  { %1938 = vperm.xlu0 %11085, %v1911_v28   ;;  %v4497_v28 = vld [vmem:[%s14560_s8 + $0x80] sm:$0xff] }
 0x263   :  { %1948 = vperm.xlu1 %11086, %v1913_v33  }
 0x264   :  { %9132 = vmatmul.mubr.msk.f32.gmra.mrb[58].mxu0 %vm309_vm1, %v7333_v34  ;;  %9047 = vmatmul.mubr.msk.f32.gmra.mrb[66].mxu1 %vm309_vm1, %v7283_v36  ;;  %v1918_v34 = vld [vmem:[%s14559_s3 + $0x40] sm:$0xff]  ;;  %v1915_v36 = vld [vmem:[%s14559_s3 + $0x28] sm:$0xff] }
 0x265   :  { %9134 = vmatprep.mubr.msk.f32.mxu0 %vm11226_vm0, %v11227_v53  ;;  %9049 = vmatprep.mubr.msk.f32.mxu1 %vm11226_vm0, %v11227_v53 }
 0x266   :  { %1953 = vperm.xlu0 %11085, %v1914_v29   ;;  %v6727_v29 = vld [vmem:[%s14561_s13 + $0x8] sm:$0xff] }
 0x267   :  { %1958 = vperm.xlu1 %11086, %v1915_v36  }
 0x268   :  { %9135 = vmatmul.mubr.msk.f32.gmra.mrb[60].mxu0 %vm309_vm1, %v7334_v38  ;;  %9050 = vmatmul.mubr.msk.f32.gmra.mrb[68].mxu1 %vm309_vm1, %v7284_v39  ;;  %v1920_v38 = vld [vmem:[%s14559_s3 + $0x50] sm:$0xff]  ;;  %v1917_v39 = vld [vmem:[%s14559_s3 + $0x38] sm:$0xff] }
 0x269   :  { %9137 = vmatprep.mubr.msk.f32.mxu0 %vm11226_vm0, %v11227_v53  ;;  %9052 = vmatprep.mubr.msk.f32.mxu1 %vm11226_vm0, %v11227_v53 }
 0x26a   :  { %1963 = vperm.xlu0 %11085, %v1916_v32  }
 0x26b   :  { %1968 = vperm.xlu1 %11086, %v1917_v39  }
 0x26c   :  { %9138 = vmatmul.mubr.msk.f32.gmra.mrb[62].mxu0 %vm309_vm1, %v7335_v40  ;;  %9053 = vmatmul.mubr.msk.f32.gmra.mrb[70].mxu1 %vm309_vm1, %v7285_v43  ;;  %v1922_v40 = vld [vmem:[%s14559_s3 + $0x60] sm:$0xff]  ;;  %v1919_v43 = vld [vmem:[%s14559_s3 + $0x48] sm:$0xff] }
 0x26d   :  { %9140 = vmatprep.mubr.msk.f32.mxu0 %vm11226_vm0, %v11227_v53  ;;  %9055 = vmatprep.mubr.msk.f32.mxu1 %vm11226_vm0, %v11227_v53 }
 0x26e   :  { %1973 = vperm.xlu0 %11085, %v1918_v34   ;;  %v4499_v34 = vld [vmem:[%s14560_s8 + $0x90] sm:$0xff] }
 0x26f   :  { %1978 = vperm.xlu1 %11086, %v1919_v43  }
 0x270   :  { %9141 = vmatmul.mubr.msk.f32.gmra.mrb[64].mxu0 %vm309_vm1, %v7336_v49  ;;  %9056 = vmatmul.mubr.msk.f32.gmra.mrb[72].mxu1 %vm309_vm1, %v7286_v44  ;;  %v1924_v49 = vld [vmem:[%s14559_s3 + $0x70] sm:$0xff]  ;;  %v1921_v44 = vld [vmem:[%s14559_s3 + $0x58] sm:$0xff] }
 0x271   :  { %9143 = vmatprep.mubr.msk.f32.mxu0 %vm11226_vm0, %v11227_v53  ;;  %9058 = vmatprep.mubr.msk.f32.mxu1 %vm11226_vm0, %v11227_v53 }
 0x272   :  { %1983 = vperm.xlu0 %11085, %v1920_v38  }
 0x273   :  { %1988 = vperm.xlu1 %11086, %v1921_v44  }
 0x274   :  { %9144 = vmatmul.mubr.msk.f32.gmra.mrb[66].mxu0 %vm309_vm1, %v7337_v50  ;;  %9059 = vmatmul.mubr.msk.f32.gmra.mrb[74].mxu1 %vm309_vm1, %v7287_v46  ;;  %v1926_v50 = vld [vmem:[%s14559_s3 + $0x80] sm:$0xff]  ;;  %v1923_v46 = vld [vmem:[%s14559_s3 + $0x68] sm:$0xff] }
 0x275   :  { %9146 = vmatprep.mubr.msk.f32.mxu0 %vm11226_vm0, %v11227_v53  ;;  %9061 = vmatprep.mubr.msk.f32.mxu1 %vm11226_vm0, %v11227_v53 }
 0x276   :  { %1993 = vperm.xlu0 %11085, %v1922_v40   ;;  %v6726_v40 = vld [vmem:[%s14561_s13] sm:$0xff] }
 0x277   :  { %1998 = vperm.xlu1 %11086, %v1923_v46  }
 0x278   :  { %9147 = vmatmul.mubr.msk.f32.gmra.mrb[68].mxu0 %vm309_vm1, %v7338_v47  ;;  %9062 = vmatmul.mubr.msk.f32.gmra.mrb[76].mxu1 %vm309_vm1, %v7288_v48  ;;  %v1928_v47 = vld [vmem:[%s14559_s3 + $0x90] sm:$0xff]  ;;  %v1925_v48 = vld [vmem:[%s14559_s3 + $0x78] sm:$0xff] }
 0x279   :  { %9149 = vmatprep.mubr.msk.f32.mxu0 %vm11226_vm0, %v11227_v53  ;;  %9064 = vmatprep.mubr.msk.f32.mxu1 %vm11226_vm0, %v11227_v53 }
 0x27a   :  { %2003 = vperm.xlu0 %11085, %v1924_v49  }
 0x27b   :  { %2008 = vperm.xlu1 %11086, %v1925_v48  }
 0x27c   :  { %9150 = vmatmul.mubr.msk.f32.gmra.mrb[70].mxu0 %vm309_vm1, %v7339_v55  ;;  %9065 = vmatmul.mubr.msk.f32.gmra.mrb[78].mxu1 %vm309_vm1, %v7289_v57  ;;  %v1930_v55 = vld [vmem:[%s14559_s3 + $0xa0] sm:$0xff]  ;;  %v1927_v57 = vld [vmem:[%s14559_s3 + $0x88] sm:$0xff] }
 0x27d   :  { %9152 = vmatprep.mubr.msk.f32.mxu0 %vm11226_vm0, %v11227_v53  ;;  %9067 = vmatprep.mubr.msk.f32.mxu1 %vm11226_vm0, %v11227_v53 }
 0x27e   :  { %2013 = vperm.xlu0 %11085, %v1926_v50   ;;  %v6733_v50 = vld [vmem:[%s14561_s13 + $0x38] sm:$0xff] }
 0x27f   :  { %2018 = vperm.xlu1 %11086, %v1927_v57  }
 0x280   :  { %9153 = vmatmul.mubr.msk.f32.gmra.mrb[72].mxu0 %vm309_vm1, %v7340_v58  ;;  %9068 = vmatmul.mubr.msk.f32.gmra.mrb[80].mxu1 %vm309_vm1, %v7290_v60  ;;  %v4482_v58 = vld [vmem:[%s14560_s8 + $0x8] sm:$0xff]  ;;  %v1929_v60 = vld [vmem:[%s14559_s3 + $0x98] sm:$0xff] }
 0x281   :  { %9155 = vmatprep.mubr.msk.f32.mxu0 %vm11226_vm0, %v11227_v53  ;;  %9070 = vmatprep.mubr.msk.f32.mxu1 %vm11226_vm0, %v11227_v53 }
 0x282   :  { %2023 = vperm.xlu0 %11085, %v1928_v47  }
 0x283   :  { %2028 = vperm.xlu1 %11086, %v1929_v60  }
 0x284   :  { %9156 = vmatmul.mubr.msk.f32.gmra.mrb[74].mxu0 %vm309_vm1, %v7341_v61  ;;  %9071 = vmatmul.mubr.msk.f32.gmra.mrb[82].mxu1 %vm309_vm1, %v7291_v63  ;;  %v4484_v61 = vld [vmem:[%s14560_s8 + $0x18] sm:$0xff]  ;;  %v4481_v63 = vld [vmem:[%s14560_s8] sm:$0xff] }
 0x285   :  { %9158 = vmatprep.mubr.msk.f32.mxu0 %vm11226_vm0, %v11227_v53  ;;  %9073 = vmatprep.mubr.msk.f32.mxu1 %vm11226_vm0, %v11227_v53 }
 0x286   :  { %2033 = vperm.xlu0 %11085, %v1930_v55   ;;  %v6735_v55 = vld [vmem:[%s14561_s13 + $0x48] sm:$0xff] }
 0x287   :  { %4503 = vperm.xlu1 %11086, %v4481_v63  }
 0x288   :  { %9159 = vmatmul.mubr.msk.f32.gmra.mrb[76].mxu0 %vm309_vm1, %v7342_v1  ;;  %9074 = vmatmul.mubr.msk.f32.gmra.mrb[84].mxu1 %vm309_vm1, %v7292_v2  ;;  %v4486_v1 = vld [vmem:[%s14560_s8 + $0x28] sm:$0xff]  ;;  %v4483_v2 = vld [vmem:[%s14560_s8 + $0x10] sm:$0xff] }
 0x289   :  { %9161 = vmatprep.mubr.msk.f32.mxu0 %vm11226_vm0, %v11227_v53  ;;  %9076 = vmatprep.mubr.msk.f32.mxu1 %vm11226_vm0, %v11227_v53 }
 0x28a   :  { %4508 = vperm.xlu0 %11085, %v4482_v58  }
 0x28b   :  { %4513 = vperm.xlu1 %11086, %v4483_v2  }
 0x28c   :  { %9162 = vmatmul.mubr.msk.f32.gmra.mrb[78].mxu0 %vm309_vm1, %v7343_v3  ;;  %9077 = vmatmul.mubr.msk.f32.gmra.mrb[86].mxu1 %vm309_vm1, %v7293_v6  ;;  %v4488_v3 = vld [vmem:[%s14560_s8 + $0x38] sm:$0xff]  ;;  %v4485_v6 = vld [vmem:[%s14560_s8 + $0x20] sm:$0xff] }
 0x28d   :  { %9164 = vmatprep.mubr.msk.f32.mxu0 %vm11226_vm0, %v11227_v53  ;;  %9220 = vmatprep.mubr.f32.mxu1 %v11221_v8  ;;  %v4487_v8 = vld [vmem:[%s14560_s8 + $0x30] sm:$0xff] }
 0x28e   :  { %4518 = vperm.xlu0 %11085, %v4484_v61   ;;  %v6737_v61 = vld [vmem:[%s14561_s13 + $0x58] sm:$0xff] }
 0x28f   :  { %4523 = vperm.xlu1 %11086, %v4485_v6  }
 0x290   :  { %9165 = vmatmul.mubr.msk.f32.gmra.mrb[80].mxu0 %vm309_vm1, %v7344_v7  ;;  %9221 = vmatmul.mubr.f32.vlgmr.msra.gmra.mrb[88].mxu1 %v11222_v9  ;;  %v4490_v7 = vld [vmem:[%s14560_s8 + $0x48] sm:$0xff]  ;;  %v4492_v9 = vld [vmem:[%s14560_s8 + $0x58] sm:$0xff] }
 0x291   :  { %9167 = vmatprep.mubr.msk.f32.mxu0 %vm11226_vm0, %v11227_v53  ;;  %9223 = vmatprep.mubr.f32.mxu1 %v11223_v13  ;;  %v4494_v13 = vld [vmem:[%s14560_s8 + $0x68] sm:$0xff] }
 0x292   :  { %4528 = vperm.xlu0 %11085, %v4486_v1  }
 0x293   :  { %4533 = vperm.xlu1 %11086, %v4487_v8  }
 0x294   :  { %9168 = vmatmul.mubr.msk.f32.gmra.mrb[82].mxu0 %vm309_vm1, %v7345_v12  ;;  %9224 = vmatmul.mubr.f32.gmra.mrb[90].mxu1 %v11224_v14  ;;  %v4489_v12 = vld [vmem:[%s14560_s8 + $0x40] sm:$0xff]  ;;  %v4491_v14 = vld [vmem:[%s14560_s8 + $0x50] sm:$0xff] }
 0x295   :  { %9170 = vmatprep.mubr.msk.f32.mxu0 %vm11226_vm0, %v11227_v53  ;;  %9234 = vmatprep.mubr.msk.f32.mxu1 %vm11226_vm0, %v11227_v53 }
 0x296   :  { %4538 = vperm.xlu0 %11085, %v4488_v3   ;;  %v6739_v3 = vld [vmem:[%s14561_s13 + $0x68] sm:$0xff] }
 0x297   :  { %4543 = vperm.xlu1 %11086, %v4489_v12  }
 0x298   :  { %9171 = vmatmul.mubr.msk.f32.gmra.mrb[84].mxu0 %vm309_vm1, %v7346_v16  ;;  %v4496_v16 = vld [vmem:[%s14560_s8 + $0x78] sm:$0xff] }
 0x299   :  { %9173 = vmatprep.mubr.msk.f32.mxu0 %vm11226_vm0, %v11227_v53 }
 0x29a   :  { %4548 = vperm.xlu0 %11085, %v4490_v7  }
 0x29b   :  { %4553 = vperm.xlu1 %11086, %v4491_v14  }
 0x29c   :  { %9174 = vmatmul.mubr.msk.f32.gmra.mrb[86].mxu0 %vm309_vm1, %v7347_v18  ;;  %v4493_v18 = vld [vmem:[%s14560_s8 + $0x60] sm:$0xff] }
 0x29d   :  { %9176 = vmatprep.mubr.msk.f32.mxu0 %vm11226_vm0, %v11227_v53 }
 0x29e   :  { %4558 = vperm.xlu0 %11085, %v4492_v9   ;;  %v6857_v9 = vld [vmem:[%s14562_s15] sm:$0xff] }
 0x29f   :  { %4563 = vperm.xlu1 %11086, %v4493_v18  }
 0x2a0   :  { %9177 = vmatmul.mubr.msk.f32.gmra.mrb[88].mxu0 %vm309_vm1, %v7348_v19  ;;  %v4498_v19 = vld [vmem:[%s14560_s8 + $0x88] sm:$0xff] }
 0x2a1   :  { %9179 = vmatprep.mubr.msk.f32.mxu0 %vm11226_vm0, %v11227_v53 }
 0x2a2   :  { %4568 = vperm.xlu0 %11085, %v4494_v13  }
 0x2a4   :  { %9180 = vmatmul.mubr.msk.f32.gmra.mrb[90].mxu0 %vm309_vm1, %v7349_v21  ;;  %v4495_v21 = vld [vmem:[%s14560_s8 + $0x70] sm:$0xff] }
 0x2a5   :  { %9182 = vmatprep.mubr.msk.f32.mxu0 %vm11226_vm0, %v11227_v53  ;;  %4573 = vperm.xlu1 %11086, %v4495_v21   ;;  %v6859_v21 = vld [vmem:[%s14562_s15 + $0x10] sm:$0xff] }
 0x2a6   :  { %4578 = vperm.xlu0 %11085, %v4496_v16  }
 0x2a8   :  { %9183 = vmatmul.mubr.msk.f32.gmra.mrb[92].mxu0 %vm309_vm1, %v7350_v22  ;;  %v4500_v22 = vld [vmem:[%s14560_s8 + $0x98] sm:$0xff] }
 0x2a9   :  { %9185 = vmatprep.mubr.msk.f32.mxu0 %vm11226_vm0, %v11227_v53  ;;  %4583 = vperm.xlu1 %11086, %v4497_v28  }
 0x2aa   :  { %4588 = vperm.xlu0 %11085, %v4498_v19  }
 0x2ac   :  { %9186 = vmatmul.mubr.msk.f32.gmra.mrb[94].mxu0 %vm309_vm1, %v7351_v24 }
 0x2ad   :  { %9325 = vmatprep.mubr.msk.f32.mxu0 %vm11226_vm0, %v11227_v53  ;;  %4593 = vperm.xlu1 %11086, %v4499_v34  }
 0x2ae   :  { %4598 = vperm.xlu0 %11085, %v4500_v22  }
 0x2b1   :  { %6743 = vperm.xlu1 %11086, %v6726_v40   ;;  %v6863_v40 = vld [vmem:[%s14562_s15 + $0x30] sm:$0xff] }
 0x2b2   :  { %6748 = vperm.xlu0 %11085, %v6727_v29  }
 0x30f   :  { %v1029_v24 = vpop.f32.mrb[46].mxu1 }
 0x310   :  { %v9018_v26 = vpop.f32.mrb[47].mxu1  ;;  %v1133_v27 = vadd.f32 %v1029_v24, %v11818_v37  ;;  %v6729_v37 = vld [vmem:[%s14561_s13 + $0x18] sm:$0xff] }
 0x311   :  { %6758 = vperm.xlu0 %11085, %v6729_v37  }
 0x313   :  { %v1034_v31 = vpop.f32.mrb[48].mxu1 }
 0x314   :  { %v9021_v32 = vpop.f32.mrb[49].mxu1  ;;  %v1134_v33 = vadd.f32 %v1034_v31, %v11820_v42  ;;  %v6731_v42 = vld [vmem:[%s14561_s13 + $0x28] sm:$0xff]  ;;  %v6861_v31 = vld [vmem:[%s14562_s15 + $0x20] sm:$0xff] }
 0x315   :  { %6768 = vperm.xlu0 %11085, %v6731_v42  }
 0x317   :  { %v1039_v36 = vpop.f32.mrb[50].mxu1 }
 0x318   :  { %v9024_v38 = vpop.f32.mrb[51].mxu1  ;;  %v12308_v39 = vadd.f32 %v1039_v36, %v11822_v45  ;;  %v6728_v45 = vld [vmem:[%s14561_s13 + $0x10] sm:$0xff] }
 0x319   :  { %6753 = vperm.xlu1 %11086, %v6728_v45   ;;  %6778 = vperm.xlu0 %11085, %v6733_v50   ;;  %v6858_v38 = vld [vmem:[%s14562_s15 + $0x8] sm:$0xff]  ;;  %v6860_v50 = vld [vmem:[%s14562_s15 + $0x18] sm:$0xff] }
 0x31b   :  { %v1044_v43 = vpop.f32.mrb[52].mxu1 }
 0x31c   :  { %v9027_v49 = vpop.f32.mrb[53].mxu1  ;;  %v12317_v44 = vadd.f32 %v1044_v43, %v11824_v54  ;;  %v6730_v54 = vld [vmem:[%s14561_s13 + $0x20] sm:$0xff] }
 0x31d   :  { %6763 = vperm.xlu1 %11086, %v6730_v54   ;;  %6788 = vperm.xlu0 %11085, %v6735_v55  }
 0x31f   :  { %v1049_v46 = vpop.f32.mrb[54].mxu1 }
 0x320   :  { %v9030_v47 = vpop.f32.mrb[55].mxu1  ;;  %v12326_v48 = vadd.f32 %v1049_v46, %v11826_v59  ;;  %v6732_v59 = vld [vmem:[%s14561_s13 + $0x30] sm:$0xff]  ;;  %v6865_v46 = vld [vmem:[%s14562_s15 + $0x40] sm:$0xff] }
 0x321   :  { %6773 = vperm.xlu1 %11086, %v6732_v59   ;;  %6798 = vperm.xlu0 %11085, %v6737_v61   ;;  %v6867_v47 = vld [vmem:[%s14562_s15 + $0x50] sm:$0xf]  ;;  %v2100_v61 = vld [vmem:[%s14563_s5] sm:$0xff] }
 0x323   :  { %v1054_v57 = vpop.f32.mrb[56].mxu1 }
 0x324   :  { %v9033_v58 = vpop.f32.mrb[57].mxu1  ;;  %v12335_v60 = vadd.f32 %v1054_v57, %v11828_v0  ;;  %v6734_v0 = vld [vmem:[%s14561_s13 + $0x40] sm:$0xff] }
 0x325   :  { %6783 = vperm.xlu1 %11086, %v6734_v0   ;;  %6808 = vperm.xlu0 %11085, %v6739_v3   ;;  %v6864_v0 = vld [vmem:[%s14562_s15 + $0x38] sm:$0xff]  ;;  %v7091_v3 = vld [vmem:[%s14564_s17 + $0x8] sm:$0x3] }
 0x327   :  { %v1059_v63 = vpop.f32.mrb[58].mxu1 }
 0x328   :  { %v9036_v1 = vpop.f32.mrb[59].mxu1  ;;  %v12344_v2 = vadd.f32 %v1059_v63, %v11830_v5  ;;  %v6736_v5 = vld [vmem:[%s14561_s13 + $0x50] sm:$0xff]  ;;  %v2101_v63 = vld [vmem:[%s14563_s5 + $0x8] sm:$0xff] }
 0x329   :  { %6793 = vperm.xlu1 %11086, %v6736_v5   ;;  %6870 = vperm.xlu0 %11085, %v6857_v9   ;;  %v2102_v1 = vld [vmem:[%s14563_s5 + $0x10] sm:$0xff] }
 0x32b   :  { %v1064_v6 = vpop.f32.mrb[60].mxu1 }
 0x32c   :  { %v9039_v7 = vpop.f32.mrb[61].mxu1  ;;  %v12353_v8 = vadd.f32 %v1064_v6, %v11832_v10  ;;  %v6738_v10 = vld [vmem:[%s14561_s13 + $0x60] sm:$0xff] }
 0x32d   :  { %6803 = vperm.xlu1 %11086, %v6738_v10   ;;  %6880 = vperm.xlu0 %11085, %v6859_v21   ;;  %v2105_v10 = vld [vmem:[%s14563_s5 + $0x28] sm:$0xff] }
 0x32f   :  { %v1407_v12 = vpop.f32.mrb[54].mxu0  ;;  %v1069_v13 = vpop.f32.mrb[62].mxu1 }
 0x330   :  { %v12361_v14 = vadd.f32 %v1407_v12, %v1133_v27  ;;  %v9127_v16 = vpop.f32.mrb[55].mxu0  ;;  %v9042_v18 = vpop.f32.mrb[63].mxu1  ;;  %v12364_v19 = vadd.f32 %v1069_v13, %v11834_v15  ;;  %v6740_v15 = vld [vmem:[%s14561_s13 + $0x70] sm:$0xff] }
 0x331   :  { %6813 = vperm.xlu1 %11086, %v6740_v15   ;;  %6890 = vperm.xlu0 %11085, %v6861_v31   ;;  %v2104_v18 = vld [vmem:[%s14563_s5 + $0x20] sm:$0xff] }
 0x332   :  { %v7090_v31 = vld [vmem:[%s14564_s17] sm:$0xff] }
 0x333   :  { %v1412_v22 = vpop.f32.mrb[56].mxu0  ;;  %v1074_v24 = vpop.f32.mrb[64].mxu1 }
 0x334   :  { %v12372_v26 = vadd.f32 %v1412_v22, %v1134_v33  ;;  %v9130_v27 = vpop.f32.mrb[57].mxu0  ;;  %v9045_v28 = vpop.f32.mrb[65].mxu1  ;;  %v12375_v29 = vadd.f32 %v1074_v24, %v11836_v20 }
 0x335   :  { %6875 = vperm.xlu1 %11086, %v6858_v38   ;;  %6900 = vperm.xlu0 %11085, %v6863_v40  }
 0x337   :  { %v1417_v32 = vpop.f32.mrb[58].mxu0  ;;  %v1079_v34 = vpop.f32.mrb[66].mxu1 }
 0x338   :  { %v12384_v33 = vadd.f32 %v1417_v32, %v12308_v39  ;;  %v9133_v37 = vpop.f32.mrb[59].mxu0  ;;  %v9048_v36 = vpop.f32.mrb[67].mxu1  ;;  %v12387_v20 = vadd.f32 %v1079_v34, %v11838_v25 }
 0x339   :  { %6885 = vperm.xlu1 %11086, %v6860_v50   ;;  %6910 = vperm.xlu0 %11085, %v6865_v46  }
 0x33b   :  { %v1422_v42 = vpop.f32.mrb[60].mxu0  ;;  %v1084_v43 = vpop.f32.mrb[68].mxu1 }
 0x33c   :  { %v12396_v39 = vadd.f32 %v1422_v42, %v12317_v44  ;;  %v9136_v49 = vpop.f32.mrb[61].mxu0  ;;  %v9051_v45 = vpop.f32.mrb[69].mxu1  ;;  %v12399_v25 = vadd.f32 %v1084_v43, %v11840_v30  ;;  %v6862_v44 = vld [vmem:[%s14562_s15 + $0x28] sm:$0xff] }
 0x33d   :  { %6895 = vperm.xlu1 %11086, %v6862_v44   ;;  %6920 = vperm.xlu0 %11085, %v6867_v47  }
 0x33f   :  { %v1427_v30 = vpop.f32.mrb[62].mxu0  ;;  %v1089_v54 = vpop.f32.mrb[70].mxu1 }
 0x340   :  { %v12414_v55 = vadd.f32 %v1427_v30, %v12326_v48  ;;  %v9139_v57 = vpop.f32.mrb[63].mxu0  ;;  %v9054_v58 = vpop.f32.mrb[71].mxu1  ;;  %v12417_v59 = vadd.f32 %v1089_v54, %v11842_v35  ;;  %v10632_v48 = vpack.c.bf16 %v2101_v63, %v2100_v61  ;;  %v2103_v35 = vld [vmem:[%s14563_s5 + $0x18] sm:$0xff] }
 0x341   :  { %v10635_v5 = vpack.c.bf16 %v2103_v35, %v2102_v1  ;;  %6905 = vperm.xlu1 %11086, %v6864_v0   ;;  %7099 = vperm.xlu0 %11085, %v7091_v3  }
 0x342   :  { %10633 = vmatpush3.bf16.msra.mxu0 %v10632_v48 }
 0x343   :  { %v1432_v6 = vpop.f32.mrb[64].mxu0  ;;  %v1094_v7 = vpop.f32.mrb[72].mxu1  ;;  %10634 = vmatprep.subr.bf16.mxu0 %v11225_v52 }
 0x344   :  { %v12438_v9 = vadd.f32 %v1432_v6, %v12335_v60  ;;  %v9142_v12 = vpop.f32.mrb[65].mxu0  ;;  %v9057_v13 = vpop.f32.mrb[73].mxu1  ;;  %v1146_v16 = vadd.f32 %v1094_v7, %v11844_v41  ;;  %v6866_v60 = vld [vmem:[%s14562_s15 + $0x48] sm:$0xff]  ;;  %v10638_v41 = vpack.c.bf16 %v2105_v10, %v2104_v18 }
 0x345   :  { %6915 = vperm.xlu1 %11086, %v6866_v60  }
 0x346   :  { %10636 = vmatpush3.bf16.msra.mxu0 %v10635_v5 }
 0x347   :  { %v1437_v21 = vpop.f32.mrb[66].mxu0  ;;  %v1099_v22 = vpop.f32.mrb[74].mxu1  ;;  %10637 = vmatprep.subr.bf16.mxu0 %v11225_v52 }
 0x348   :  { %v12452_v24 = vadd.f32 %v1437_v21, %v12344_v2  ;;  %v9145_v27 = vpop.f32.mrb[67].mxu0  ;;  %v9060_v28 = vpop.f32.mrb[75].mxu1  ;;  %v1147_v15 = vadd.f32 %v1099_v22, %v11846_v51 }
 0x349   :  { %7094 = vperm.xlu1 %11086, %v7090_v31  }
 0x34a   :  { %10639 = vmatpush3.bf16.msra.mxu0 %v10638_v41 }
 0x34b   :  { %v1442_v32 = vpop.f32.mrb[68].mxu0  ;;  %v1104_v34 = vpop.f32.mrb[76].mxu1  ;;  %10640 = vmatprep.subr.bf16.mxu0 %v11225_v52 }
 0x34c   :  { %v12460_v37 = vadd.f32 %v1442_v32, %v12353_v8  ;;  %v9148_v36 = vpop.f32.mrb[69].mxu0  ;;  %v9063_v2 = vpop.f32.mrb[77].mxu1  ;;  %v1148_v38 = vadd.f32 %v1104_v34, %v11848_v56 }
 0x34d   :  { %v7391_v36 = vld [vmem:[%s14583_s30 + $0x2b0] sm:$0xff] }
 0x34f   :  { %v1447_v51 = vpop.f32.mrb[70].mxu0  ;;  %v1109_v40 = vpop.f32.mrb[78].mxu1 }
 0x350   :  { %v12465_v42 = vadd.f32 %v1447_v51, %v12364_v19  ;;  %v9151_v43 = vpop.f32.mrb[71].mxu0  ;;  %v9066_v49 = vpop.f32.mrb[79].mxu1  ;;  %v1149_v45 = vadd.f32 %v1109_v40, %v11850_v62  ;;  %v7392_v40 = vld [vmem:[%s14583_s30 + $0x2b8] sm:$0xff] }
 0x353   :  { %v1452_v50 = vpop.f32.mrb[72].mxu0  ;;  %v1114_v46 = vpop.f32.mrb[80].mxu1 }
 0x354   :  { %v12469_v8 = vadd.f32 %v1452_v50, %v12375_v29  ;;  %v9154_v44 = vpop.f32.mrb[73].mxu0  ;;  %v9069_v47 = vpop.f32.mrb[81].mxu1  ;;  %v1150_v56 = vadd.f32 %v1114_v46, %v11852_v4  ;;  %v7393_v50 = vld [vmem:[%s14583_s30 + $0x2c0] sm:$0xff] }
 0x357   :  { %v1457_v30 = vpop.f32.mrb[74].mxu0  ;;  %v1119_v54 = vpop.f32.mrb[82].mxu1 }
 0x358   :  { %v12473_v57 = vadd.f32 %v1457_v30, %v12387_v20  ;;  %v9157_v19 = vpop.f32.mrb[75].mxu0  ;;  %v9072_v58 = vpop.f32.mrb[83].mxu1  ;;  %v1151_v61 = vadd.f32 %v1119_v54, %v11854_v11 }
 0x359   :  { %v7395_v19 = vld [vmem:[%s14583_s30 + $0x2d0] sm:$0xff]  ;;  %v7396_v58 = vld [vmem:[%s14583_s30 + $0x2d8] sm:$0xff] }
 0x35b   :  { %v1462_v63 = vpop.f32.mrb[76].mxu0  ;;  %v1124_v62 = vpop.f32.mrb[84].mxu1 }
 0x35c   :  { %v12477_v1 = vadd.f32 %v1462_v63, %v12399_v25  ;;  %v9160_v29 = vpop.f32.mrb[77].mxu0  ;;  %v9075_v48 = vpop.f32.mrb[85].mxu1  ;;  %v1152_v35 = vadd.f32 %v1124_v62, %v11856_v17  ;;  %v7398_v63 = vld [vmem:[%s14583_s30 + $0x2e8] sm:$0xff]  ;;  %v7399_v62 = vld [vmem:[%s14583_s30 + $0x2f0] sm:$0xff] }
 0x35d   :  { %v7400_v29 = vld [vmem:[%s14583_s30 + $0x2f8] sm:$0xff]  ;;  %v7401_v48 = vld [vmem:[%s14583_s30 + $0x300] sm:$0xff] }
 0x35f   :  { %v1467_v0 = vpop.f32.mrb[78].mxu0  ;;  %v1129_v4 = vpop.f32.mrb[86].mxu1 }
 0x360   :  { %v12481_v3 = vadd.f32 %v1467_v0, %v12417_v59  ;;  %v9163_v20 = vpop.f32.mrb[79].mxu0  ;;  %v9078_v6 = vpop.f32.mrb[87].mxu1  ;;  %v1153_v7 = vadd.f32 %v1129_v4, %v11858_v23  ;;  %v7389_v23 = vld [vmem:[%s14583_s30 + $0x2a0] sm:$0xff]  ;;  %v7403_v0 = vld [vmem:[%s14583_s30 + $0x310] sm:$0xff]  ;;  %v7404_v4 = vld [vmem:[%s14583_s30 + $0x318] sm:$0xff] }
 0x361   :  { %v7405_v20 = vld [vmem:[%s14583_s30 + $0x320] sm:$0xff]  ;;  %v7406_v6 = vld [vmem:[%s14583_s30 + $0x328] sm:$0xff] }
 0x363   :  { %v1472_v5 = vpop.f32.mrb[80].mxu0  ;;  %v9222_v11 = vpop.f32.mrb[88].mxu1 }
 0x364   :  { %v12484_v12 = vadd.f32 %v1472_v5, %v1146_v16  ;;  %v1637_v13 = vpop.f32.mrb[89].mxu1  ;;  %v9166_v25 = vpop.f32.mrb[81].mxu0  ;;  %v7408_v5 = vld [vmem:[%s14583_s30 + $0x338] sm:$0xff] }
 0x365   :  { %v10626_v18 = vpack.c.bf16 %v9222_v11, %v1637_v13  ;;  %v7409_v11 = vld [vmem:[%s14583_s30 + $0x340] sm:$0xff]  ;;  %v2106_v13 = vld [vmem:[%s14563_s5 + $0x30] sm:$0xff]  ;;  %v2107_v25 = vld [vmem:[%s14563_s5 + $0x38] sm:$0xff] }
 0x367   :  { %v1477_v10 = vpop.f32.mrb[82].mxu0  ;;  %v9225_v60 = vpop.f32.mrb[90].mxu1  ;;  %10627 = vmatpush3.bf16.msra.mxu1 %v10626_v18  ;;  %v10641_v18 = vpack.c.bf16 %v2107_v25, %v2106_v13 }
 0x368   :  { %v12486_v17 = vadd.f32 %v1477_v10, %v1147_v15  ;;  %v1647_v21 = vpop.f32.mrb[91].mxu1  ;;  %v9169_v22 = vpop.f32.mrb[83].mxu0  ;;  %10628 = vmatprep.subr.bf16.mxu1 %v11225_v52  ;;  %v7390_v15 = vld [vmem:[%s14583_s30 + $0x2a8] sm:$0xff]  ;;  %v2108_v10 = vld [vmem:[%s14563_s5 + $0x40] sm:$0xff] }
 0x369   :  { %v10629_v59 = vpack.c.bf16 %v9225_v60, %v1647_v21  ;;  %10642 = vmatpush3.bf16.msra.mxu0 %v10641_v18  ;;  %v2109_v60 = vld [vmem:[%s14563_s5 + $0x48] sm:$0xff]  ;;  %v2110_v22 = vld [vmem:[%s14563_s5 + $0x50] sm:$0xff] }
 0x36a   :  { %10643 = vmatprep.subr.bf16.mxu0 %v11225_v52  ;;  %v10644_v21 = vpack.c.bf16 %v2109_v60, %v2108_v10 }
 0x36b   :  { %v1482_v41 = vpop.f32.mrb[84].mxu0  ;;  %10630 = vmatpush3.bf16.msra.mxu1 %v10629_v59  ;;  %v2111_v59 = vld [vmem:[%s14563_s5 + $0x58] sm:$0xff] }
 0x36c   :  { %v12492_v16 = vadd.f32 %v1482_v41, %v1148_v38  ;;  %v9172_v27 = vpop.f32.mrb[85].mxu0  ;;  %10652 = vmatprep.subr.bf16.mxu1 %v11225_v52  ;;  %v10647_v41 = vpack.c.bf16 %v2111_v59, %v2110_v22 }
 0x36d   :  { %10645 = vmatpush3.bf16.msra.mxu0 %v10644_v21  ;;  %v2113_v27 = vld [vmem:[%s14563_s5 + $0x68] sm:$0xff] }
 0x36e   :  { %9235 = vmatmul.mubr.msk.f32.vlgmr.msra.gmra.mrb[92].mxu1 %vm309_vm1, %v7389_v23  ;;  %10646 = vmatprep.subr.bf16.mxu0 %v11225_v52  ;;  %v2112_v23 = vld [vmem:[%s14563_s5 + $0x60] sm:$0xff] }
 0x36f   :  { %v1487_v28 = vpop.f32.mrb[86].mxu0  ;;  %9237 = vmatprep.mubr.msk.f32.mxu1 %vm11226_vm0, %v11227_v53 }
 0x370   :  { %v12501_v31 = vadd.f32 %v1487_v28, %v1149_v45  ;;  %v9175_v32 = vpop.f32.mrb[87].mxu0  ;;  %v10650_v28 = vpack.c.bf16 %v2113_v27, %v2112_v23 }
 0x371   :  { %10648 = vmatpush3.bf16.msra.mxu0 %v10647_v41 }
 0x372   :  { %9238 = vmatmul.mubr.msk.f32.gmra.mrb[94].mxu1 %vm309_vm1, %v7390_v15  ;;  %10649 = vmatprep.subr.bf16.mxu0 %v11225_v52  ;;  %v1934_v15 = vpop.permute.xlu0 %1933 }
 0x373   :  { %v1492_v34 = vpop.f32.mrb[88].mxu0  ;;  %9240 = vmatprep.mubr.msk.f32.mxu1 %vm11226_vm0, %v11227_v53 }
 0x374   :  { %v12509_v2 = vadd.f32 %v1492_v34, %v1150_v56  ;;  %v9178_v38 = vpop.f32.mrb[89].mxu0  ;;  %v7394_v56 = vld [vmem:[%s14583_s30 + $0x2c8] sm:$0xff] }
 0x375   :  { %10651 = vmatpush3.bf16.msra.mxu0 %v10650_v28 }
 0x376   :  { %9241 = vmatmul.mubr.msk.f32.gmra.mrb[96].mxu1 %vm309_vm1, %v7391_v36  ;;  %10682 = vmatprep.subr.bf16.mxu0 %v11225_v52 }
 0x377   :  { %v1497_v51 = vpop.f32.mrb[90].mxu0  ;;  %9243 = vmatprep.mubr.msk.f32.mxu1 %vm11226_vm0, %v11227_v53 }
 0x378   :  { %v12517_v43 = vadd.f32 %v1497_v51, %v1151_v61  ;;  %v9181_v49 = vpop.f32.mrb[91].mxu0  ;;  %v7397_v61 = vld [vmem:[%s14583_s30 + $0x2e0] sm:$0xff] }
 0x37a   :  { %9244 = vmatmul.mubr.msk.f32.gmra.mrb[98].mxu1 %vm309_vm1, %v7392_v40 }
 0x37b   :  { %v1502_v45 = vpop.f32.mrb[92].mxu0  ;;  %9246 = vmatprep.mubr.msk.f32.mxu1 %vm11226_vm0, %v11227_v53 }
 0x37c   :  { %v12525_v46 = vadd.f32 %v1502_v45, %v1152_v35  ;;  %v9184_v44 = vpop.f32.mrb[93].mxu0  ;;  %v7402_v35 = vld [vmem:[%s14583_s30 + $0x308] sm:$0xff]  ;;  %v1939_v45 = vpop.permute.xlu0 %1938 }
 0x37d   :  { %v1944_v44 = vpop.permute.xlu1 %1943 }
 0x37e   :  { %9247 = vmatmul.mubr.msk.f32.gmra.mrb[100].mxu1 %vm309_vm1, %v7393_v50 }
 0x37f   :  { %v1507_v47 = vpop.f32.mrb[94].mxu0  ;;  %9249 = vmatprep.mubr.msk.f32.mxu1 %vm11226_vm0, %v11227_v53 }
 0x380   :  { %v12533_v30 = vadd.f32 %v1507_v47, %v1153_v7  ;;  %v9187_v54 = vpop.f32.mrb[95].mxu0  ;;  %v7407_v7 = vld [vmem:[%s14583_s30 + $0x330] sm:$0xff] }
 0x382   :  { %9250 = vmatmul.mubr.msk.f32.gmra.mrb[102].mxu1 %vm309_vm1, %v7394_v56 }
 0x383   :  { %9252 = vmatprep.mubr.msk.f32.mxu1 %vm11226_vm0, %v11227_v53 }
 0x386   :  { %9253 = vmatmul.mubr.msk.f32.gmra.mrb[104].mxu1 %vm309_vm1, %v7395_v19 }
 0x387   :  { %9255 = vmatprep.mubr.msk.f32.mxu1 %vm11226_vm0, %v11227_v53 }
 0x38a   :  { %9256 = vmatmul.mubr.msk.f32.gmra.mrb[106].mxu1 %vm309_vm1, %v7396_v58 }
 0x38b   :  { %9258 = vmatprep.mubr.msk.f32.mxu1 %vm11226_vm0, %v11227_v53 }
 0x38e   :  { %9259 = vmatmul.mubr.msk.f32.gmra.mrb[108].mxu1 %vm309_vm1, %v7397_v61 }
 0x38f   :  { %9261 = vmatprep.mubr.msk.f32.mxu1 %vm11226_vm0, %v11227_v53 }
 0x392   :  { %9262 = vmatmul.mubr.msk.f32.gmra.mrb[110].mxu1 %vm309_vm1, %v7398_v63  ;;  %v1949_v63 = vpop.permute.xlu1 %1948 }
 0x393   :  { %9264 = vmatprep.mubr.msk.f32.mxu1 %vm11226_vm0, %v11227_v53 }
 0x396   :  { %9265 = vmatmul.mubr.msk.f32.gmra.mrb[112].mxu1 %vm309_vm1, %v7399_v62 }
 0x397   :  { %9267 = vmatprep.mubr.msk.f32.mxu1 %vm11226_vm0, %v11227_v53 }
 0x39a   :  { %9268 = vmatmul.mubr.msk.f32.gmra.mrb[114].mxu1 %vm309_vm1, %v7400_v29 }
 0x39b   :  { %9270 = vmatprep.mubr.msk.f32.mxu1 %vm11226_vm0, %v11227_v53 }
 0x39e   :  { %9271 = vmatmul.mubr.msk.f32.gmra.mrb[116].mxu1 %vm309_vm1, %v7401_v48 }
 0x39f   :  { %9273 = vmatprep.mubr.msk.f32.mxu1 %vm11226_vm0, %v11227_v53 }
 0x3a2   :  { %9274 = vmatmul.mubr.msk.f32.gmra.mrb[118].mxu1 %vm309_vm1, %v7402_v35 }
 0x3a3   :  { %9276 = vmatprep.mubr.msk.f32.mxu1 %vm11226_vm0, %v11227_v53 }
 0x3a6   :  { %9277 = vmatmul.mubr.msk.f32.gmra.mrb[120].mxu1 %vm309_vm1, %v7403_v0 }
 0x3a7   :  { %9279 = vmatprep.mubr.msk.f32.mxu1 %vm11226_vm0, %v11227_v53 }
 0x3aa   :  { %9280 = vmatmul.mubr.msk.f32.gmra.mrb[122].mxu1 %vm309_vm1, %v7404_v4 }
 0x3ab   :  { %9282 = vmatprep.mubr.msk.f32.mxu1 %vm11226_vm0, %v11227_v53 }
 0x3ae   :  { %9283 = vmatmul.mubr.msk.f32.gmra.mrb[124].mxu1 %vm309_vm1, %v7405_v20 }
 0x3af   :  { %9285 = vmatprep.mubr.msk.f32.mxu1 %vm11226_vm0, %v11227_v53 }
 0x3b2   :  { %9286 = vmatmul.mubr.msk.f32.gmra.mrb[126].mxu1 %vm309_vm1, %v7406_v6 }
 0x3b3   :  { %9288 = vmatprep.mubr.msk.f32.mxu1 %vm11226_vm0, %v11227_v53 }
 0x3b6   :  { %9289 = vmatmul.mubr.msk.f32.gmra.mrb[128].mxu1 %vm309_vm1, %v7407_v7  ;;  %v1959_v7 = vpop.permute.xlu1 %1958 }
 0x3b7   :  { %9291 = vmatprep.mubr.msk.f32.mxu1 %vm11226_vm0, %v11227_v53 }
 0x3ba   :  { %9292 = vmatmul.mubr.msk.f32.gmra.mrb[130].mxu1 %vm309_vm1, %v7408_v5  ;;  %v1969_v59 = vpop.permute.xlu1 %1968 }
 0x3bb   :  { %9294 = vmatprep.mubr.msk.f32.mxu1 %vm11226_vm0, %v11227_v53 }
 0x3be   :  { %9295 = vmatmul.mubr.msk.f32.gmra.mrb[132].mxu1 %vm309_vm1, %v7409_v11 }
 0x441   :  { %v1785_v32 = vpop.f32.mrb[92].mxu1 }
 0x442   :  { %v1889_v34 = vadd.f32 %v1785_v32, %v12361_v14  ;;  %v9236_v36 = vpop.f32.mrb[93].mxu1 }
 0x444   :  { %v2036_v38 = vadd.f32 %v1934_v15, %v1889_v34 }
 0x445   :  { %v1790_v51 = vpop.f32.mrb[94].mxu1 }
 0x446   :  { %11087 = vtanh.f32 %v2036_v38  ;;  %v1890_v40 = vadd.f32 %v1790_v51, %v12372_v26  ;;  %v9239_v49 = vpop.f32.mrb[95].mxu1  ;;  %v1979_v51 = vpop.permute.xlu1 %1978 }
 0x448   :  { %v2037_v50 = vadd.f32 %v1939_v45, %v1890_v40 }
 0x449   :  { %v1795_v47 = vpop.f32.mrb[96].mxu1 }
 0x44a   :  { %11089 = vtanh.f32 %v2037_v50  ;;  %v1891_v56 = vadd.f32 %v1795_v47, %v12384_v33  ;;  %v9242_v54 = vpop.f32.mrb[97].mxu1  ;;  %v1954_v33 = vpop.permute.xlu0 %1953 }
 0x44c   :  { %v2038_v19 = vadd.f32 %v1944_v44, %v1891_v56 }
 0x44d   :  { %v1800_v58 = vpop.f32.mrb[98].mxu1 }
 0x44e   :  { %11091 = vtanh.f32 %v2038_v19  ;;  %v1892_v14 = vadd.f32 %v1800_v58, %v12396_v39  ;;  %v9245_v61 = vpop.f32.mrb[99].mxu1  ;;  %v1964_v18 = vpop.permute.xlu0 %1963 }
 0x44f   :  { %v1989_v58 = vpop.permute.xlu1 %1988 }
 0x450   :  { %v11088_v62 = vpop.eup %11087  ;;  %v2039_v29 = vadd.f32 %v1949_v63, %v1892_v14 }
 0x451   :  { %v1805_v26 = vpop.f32.mrb[100].mxu1  ;;  %9326 = vmatmul.mubr.msk.f32.vlgmr.msra.gmra.mrb[96].mxu0 %vm2114_vm2, %v11088_v62 }
 0x452   :  { %11093 = vtanh.f32 %v2039_v29  ;;  %v1893_v48 = vadd.f32 %v1805_v26, %v12414_v55  ;;  %v9248_v35 = vpop.f32.mrb[101].mxu1  ;;  %9328 = vmatprep.mubr.msk.f32.mxu0 %vm11226_vm0, %v11227_v53  ;;  %v1974_v15 = vpop.permute.xlu0 %1973 }
 0x454   :  { %v11090_v0 = vpop.eup %11089  ;;  %v2040_v4 = vadd.f32 %v1954_v33, %v1893_v48 }
 0x455   :  { %v1810_v20 = vpop.f32.mrb[102].mxu1  ;;  %9329 = vmatmul.mubr.msk.f32.gmra.mrb[98].mxu0 %vm2114_vm2, %v11090_v0  ;;  %v1999_v0 = vpop.permute.xlu1 %1998 }
 0x456   :  { %11095 = vtanh.f32 %v2040_v4  ;;  %v1894_v39 = vadd.f32 %v1810_v20, %v12438_v9  ;;  %v9251_v6 = vpop.f32.mrb[103].mxu1  ;;  %9331 = vmatprep.mubr.msk.f32.mxu0 %vm11226_vm0, %v11227_v53  ;;  %v1984_v44 = vpop.permute.xlu0 %1983 }
 0x458   :  { %v11092_v5 = vpop.eup %11091  ;;  %v2041_v55 = vadd.f32 %v1959_v7, %v1894_v39 }
 0x459   :  { %v1815_v11 = vpop.f32.mrb[104].mxu1  ;;  %9332 = vmatmul.mubr.msk.f32.gmra.mrb[100].mxu0 %vm2114_vm2, %v11092_v5 }
 0x45a   :  { %11097 = vtanh.f32 %v2041_v55  ;;  %v1895_v13 = vadd.f32 %v1815_v11, %v12452_v24  ;;  %v9254_v25 = vpop.f32.mrb[105].mxu1  ;;  %9334 = vmatprep.mubr.msk.f32.mxu0 %vm11226_vm0, %v11227_v53  ;;  %v1994_v29 = vpop.permute.xlu0 %1993 }
 0x45b   :  { %v2009_v25 = vpop.permute.xlu1 %2008 }
 0x45c   :  { %v11094_v10 = vpop.eup %11093  ;;  %v2042_v9 = vadd.f32 %v1964_v18, %v1895_v13 }
 0x45d   :  { %v1820_v60 = vpop.f32.mrb[106].mxu1  ;;  %9335 = vmatmul.mubr.msk.f32.gmra.mrb[102].mxu0 %vm2114_vm2, %v11094_v10 }
 0x45e   :  { %11099 = vtanh.f32 %v2042_v9  ;;  %v1896_v21 = vadd.f32 %v1820_v60, %v12460_v37  ;;  %v9257_v22 = vpop.f32.mrb[107].mxu1  ;;  %9337 = vmatprep.mubr.msk.f32.mxu0 %vm11226_vm0, %v11227_v53  ;;  %v2004_v7 = vpop.permute.xlu0 %2003 }
 0x460   :  { %v11096_v41 = vpop.eup %11095  ;;  %v2043_v24 = vadd.f32 %v1969_v59, %v1896_v21 }
 0x461   :  { %v1825_v23 = vpop.f32.mrb[108].mxu1  ;;  %9338 = vmatmul.mubr.msk.f32.gmra.mrb[104].mxu0 %vm2114_vm2, %v11096_v41 }
 0x462   :  { %11101 = vtanh.f32 %v2043_v24  ;;  %v1897_v27 = vadd.f32 %v1825_v23, %v12465_v42  ;;  %v9260_v28 = vpop.f32.mrb[109].mxu1  ;;  %9340 = vmatprep.mubr.msk.f32.mxu0 %vm11226_vm0, %v11227_v53  ;;  %v2014_v21 = vpop.permute.xlu0 %2013 }
 0x463   :  { %v2019_v23 = vpop.permute.xlu1 %2018 }
 0x464   :  { %v11098_v32 = vpop.eup %11097  ;;  %v2044_v37 = vadd.f32 %v1974_v15, %v1897_v27 }
 0x465   :  { %v1830_v34 = vpop.f32.mrb[110].mxu1  ;;  %9341 = vmatmul.mubr.msk.f32.gmra.mrb[106].mxu0 %vm2114_vm2, %v11098_v32 }
 0x466   :  { %11103 = vtanh.f32 %v2044_v37  ;;  %v1898_v36 = vadd.f32 %v1830_v34, %v12469_v8  ;;  %v9263_v38 = vpop.f32.mrb[111].mxu1  ;;  %9343 = vmatprep.mubr.msk.f32.mxu0 %vm11226_vm0, %v11227_v53  ;;  %v2024_v37 = vpop.permute.xlu0 %2023 }
 0x468   :  { %v11100_v40 = vpop.eup %11099  ;;  %v2045_v42 = vadd.f32 %v1979_v51, %v1898_v36 }
 0x469   :  { %v1835_v49 = vpop.f32.mrb[112].mxu1  ;;  %9344 = vmatmul.mubr.msk.f32.gmra.mrb[108].mxu0 %vm2114_vm2, %v11100_v40  ;;  %v2029_v40 = vpop.permute.xlu1 %2028 }
 0x46a   :  { %11105 = vtanh.f32 %v2045_v42  ;;  %v1899_v45 = vadd.f32 %v1835_v49, %v12473_v57  ;;  %v9266_v50 = vpop.f32.mrb[113].mxu1  ;;  %9346 = vmatprep.mubr.msk.f32.mxu0 %vm11226_vm0, %v11227_v53 }
 0x46c   :  { %v11102_v47 = vpop.eup %11101  ;;  %v2046_v8 = vadd.f32 %v1984_v44, %v1899_v45  ;;  %v2034_v44 = vpop.permute.xlu0 %2033 }
 0x46d   :  { %v1840_v56 = vpop.f32.mrb[114].mxu1  ;;  %9347 = vmatmul.mubr.msk.f32.gmra.mrb[110].mxu0 %vm2114_vm2, %v11102_v47 }
 0x46e   :  { %11107 = vtanh.f32 %v2046_v8  ;;  %v1900_v54 = vadd.f32 %v1840_v56, %v12477_v1  ;;  %v9269_v19 = vpop.f32.mrb[115].mxu1  ;;  %9349 = vmatprep.mubr.msk.f32.mxu0 %vm11226_vm0, %v11227_v53 }
 0x470   :  { %v11104_v14 = vpop.eup %11103  ;;  %v2047_v57 = vadd.f32 %v1989_v58, %v1900_v54  ;;  %v2079_v54 = vld [vmem:[%s14565_s4 + $0x8] sm:$0xff] }
 0x471   :  { %v1845_v61 = vpop.f32.mrb[116].mxu1  ;;  %9350 = vmatmul.mubr.msk.f32.gmra.mrb[112].mxu0 %vm2114_vm2, %v11104_v14  ;;  %7468 = vmatprep.mubr.msk.f32.mxu1 %vm2348_vm3, %v2079_v54  ;;  %v2083_v54 = vld [vmem:[%s14565_s4 + $0x28] sm:$0xff] }
 0x472   :  { %11109 = vtanh.f32 %v2047_v57  ;;  %v1901_v63 = vadd.f32 %v1845_v61, %v12481_v3  ;;  %v9272_v62 = vpop.f32.mrb[117].mxu1  ;;  %9352 = vmatprep.mubr.msk.f32.mxu0 %vm11226_vm0, %v11227_v53 }
 0x474   :  { %v11106_v26 = vpop.eup %11105  ;;  %v2048_v1 = vadd.f32 %v1994_v29, %v1901_v63 }
 0x475   :  { %v1850_v48 = vpop.f32.mrb[118].mxu1  ;;  %9353 = vmatmul.mubr.msk.f32.gmra.mrb[114].mxu0 %vm2114_vm2, %v11106_v26 }
 0x476   :  { %11111 = vtanh.f32 %v2048_v1  ;;  %v1902_v35 = vadd.f32 %v1850_v48, %v12484_v12  ;;  %v9275_v33 = vpop.f32.mrb[119].mxu1  ;;  %9355 = vmatprep.mubr.msk.f32.mxu0 %vm11226_vm0, %v11227_v53 }
 0x478   :  { %v11108_v4 = vpop.eup %11107  ;;  %v2049_v3 = vadd.f32 %v1999_v0, %v1902_v35 }
 0x479   :  { %v1855_v20 = vpop.f32.mrb[120].mxu1  ;;  %9356 = vmatmul.mubr.msk.f32.gmra.mrb[116].mxu0 %vm2114_vm2, %v11108_v4 }
 0x47a   :  { %11113 = vtanh.f32 %v2049_v3  ;;  %v1903_v39 = vadd.f32 %v1855_v20, %v12486_v17  ;;  %v9278_v6 = vpop.f32.mrb[121].mxu1  ;;  %9358 = vmatprep.mubr.msk.f32.mxu0 %vm11226_vm0, %v11227_v53 }
 0x47c   :  { %v11110_v5 = vpop.eup %11109  ;;  %v2050_v12 = vadd.f32 %v2004_v7, %v1903_v39 }
 0x47d   :  { %v1860_v55 = vpop.f32.mrb[122].mxu1  ;;  %9359 = vmatmul.mubr.msk.f32.gmra.mrb[118].mxu0 %vm2114_vm2, %v11110_v5 }
 0x47e   :  { %11115 = vtanh.f32 %v2050_v12  ;;  %v1904_v11 = vadd.f32 %v1860_v55, %v12492_v16  ;;  %v9281_v13 = vpop.f32.mrb[123].mxu1  ;;  %9361 = vmatprep.mubr.msk.f32.mxu0 %vm11226_vm0, %v11227_v53 }
 0x480   :  { %v11112_v18 = vpop.eup %11111  ;;  %v2051_v17 = vadd.f32 %v2009_v25, %v1904_v11 }
 0x481   :  { %v1865_v10 = vpop.f32.mrb[124].mxu1  ;;  %9362 = vmatmul.mubr.msk.f32.gmra.mrb[120].mxu0 %vm2114_vm2, %v11112_v18 }
 0x482   :  { %11117 = vtanh.f32 %v2051_v17  ;;  %v1905_v9 = vadd.f32 %v1865_v10, %v12501_v31  ;;  %v9284_v60 = vpop.f32.mrb[125].mxu1  ;;  %9364 = vmatprep.mubr.msk.f32.mxu0 %vm11226_vm0, %v11227_v53 }
 0x484   :  { %v11114_v22 = vpop.eup %11113  ;;  %v2052_v16 = vadd.f32 %v2014_v21, %v1905_v9 }
 0x485   :  { %v1870_v59 = vpop.f32.mrb[126].mxu1  ;;  %9365 = vmatmul.mubr.msk.f32.gmra.mrb[122].mxu0 %vm2114_vm2, %v11114_v22 }
 0x486   :  { %11119 = vtanh.f32 %v2052_v16  ;;  %v1906_v41 = vadd.f32 %v1870_v59, %v12509_v2  ;;  %v9287_v24 = vpop.f32.mrb[127].mxu1  ;;  %9367 = vmatprep.mubr.msk.f32.mxu0 %vm11226_vm0, %v11227_v53 }
 0x488   :  { %v11116_v27 = vpop.eup %11115  ;;  %v2053_v31 = vadd.f32 %v2019_v23, %v1906_v41 }
 0x489   :  { %v1875_v28 = vpop.f32.mrb[128].mxu1  ;;  %9368 = vmatmul.mubr.msk.f32.gmra.mrb[124].mxu0 %vm2114_vm2, %v11116_v27 }
 0x48a   :  { %11121 = vtanh.f32 %v2053_v31  ;;  %v1907_v15 = vadd.f32 %v1875_v28, %v12517_v43  ;;  %v9290_v32 = vpop.f32.mrb[129].mxu1  ;;  %9370 = vmatprep.mubr.msk.f32.mxu0 %vm11226_vm0, %v11227_v53 }
 0x48c   :  { %v11118_v34 = vpop.eup %11117  ;;  %v2054_v2 = vadd.f32 %v2024_v37, %v1907_v15 }
 0x48d   :  { %v1880_v36 = vpop.f32.mrb[130].mxu1  ;;  %9371 = vmatmul.mubr.msk.f32.gmra.mrb[126].mxu0 %vm2114_vm2, %v11118_v34 }
 0x48e   :  { %11123 = vtanh.f32 %v2054_v2  ;;  %v1908_v38 = vadd.f32 %v1880_v36, %v12525_v46  ;;  %v9293_v51 = vpop.f32.mrb[131].mxu1  ;;  %9373 = vmatprep.mubr.msk.f32.mxu0 %vm11226_vm0, %v11227_v53 }
 0x490   :  { %v11120_v42 = vpop.eup %11119  ;;  %v2055_v43 = vadd.f32 %v2029_v40, %v1908_v38 }
 0x491   :  { %v1885_v49 = vpop.f32.mrb[132].mxu1  ;;  %9374 = vmatmul.mubr.msk.f32.gmra.mrb[128].mxu0 %vm2114_vm2, %v11120_v42  ;;  %v7510_v42 = vld [vmem:[%s14566_s7 + $0x38] sm:$0xff] }
 0x492   :  { %11125 = vtanh.f32 %v2055_v43  ;;  %v1909_v45 = vadd.f32 %v1885_v49, %v12533_v30  ;;  %9376 = vmatprep.mubr.msk.f32.mxu0 %vm11226_vm0, %v11227_v53  ;;  %v9296_v50 = vpop.f32.mrb[133].mxu1  ;;  %v7511_v43 = vld [vmem:[%s14566_s7 + $0x40] sm:$0xff] }
 0x493   :  { %v2078_v50 = vld [vmem:[%s14565_s4] sm:$0xff] }
 0x494   :  { %v11122_v47 = vpop.eup %11121  ;;  %v2056_v46 = vadd.f32 %v2034_v44, %v1909_v45  ;;  %v10692_v44 = vpack.c.bf16 %v7511_v43, %v7510_v42 }
 0x495   :  { %9377 = vmatmul.mubr.msk.f32.gmra.mrb[130].mxu0 %vm2114_vm2, %v11122_v47  ;;  %v2081_v47 = vld [vmem:[%s14565_s4 + $0x18] sm:$0xff] }
 0x496   :  { %11127 = vtanh.f32 %v2056_v46  ;;  %9379 = vmatprep.mubr.msk.f32.mxu0 %vm11226_vm0, %v11227_v53  ;;  %v7512_v46 = vld [vmem:[%s14566_s7 + $0x48] sm:$0xff] }
 0x498   :  { %v11124_v8 = vpop.eup %11123 }
 0x499   :  { %9380 = vmatmul.mubr.msk.f32.gmra.mrb[132].mxu0 %vm2114_vm2, %v11124_v8  ;;  %v7513_v8 = vld [vmem:[%s14566_s7 + $0x50] sm:$0xff] }
 0x49a   :  { %9382 = vmatprep.mubr.msk.f32.mxu0 %vm11226_vm0, %v11227_v53 }
 0x49c   :  { %v11126_v30 = vpop.eup %11125 }
 0x49d   :  { %9383 = vmatmul.mubr.msk.f32.gmra.mrb[134].mxu0 %vm2114_vm2, %v11126_v30  ;;  %v2080_v30 = vld [vmem:[%s14565_s4 + $0x10] sm:$0xff] }
 0x49e   :  { %9385 = vmatprep.mubr.msk.f32.mxu0 %vm11226_vm0, %v11227_v53 }
 0x4a0   :  { %v11128_v56 = vpop.eup %11127 }
 0x4a1   :  { %9386 = vmatmul.mubr.msk.f32.gmra.mrb[136].mxu0 %vm2114_vm2, %v11128_v56  ;;  %v10695_v56 = vpack.c.bf16 %v7513_v8, %v7512_v46 }
 0x4a2   :  { %9402 = vmatprep.mubr.msk.f32.mxu0 %vm11226_vm0, %v11227_v53 }
 0x524   :  { %v2244_v19 = vpop.f32.mrb[96].mxu0 }
 0x525   :  { %v9327_v58 = vpop.f32.mrb[97].mxu0 }
 0x526   :  { %v7515_v58 = vld [vmem:[%s14566_s7 + $0x60] sm:$0xff] }
 0x528   :  { %v2249_v14 = vpop.f32.mrb[98].mxu0 }
 0x529   :  { %v10653_v57 = vpack.c.bf16 %v2249_v14, %v2244_v19  ;;  %v9330_v61 = vpop.f32.mrb[99].mxu0  ;;  %v7514_v19 = vld [vmem:[%s14566_s7 + $0x58] sm:$0xff]  ;;  %v2082_v14 = vld [vmem:[%s14565_s4 + $0x20] sm:$0xff] }
 0x52a   :  { %v2085_v61 = vld [vmem:[%s14565_s4 + $0x38] sm:$0xff] }
 0x52b   :  { %10654 = vmatpush1.bf16.msra.mxu1 %v10653_v57  ;;  %v10698_v57 = vpack.c.bf16 %v7515_v58, %v7514_v19  ;;  %v7650_v19 = vld [vmem:[%s14566_s7 + $0xb0] sm:$0xff] }
 0x52c   :  { %v2254_v63 = vpop.f32.mrb[100].mxu0  ;;  %10655 = vmatprep.subr.bf16.mxu1 %v11225_v52 }
 0x52d   :  { %v9333_v62 = vpop.f32.mrb[101].mxu0 }
 0x52e   :  { %v2087_v62 = vld [vmem:[%s14565_s4 + $0x48] sm:$0xff] }
 0x530   :  { %v2259_v29 = vpop.f32.mrb[102].mxu0 }
 0x531   :  { %v10656_v26 = vpack.c.bf16 %v2259_v29, %v2254_v63  ;;  %v9336_v1 = vpop.f32.mrb[103].mxu0  ;;  %v2084_v63 = vld [vmem:[%s14565_s4 + $0x30] sm:$0xff]  ;;  %v2086_v29 = vld [vmem:[%s14565_s4 + $0x40] sm:$0xff] }
 0x532   :  { %v2088_v1 = vld [vmem:[%s14565_s4 + $0x50] sm:$0xff] }
 0x533   :  { %10657 = vmatpush1.bf16.msra.mxu1 %v10656_v26  ;;  %v2089_v26 = vld [vmem:[%s14565_s4 + $0x58] sm:$0xff] }
 0x534   :  { %v2264_v48 = vpop.f32.mrb[104].mxu0  ;;  %10658 = vmatprep.subr.bf16.mxu1 %v11225_v52 }
 0x535   :  { %v9339_v35 = vpop.f32.mrb[105].mxu0 }
 0x536   :  { %v2090_v35 = vld [vmem:[%s14565_s4 + $0x60] sm:$0xff] }
 0x538   :  { %v2269_v33 = vpop.f32.mrb[106].mxu0 }
 0x539   :  { %v10659_v0 = vpack.c.bf16 %v2269_v33, %v2264_v48  ;;  %v9342_v4 = vpop.f32.mrb[107].mxu0  ;;  %v2091_v48 = vld [vmem:[%s14565_s4 + $0x68] sm:$0xff]  ;;  %v2093_v33 = vld [vmem:[%s14565_s4 + $0x78] sm:$0xff] }
 0x53a   :  { %v2095_v4 = vld [vmem:[%s14565_s4 + $0x88] sm:$0xff] }
 0x53b   :  { %10660 = vmatpush1.bf16.msra.mxu1 %v10659_v0  ;;  %v2092_v0 = vld [vmem:[%s14565_s4 + $0x70] sm:$0xff] }
 0x53c   :  { %v2274_v3 = vpop.f32.mrb[108].mxu0  ;;  %10661 = vmatprep.subr.bf16.mxu1 %v11225_v52 }
 0x53d   :  { %v9345_v20 = vpop.f32.mrb[109].mxu0 }
 0x53e   :  { %v2097_v20 = vld [vmem:[%s14565_s4 + $0x98] sm:$0xff] }
 0x540   :  { %v2279_v39 = vpop.f32.mrb[110].mxu0 }
 0x541   :  { %v10662_v6 = vpack.c.bf16 %v2279_v39, %v2274_v3  ;;  %v9348_v7 = vpop.f32.mrb[111].mxu0  ;;  %v2094_v3 = vld [vmem:[%s14565_s4 + $0x80] sm:$0xff]  ;;  %v2096_v39 = vld [vmem:[%s14565_s4 + $0x90] sm:$0xff] }
 0x542   :  { %v2098_v7 = vld [vmem:[%s14565_s4 + $0xa0] sm:$0xf] }
 0x543   :  { %10663 = vmatpush1.bf16.msra.mxu1 %v10662_v6  ;;  %v2099_v6 = vld [vmem:[%s14565_s4 + $0xa8] sm:$0xf] }
 0x544   :  { %v2284_v5 = vpop.f32.mrb[112].mxu0  ;;  %10664 = vmatprep.subr.bf16.mxu1 %v11225_v52 }
 0x545   :  { %v9351_v12 = vpop.f32.mrb[113].mxu0 }
 0x546   :  { %v2523_v12 = vld [vmem:[%s14566_s7 + $0x8] sm:$0xff] }
 0x548   :  { %v2289_v55 = vpop.f32.mrb[114].mxu0 }
 0x549   :  { %v10665_v11 = vpack.c.bf16 %v2289_v55, %v2284_v5  ;;  %v9354_v13 = vpop.f32.mrb[115].mxu0  ;;  %v2522_v5 = vld [vmem:[%s14566_s7] sm:$0xff] }
 0x54a   :  { %v10683_v55 = vpack.c.bf16 %v2523_v12, %v2522_v5  ;;  %v2525_v13 = vld [vmem:[%s14566_s7 + $0x18] sm:$0xff]  ;;  %v7714_v5 = vld [vmem:[%s14566_s7 + $0x110] sm:$0xff]  ;;  %v7490_v12 = vld [vmem:[%s14567_s6 + $0xa0] sm:$0xff] }
 0x54b   :  { %10666 = vmatpush1.bf16.msra.mxu1 %v10665_v11  ;;  %v2524_v11 = vld [vmem:[%s14566_s7 + $0x10] sm:$0xff] }
 0x54c   :  { %v2294_v25 = vpop.f32.mrb[116].mxu0  ;;  %10667 = vmatprep.subr.bf16.mxu1 %v11225_v52  ;;  %10684 = vmatpush3.bf16.msra.mxu0 %v10683_v55 }
 0x54d   :  { %v9357_v18 = vpop.f32.mrb[117].mxu0  ;;  %10685 = vmatprep.subr.bf16.mxu0 %v11225_v52 }
 0x54e   :  { %v2526_v18 = vld [vmem:[%s14566_s7 + $0x20] sm:$0xff] }
 0x550   :  { %v2299_v17 = vpop.f32.mrb[118].mxu0 }
 0x551   :  { %v10668_v10 = vpack.c.bf16 %v2299_v17, %v2294_v25  ;;  %v9360_v9 = vpop.f32.mrb[119].mxu0  ;;  %v10686_v25 = vpack.c.bf16 %v2525_v13, %v2524_v11  ;;  %v2527_v17 = vld [vmem:[%s14566_s7 + $0x28] sm:$0xff] }
 0x552   :  { %v7516_v9 = vld [vmem:[%s14566_s7 + $0x68] sm:$0xff] }
 0x553   :  { %10669 = vmatpush1.bf16.msra.mxu1 %v10668_v10  ;;  %10687 = vmatpush3.bf16.msra.mxu0 %v10686_v25  ;;  %v10689_v10 = vpack.c.bf16 %v2527_v17, %v2526_v18 }
 0x554   :  { %v2304_v60 = vpop.f32.mrb[120].mxu0  ;;  %10670 = vmatprep.subr.bf16.mxu1 %v11225_v52  ;;  %10688 = vmatprep.subr.bf16.mxu0 %v11225_v52 }
 0x555   :  { %v9363_v21 = vpop.f32.mrb[121].mxu0 }
 0x556   :  { %v7590_v21 = vld [vmem:[%s14566_s7 + $0x70] sm:$0xff] }
 0x557   :  { %10690 = vmatpush3.bf16.msra.mxu0 %v10689_v10 }
 0x558   :  { %v2309_v22 = vpop.f32.mrb[122].mxu0  ;;  %9400 = vmatprep.subr.mxu0 %v11227_v53 }
 0x559   :  { %v10671_v16 = vpack.c.bf16 %v2309_v22, %v2304_v60  ;;  %v9366_v59 = vpop.f32.mrb[123].mxu0  ;;  %v2528_v60 = vld [vmem:[%s14566_s7 + $0x30] sm:$0xff]  ;;  %v7591_v22 = vld [vmem:[%s14566_s7 + $0x78] sm:$0xff] }
 0x55b   :  { %10672 = vmatpush1.bf16.msra.mxu1 %v10671_v16  ;;  %9401 = vmatpush3.msra.mxu0 %v2528_v60  ;;  %v10741_v16 = vpack.c.bf16 %v7591_v22, %v7590_v21 }
 0x55c   :  { %v2314_v41 = vpop.f32.mrb[124].mxu0  ;;  %10673 = vmatprep.subr.bf16.mxu1 %v11225_v52 }
 0x55d   :  { %v9369_v24 = vpop.f32.mrb[125].mxu0 }
 0x55e   :  { %v7593_v24 = vld [vmem:[%s14566_s7 + $0x88] sm:$0xff] }
 0x560   :  { %v2319_v23 = vpop.f32.mrb[126].mxu0 }
 0x561   :  { %v10674_v27 = vpack.c.bf16 %v2319_v23, %v2314_v41  ;;  %v9372_v31 = vpop.f32.mrb[127].mxu0  ;;  %v7592_v41 = vld [vmem:[%s14566_s7 + $0x80] sm:$0xff] }
 0x563   :  { %10675 = vmatpush1.bf16.msra.mxu1 %v10674_v27  ;;  %v10744_v27 = vpack.c.bf16 %v7593_v24, %v7592_v41 }
 0x564   :  { %v2324_v28 = vpop.f32.mrb[128].mxu0  ;;  %10676 = vmatprep.subr.bf16.mxu1 %v11225_v52 }
 0x565   :  { %v9375_v15 = vpop.f32.mrb[129].mxu0 }
 0x566   :  { %v7595_v15 = vld [vmem:[%s14566_s7 + $0x98] sm:$0xff] }
 0x568   :  { %v2329_v32 = vpop.f32.mrb[130].mxu0 }
 0x569   :  { %v10677_v37 = vpack.c.bf16 %v2329_v32, %v2324_v28  ;;  %v9378_v34 = vpop.f32.mrb[131].mxu0  ;;  %v7594_v28 = vld [vmem:[%s14566_s7 + $0x90] sm:$0xff] }
 0x56b   :  { %10678 = vmatpush1.bf16.msra.mxu1 %v10677_v37  ;;  %v10747_v37 = vpack.c.bf16 %v7595_v15, %v7594_v28 }
 0x56c   :  { %v2334_v2 = vpop.f32.mrb[132].mxu0  ;;  %10679 = vmatprep.subr.bf16.mxu1 %v11225_v52 }
 0x56d   :  { %v9381_v36 = vpop.f32.mrb[133].mxu0 }
 0x570   :  { %v2339_v38 = vpop.f32.mrb[134].mxu0 }
 0x571   :  { %v10680_v51 = vpack.c.bf16 %v2339_v38, %v2334_v2  ;;  %v9384_v40 = vpop.f32.mrb[135].mxu0  ;;  %v7596_v38 = vld [vmem:[%s14566_s7 + $0xa0] sm:$0xff] }
 0x573   :  { %10681 = vmatpush1.bf16.msra.mxu1 %v10680_v51 }
 0x574   :  { %v2344_v49 = vpop.f32.mrb[136].mxu0  ;;  %2422 = vmatprep.subr.mxu1 %v11227_v53 }
 0x575   :  { %v9387_v45 = vpop.f32.mrb[137].mxu0 }
 0x577   :  { %2423 = vmatpush1.msra.mxu1 %v2344_v49 }
 0x578   :  { %2447 = vmatmul.mubr.f32.vlgmr.msra.gmra.mrb[134].mxu1 %v2078_v50  ;;  %10691 = vmatprep.subr.bf16.mxu1 %v11225_v52 }
 0x579   :  { %7469 = vmatprep.mubr.msk.f32.mxu1 %vm2348_vm3, %v2081_v47  ;;  %10693 = vmatpush3.bf16.msra.mxu1 %v10692_v44 }
 0x57a   :  { %10694 = vmatprep.subr.bf16.mxu1 %v11225_v52 }
 0x57c   :  { %2452 = vmatmul.mubr.f32.gmra.mrb[136].mxu1 %v2080_v30 }
 0x57d   :  { %7470 = vmatprep.mubr.msk.f32.mxu1 %vm2348_vm3, %v2083_v54  ;;  %10696 = vmatpush3.bf16.msra.mxu1 %v10695_v56  ;;  %v7649_v54 = vld [vmem:[%s14566_s7 + $0xa8] sm:$0xff] }
 0x57e   :  { %10697 = vmatprep.subr.bf16.mxu1 %v11225_v52 }
 0x580   :  { %2457 = vmatmul.mubr.f32.gmra.mrb[138].mxu1 %v2082_v14 }
 0x581   :  { %7471 = vmatprep.mubr.msk.f32.mxu1 %vm2348_vm3, %v2085_v61  ;;  %10699 = vmatpush3.bf16.msra.mxu1 %v10698_v57  ;;  %v10770_v57 = vpack.c.bf16 %v7650_v19, %v7649_v54  ;;  %v7651_v61 = vld [vmem:[%s14566_s7 + $0xb8] sm:$0xff] }
 0x582   :  { %9447 = vmatprep.subr.mxu1 %v11227_v53 }
 0x584   :  { %2462 = vmatmul.mubr.f32.gmra.mrb[140].mxu1 %v2084_v63  ;;  %v7652_v63 = vld [vmem:[%s14566_s7 + $0xc0] sm:$0xff] }
 0x585   :  { %7472 = vmatprep.mubr.msk.f32.mxu1 %vm2348_vm3, %v2087_v62  ;;  %9448 = vmatpush3.msra.mxu1 %v7516_v9  ;;  %v10773_v62 = vpack.c.bf16 %v7652_v63, %v7651_v61 }
 0x586   :  { %10740 = vmatprep.subr.bf16.mxu1 %v11225_v52 }
 0x588   :  { %2467 = vmatmul.mubr.f32.gmra.mrb[142].mxu1 %v2086_v29  ;;  %v7653_v29 = vld [vmem:[%s14566_s7 + $0xc8] sm:$0xff] }
 0x589   :  { %7473 = vmatprep.mubr.msk.f32.mxu1 %vm2348_vm3, %v2089_v26  ;;  %v7654_v26 = vld [vmem:[%s14566_s7 + $0xd0] sm:$0xff] }
 0x58c   :  { %2472 = vmatmul.mubr.f32.gmra.mrb[144].mxu1 %v2088_v1  ;;  %v10776_v1 = vpack.c.bf16 %v7654_v26, %v7653_v29 }
 0x58d   :  { %7474 = vmatprep.mubr.msk.f32.mxu1 %vm2348_vm3, %v2091_v48  ;;  %v7655_v48 = vld [vmem:[%s14566_s7 + $0xd8] sm:$0xff] }
 0x590   :  { %2477 = vmatmul.mubr.f32.gmra.mrb[146].mxu1 %v2090_v35  ;;  %v7708_v35 = vld [vmem:[%s14566_s7 + $0xe0] sm:$0xff] }
 0x591   :  { %7475 = vmatprep.mubr.msk.f32.mxu1 %vm2348_vm3, %v2093_v33  ;;  %v7709_v33 = vld [vmem:[%s14566_s7 + $0xe8] sm:$0xff] }
 0x594   :  { %2482 = vmatmul.mubr.f32.gmra.mrb[148].mxu1 %v2092_v0  ;;  %v10799_v0 = vpack.c.bf16 %v7709_v33, %v7708_v35 }
 0x595   :  { %7476 = vmatprep.mubr.msk.f32.mxu1 %vm2348_vm3, %v2095_v4  ;;  %v7710_v4 = vld [vmem:[%s14566_s7 + $0xf0] sm:$0xff] }
 0x598   :  { %2487 = vmatmul.mubr.f32.gmra.mrb[150].mxu1 %v2094_v3  ;;  %v7711_v3 = vld [vmem:[%s14566_s7 + $0xf8] sm:$0xff] }
 0x599   :  { %7477 = vmatprep.mubr.msk.f32.mxu1 %vm2348_vm3, %v2097_v20  ;;  %v10802_v20 = vpack.c.bf16 %v7711_v3, %v7710_v4  ;;  %v7491_v4 = vld [vmem:[%s14567_s6 + $0xa8] sm:$0xff]  ;;  %v7492_v3 = vld [vmem:[%s14567_s6 + $0xb0] sm:$0xff] }
 0x59c   :  { %2492 = vmatmul.mubr.f32.gmra.mrb[152].mxu1 %v2096_v39  ;;  %v7712_v39 = vld [vmem:[%s14566_s7 + $0x100] sm:$0xff] }
 0x59d   :  { %7478 = vmatprep.mubr.msk.f32.mxu1 %vm2348_vm3, %v2099_v6  ;;  %v7713_v6 = vld [vmem:[%s14566_s7 + $0x108] sm:$0xff] }
 0x5a0   :  { %2497 = vmatmul.mubr.f32.gmra.mrb[154].mxu1 %v2098_v7  ;;  %v10805_v7 = vpack.c.bf16 %v7713_v6, %v7712_v39  ;;  %v7493_v6 = vld [vmem:[%s14567_s6 + $0xb8] sm:$0xff] }
 0x5a1   :  { %9449 = vmatprep.mubr.msk.f32.mxu1 %vm11226_vm0, %v11227_v53 }
 0x64b   :  { %v12883_v59 = vpop.f32.mrb[134].mxu1 }
 0x64c   :  { %9450 = vmatmul.mubr.msk.f32.vlgmr.msra.gmra.mrb[156].mxu1 %vm2529_vm4, %v12883_v59  ;;  %v2450_v23 = vpop.f32.mrb[135].mxu1  ;;  %9403 = vmatmul.mubr.msk.f32.vlgmr.msra.gmra.mrb[138].mxu0 %vm2529_vm4, %v12883_v59 }
 0x64d   :  { %9452 = vmatprep.mubr.msk.f32.mxu1 %vm11226_vm0, %v11227_v53  ;;  %9405 = vmatprep.mubr.msk.f32.mxu0 %vm11226_vm0, %v11227_v53 }
 0x64e   :  { %10742 = vmatpush3.bf16.msra.mxu1 %v10741_v16 }
 0x64f   :  { %v12899_v31 = vpop.f32.mrb[136].mxu1  ;;  %10743 = vmatprep.subr.bf16.mxu1 %v11225_v52 }
 0x650   :  { %9453 = vmatmul.mubr.msk.f32.gmra.mrb[158].mxu1 %vm2529_vm4, %v12899_v31  ;;  %v2455_v32 = vpop.f32.mrb[137].mxu1  ;;  %9406 = vmatmul.mubr.msk.f32.gmra.mrb[140].mxu0 %vm2529_vm4, %v12899_v31 }
 0x651   :  { %9455 = vmatprep.mubr.msk.f32.mxu1 %vm11226_vm0, %v11227_v53  ;;  %9408 = vmatprep.mubr.msk.f32.mxu0 %vm11226_vm0, %v11227_v53 }
 0x652   :  { %10745 = vmatpush3.bf16.msra.mxu1 %v10744_v27 }
 0x653   :  { %v12916_v34 = vpop.f32.mrb[138].mxu1  ;;  %10746 = vmatprep.subr.bf16.mxu1 %v11225_v52 }
 0x654   :  { %9456 = vmatmul.mubr.msk.f32.gmra.mrb[160].mxu1 %vm2529_vm4, %v12916_v34  ;;  %v2460_v2 = vpop.f32.mrb[139].mxu1  ;;  %9409 = vmatmul.mubr.msk.f32.gmra.mrb[142].mxu0 %vm2529_vm4, %v12916_v34 }
 0x655   :  { %9458 = vmatprep.mubr.msk.f32.mxu1 %vm11226_vm0, %v11227_v53  ;;  %9411 = vmatprep.mubr.msk.f32.mxu0 %vm11226_vm0, %v11227_v53 }
 0x656   :  { %10748 = vmatpush3.bf16.msra.mxu1 %v10747_v37 }
 0x657   :  { %v12927_v36 = vpop.f32.mrb[140].mxu1  ;;  %9598 = vmatprep.subr.mxu1 %v11227_v53 }
 0x658   :  { %9459 = vmatmul.mubr.msk.f32.gmra.mrb[162].mxu1 %vm2529_vm4, %v12927_v36  ;;  %v2465_v51 = vpop.f32.mrb[141].mxu1  ;;  %9412 = vmatmul.mubr.msk.f32.gmra.mrb[144].mxu0 %vm2529_vm4, %v12927_v36 }
 0x659   :  { %9461 = vmatprep.mubr.msk.f32.mxu1 %vm11226_vm0, %v11227_v53  ;;  %9414 = vmatprep.mubr.msk.f32.mxu0 %vm11226_vm0, %v11227_v53 }
 0x65a   :  { %9599 = vmatpush3.msra.mxu1 %v7596_v38 }
 0x65b   :  { %v12941_v40 = vpop.f32.mrb[142].mxu1  ;;  %10769 = vmatprep.subr.bf16.mxu1 %v11225_v52 }
 0x65c   :  { %9462 = vmatmul.mubr.msk.f32.gmra.mrb[164].mxu1 %vm2529_vm4, %v12941_v40  ;;  %v2470_v42 = vpop.f32.mrb[143].mxu1  ;;  %9415 = vmatmul.mubr.msk.f32.gmra.mrb[146].mxu0 %vm2529_vm4, %v12941_v40 }
 0x65d   :  { %9464 = vmatprep.mubr.msk.f32.mxu1 %vm11226_vm0, %v11227_v53  ;;  %9417 = vmatprep.mubr.msk.f32.mxu0 %vm11226_vm0, %v11227_v53 }
 0x65f   :  { %v12952_v43 = vpop.f32.mrb[144].mxu1 }
 0x660   :  { %9465 = vmatmul.mubr.msk.f32.gmra.mrb[166].mxu1 %vm2529_vm4, %v12952_v43  ;;  %v2475_v49 = vpop.f32.mrb[145].mxu1  ;;  %9418 = vmatmul.mubr.msk.f32.gmra.mrb[148].mxu0 %vm2529_vm4, %v12952_v43 }
 0x661   :  { %9467 = vmatprep.mubr.msk.f32.mxu1 %vm11226_vm0, %v11227_v53  ;;  %9420 = vmatprep.mubr.msk.f32.mxu0 %vm11226_vm0, %v11227_v53 }
 0x663   :  { %v12962_v45 = vpop.f32.mrb[146].mxu1 }
 0x664   :  { %9468 = vmatmul.mubr.msk.f32.gmra.mrb[168].mxu1 %vm2529_vm4, %v12962_v45  ;;  %v2480_v50 = vpop.f32.mrb[147].mxu1  ;;  %9421 = vmatmul.mubr.msk.f32.gmra.mrb[150].mxu0 %vm2529_vm4, %v12962_v45 }
 0x665   :  { %9470 = vmatprep.mubr.msk.f32.mxu1 %vm11226_vm0, %v11227_v53  ;;  %9423 = vmatprep.mubr.msk.f32.mxu0 %vm11226_vm0, %v11227_v53 }
 0x667   :  { %v12972_v44 = vpop.f32.mrb[148].mxu1 }
 0x668   :  { %9471 = vmatmul.mubr.msk.f32.gmra.mrb[170].mxu1 %vm2529_vm4, %v12972_v44  ;;  %v2485_v47 = vpop.f32.mrb[149].mxu1  ;;  %9424 = vmatmul.mubr.msk.f32.gmra.mrb[152].mxu0 %vm2529_vm4, %v12972_v44 }
 0x669   :  { %9473 = vmatprep.mubr.msk.f32.mxu1 %vm11226_vm0, %v11227_v53  ;;  %9426 = vmatprep.mubr.msk.f32.mxu0 %vm11226_vm0, %v11227_v53 }
 0x66b   :  { %v12982_v46 = vpop.f32.mrb[150].mxu1 }
 0x66c   :  { %9474 = vmatmul.mubr.msk.f32.gmra.mrb[172].mxu1 %vm2529_vm4, %v12982_v46  ;;  %v2490_v8 = vpop.f32.mrb[151].mxu1  ;;  %9427 = vmatmul.mubr.msk.f32.gmra.mrb[154].mxu0 %vm2529_vm4, %v12982_v46 }
 0x66d   :  { %9476 = vmatprep.mubr.msk.f32.mxu1 %vm11226_vm0, %v11227_v53  ;;  %9429 = vmatprep.mubr.msk.f32.mxu0 %vm11226_vm0, %v11227_v53 }
 0x66f   :  { %v12992_v30 = vpop.f32.mrb[152].mxu1 }
 0x670   :  { %9477 = vmatmul.mubr.msk.f32.gmra.mrb[174].mxu1 %vm2529_vm4, %v12992_v30  ;;  %v2495_v56 = vpop.f32.mrb[153].mxu1  ;;  %9430 = vmatmul.mubr.msk.f32.gmra.mrb[156].mxu0 %vm2529_vm4, %v12992_v30 }
 0x671   :  { %9479 = vmatprep.mubr.msk.f32.mxu1 %vm11226_vm0, %v11227_v53  ;;  %9432 = vmatprep.mubr.msk.f32.mxu0 %vm11226_vm0, %v11227_v53 }
 0x673   :  { %v13008_v58 = vpop.f32.mrb[154].mxu1 }
 0x674   :  { %9480 = vmatmul.mubr.msk.f32.gmra.mrb[176].mxu1 %vm2529_vm4, %v13008_v58  ;;  %9433 = vmatmul.mubr.msk.f32.gmra.mrb[158].mxu0 %vm2529_vm4, %v13008_v58  ;;  %v2500_v14 = vpop.f32.mrb[155].mxu1 }
 0x675   :  { %9600 = vmatprep.mubr.msk.f32.mxu1 %vm11226_vm0, %v11227_v53  ;;  %9504 = vmatprep.mubr.msk.f32.mxu0 %vm2832_vm5, %v7490_v12 }
 0x678   :  { %9601 = vmatmul.mubr.msk.f32.vlgmr.msra.gmra.mrb[178].mxu1 %vm2529_vm4, %v12883_v59 }
 0x679   :  { %9603 = vmatprep.mubr.msk.f32.mxu1 %vm11226_vm0, %v11227_v53  ;;  %10771 = vmatpush3.bf16.msra.mxu1 %v10770_v57 }
 0x67a   :  { %10772 = vmatprep.subr.bf16.mxu1 %v11225_v52 }
 0x67c   :  { %9604 = vmatmul.mubr.msk.f32.gmra.mrb[180].mxu1 %vm2529_vm4, %v12899_v31 }
 0x67d   :  { %9606 = vmatprep.mubr.msk.f32.mxu1 %vm11226_vm0, %v11227_v53  ;;  %10774 = vmatpush3.bf16.msra.mxu1 %v10773_v62 }
 0x67e   :  { %10775 = vmatprep.subr.bf16.mxu1 %v11225_v52 }
 0x680   :  { %9607 = vmatmul.mubr.msk.f32.gmra.mrb[182].mxu1 %vm2529_vm4, %v12916_v34 }
 0x681   :  { %9609 = vmatprep.mubr.msk.f32.mxu1 %vm11226_vm0, %v11227_v53  ;;  %10777 = vmatpush3.bf16.msra.mxu1 %v10776_v1 }
 0x682   :  { %9697 = vmatprep.subr.mxu1 %v11227_v53 }
 0x684   :  { %9610 = vmatmul.mubr.msk.f32.gmra.mrb[184].mxu1 %vm2529_vm4, %v12927_v36 }
 0x685   :  { %9612 = vmatprep.mubr.msk.f32.mxu1 %vm11226_vm0, %v11227_v53  ;;  %9698 = vmatpush3.msra.mxu1 %v7655_v48 }
 0x686   :  { %10798 = vmatprep.subr.bf16.mxu1 %v11225_v52 }
 0x688   :  { %9613 = vmatmul.mubr.msk.f32.gmra.mrb[186].mxu1 %vm2529_vm4, %v12941_v40 }
 0x689   :  { %9615 = vmatprep.mubr.msk.f32.mxu1 %vm11226_vm0, %v11227_v53 }
 0x68c   :  { %9616 = vmatmul.mubr.msk.f32.gmra.mrb[188].mxu1 %vm2529_vm4, %v12952_v43 }
 0x68d   :  { %9618 = vmatprep.mubr.msk.f32.mxu1 %vm11226_vm0, %v11227_v53 }
 0x690   :  { %9619 = vmatmul.mubr.msk.f32.gmra.mrb[190].mxu1 %vm2529_vm4, %v12962_v45 }
 0x691   :  { %9621 = vmatprep.mubr.msk.f32.mxu1 %vm11226_vm0, %v11227_v53 }
 0x694   :  { %9622 = vmatmul.mubr.msk.f32.gmra.mrb[192].mxu1 %vm2529_vm4, %v12972_v44 }
 0x695   :  { %9624 = vmatprep.mubr.msk.f32.mxu1 %vm11226_vm0, %v11227_v53 }
 0x698   :  { %9625 = vmatmul.mubr.msk.f32.gmra.mrb[194].mxu1 %vm2529_vm4, %v12982_v46 }
 0x699   :  { %9627 = vmatprep.mubr.msk.f32.mxu1 %vm11226_vm0, %v11227_v53 }
 0x69c   :  { %9628 = vmatmul.mubr.msk.f32.gmra.mrb[196].mxu1 %vm2529_vm4, %v12992_v30 }
 0x69d   :  { %9630 = vmatprep.mubr.msk.f32.mxu1 %vm11226_vm0, %v11227_v53 }
 0x6a0   :  { %9631 = vmatmul.mubr.msk.f32.gmra.mrb[198].mxu1 %vm2529_vm4, %v13008_v58 }
 0x6a1   :  { %9699 = vmatprep.mubr.msk.f32.mxu1 %vm11226_vm0, %v11227_v53 }
 0x6a4   :  { %9700 = vmatmul.mubr.msk.f32.vlgmr.msra.gmra.mrb[200].mxu1 %vm2529_vm4, %v12883_v59 }
 0x6a5   :  { %9702 = vmatprep.mubr.msk.f32.mxu1 %vm11226_vm0, %v11227_v53  ;;  %10800 = vmatpush3.bf16.msra.mxu1 %v10799_v0 }
 0x6a6   :  { %10801 = vmatprep.subr.bf16.mxu1 %v11225_v52 }
 0x6a8   :  { %9703 = vmatmul.mubr.msk.f32.gmra.mrb[202].mxu1 %vm2529_vm4, %v12899_v31 }
 0x6a9   :  { %9705 = vmatprep.mubr.msk.f32.mxu1 %vm11226_vm0, %v11227_v53  ;;  %10803 = vmatpush3.bf16.msra.mxu1 %v10802_v20 }
 0x6aa   :  { %10804 = vmatprep.subr.bf16.mxu1 %v11225_v52 }
 0x6ac   :  { %9706 = vmatmul.mubr.msk.f32.gmra.mrb[204].mxu1 %vm2529_vm4, %v12916_v34 }
 0x6ad   :  { %9708 = vmatprep.mubr.msk.f32.mxu1 %vm11226_vm0, %v11227_v53  ;;  %10806 = vmatpush3.bf16.msra.mxu1 %v10805_v7  ;;  %v7494_v7 = vld [vmem:[%s14567_s6 + $0xc0] sm:$0xff] }
 0x6ae   :  { %9796 = vmatprep.subr.mxu1 %v11227_v53 }
 0x6b0   :  { %9709 = vmatmul.mubr.msk.f32.gmra.mrb[206].mxu1 %vm2529_vm4, %v12927_v36 }
 0x6b1   :  { %9711 = vmatprep.mubr.msk.f32.mxu1 %vm11226_vm0, %v11227_v53  ;;  %9797 = vmatpush3.msra.mxu1 %v7714_v5 }
 0x6b4   :  { %9712 = vmatmul.mubr.msk.f32.gmra.mrb[208].mxu1 %vm2529_vm4, %v12941_v40 }
 0x6b5   :  { %9714 = vmatprep.mubr.msk.f32.mxu1 %vm11226_vm0, %v11227_v53 }
 0x6b8   :  { %9715 = vmatmul.mubr.msk.f32.gmra.mrb[210].mxu1 %vm2529_vm4, %v12952_v43 }
 0x6b9   :  { %9717 = vmatprep.mubr.msk.f32.mxu1 %vm11226_vm0, %v11227_v53 }
 0x6bc   :  { %9718 = vmatmul.mubr.msk.f32.gmra.mrb[212].mxu1 %vm2529_vm4, %v12962_v45 }
 0x6bd   :  { %9720 = vmatprep.mubr.msk.f32.mxu1 %vm11226_vm0, %v11227_v53 }
 0x6c0   :  { %9721 = vmatmul.mubr.msk.f32.gmra.mrb[214].mxu1 %vm2529_vm4, %v12972_v44 }
 0x6c1   :  { %9723 = vmatprep.mubr.msk.f32.mxu1 %vm11226_vm0, %v11227_v53 }
 0x6c4   :  { %9724 = vmatmul.mubr.msk.f32.gmra.mrb[216].mxu1 %vm2529_vm4, %v12982_v46 }
 0x6c5   :  { %9726 = vmatprep.mubr.msk.f32.mxu1 %vm11226_vm0, %v11227_v53 }
 0x6c8   :  { %9727 = vmatmul.mubr.msk.f32.gmra.mrb[218].mxu1 %vm2529_vm4, %v12992_v30 }
 0x6c9   :  { %9729 = vmatprep.mubr.msk.f32.mxu1 %vm11226_vm0, %v11227_v53 }
 0x6cc   :  { %9730 = vmatmul.mubr.msk.f32.gmra.mrb[220].mxu1 %vm2529_vm4, %v13008_v58 }
 0x6cd   :  { %9798 = vmatprep.mubr.msk.f32.mxu1 %vm11226_vm0, %v11227_v53 }
 0x6d0   :  { %9799 = vmatmul.mubr.msk.f32.vlgmr.msra.gmra.mrb[222].mxu1 %vm2529_vm4, %v12883_v59 }
 0x6d1   :  { %9801 = vmatprep.mubr.msk.f32.mxu1 %vm11226_vm0, %v11227_v53 }
 0x6d4   :  { %9802 = vmatmul.mubr.msk.f32.gmra.mrb[224].mxu1 %vm2529_vm4, %v12899_v31 }
 0x6d5   :  { %9804 = vmatprep.mubr.msk.f32.mxu1 %vm11226_vm0, %v11227_v53 }
 0x6d8   :  { %9805 = vmatmul.mubr.msk.f32.gmra.mrb[226].mxu1 %vm2529_vm4, %v12916_v34 }
 0x6d9   :  { %9807 = vmatprep.mubr.msk.f32.mxu1 %vm11226_vm0, %v11227_v53 }
 0x6dc   :  { %9808 = vmatmul.mubr.msk.f32.gmra.mrb[228].mxu1 %vm2529_vm4, %v12927_v36 }
 0x6dd   :  { %9810 = vmatprep.mubr.msk.f32.mxu1 %vm11226_vm0, %v11227_v53 }
 0x6e0   :  { %9811 = vmatmul.mubr.msk.f32.gmra.mrb[230].mxu1 %vm2529_vm4, %v12941_v40 }
 0x6e1   :  { %9813 = vmatprep.mubr.msk.f32.mxu1 %vm11226_vm0, %v11227_v53 }
 0x6e4   :  { %9814 = vmatmul.mubr.msk.f32.gmra.mrb[232].mxu1 %vm2529_vm4, %v12952_v43 }
 0x6e5   :  { %9816 = vmatprep.mubr.msk.f32.mxu1 %vm11226_vm0, %v11227_v53 }
 0x6e8   :  { %9817 = vmatmul.mubr.msk.f32.gmra.mrb[234].mxu1 %vm2529_vm4, %v12962_v45 }
 0x6e9   :  { %9819 = vmatprep.mubr.msk.f32.mxu1 %vm11226_vm0, %v11227_v53 }
 0x6ec   :  { %9820 = vmatmul.mubr.msk.f32.gmra.mrb[236].mxu1 %vm2529_vm4, %v12972_v44 }
 0x6ed   :  { %9822 = vmatprep.mubr.msk.f32.mxu1 %vm11226_vm0, %v11227_v53 }
 0x6f0   :  { %9823 = vmatmul.mubr.msk.f32.gmra.mrb[238].mxu1 %vm2529_vm4, %v12982_v46 }
 0x6f1   :  { %9825 = vmatprep.mubr.msk.f32.mxu1 %vm11226_vm0, %v11227_v53 }
 0x6f4   :  { %9826 = vmatmul.mubr.msk.f32.gmra.mrb[240].mxu1 %vm2529_vm4, %v12992_v30 }
 0x6f5   :  { %9828 = vmatprep.mubr.msk.f32.mxu1 %vm11226_vm0, %v11227_v53 }
 0x6f8   :  { %9829 = vmatmul.mubr.msk.f32.gmra.mrb[242].mxu1 %vm2529_vm4, %v13008_v58 }
 0x71f   :  { %v2778_v55 = vpop.f32.mrb[156].mxu1  ;;  %v2629_v11 = vpop.f32.mrb[138].mxu0 }
 0x720   :  { %v9451_v13 = vpop.f32.mrb[157].mxu1  ;;  %v9404_v25 = vpop.f32.mrb[139].mxu0 }
 0x721   :  { %v7496_v13 = vld [vmem:[%s14567_s6 + $0xd0] sm:$0xff] }
 0x723   :  { %v2783_v18 = vpop.f32.mrb[158].mxu1  ;;  %v2634_v17 = vpop.f32.mrb[140].mxu0 }
 0x724   :  { %v10700_v10 = vpack.c.bf16 %v2783_v18, %v2778_v55  ;;  %v9454_v9 = vpop.f32.mrb[159].mxu1  ;;  %v13193_v60 = vpack.c.bf16 %v2634_v17, %v2629_v11  ;;  %v9407_v21 = vpop.f32.mrb[141].mxu0  ;;  %v7495_v11 = vld [vmem:[%s14567_s6 + $0xc8] sm:$0xff]  ;;  %v7497_v17 = vld [vmem:[%s14567_s6 + $0xd8] sm:$0xff] }
 0x726   :  { %10701 = vmatprep.subr.bf16.mxu0 %v10700_v10 }
 0x727   :  { %v2788_v22 = vpop.f32.mrb[160].mxu1  ;;  %10703 = vmatpush3.bf16.msra.mxu0 %v10700_v10  ;;  %v2639_v16 = vpop.f32.mrb[142].mxu0  ;;  %v7498_v10 = vld [vmem:[%s14567_s6 + $0xe0] sm:$0xff] }
 0x728   :  { %v9457_v59 = vpop.f32.mrb[161].mxu1  ;;  %v9410_v41 = vpop.f32.mrb[143].mxu0 }
 0x72b   :  { %v2793_v24 = vpop.f32.mrb[162].mxu1  ;;  %v2644_v23 = vpop.f32.mrb[144].mxu0 }
 0x72c   :  { %v10704_v27 = vpack.c.bf16 %v2793_v24, %v2788_v22  ;;  %v9460_v31 = vpop.f32.mrb[163].mxu1  ;;  %v10724_v28 = vpack.c.bf16 %v2644_v23, %v2639_v16  ;;  %v9413_v15 = vpop.f32.mrb[145].mxu0  ;;  %v7499_v22 = vld [vmem:[%s14567_s6 + $0xe8] sm:$0xff]  ;;  %v7500_v16 = vld [vmem:[%s14567_s6 + $0xf0] sm:$0xff]  ;;  %v7501_v24 = vld [vmem:[%s14567_s6 + $0xf8] sm:$0xff] }
 0x72d   :  { %v7502_v23 = vld [vmem:[%s14567_s6 + $0x100] sm:$0xff]  ;;  %v7503_v15 = vld [vmem:[%s14567_s6 + $0x108] sm:$0xff] }
 0x72e   :  { %10705 = vmatprep.subr.bf16.mxu0 %v10704_v27 }
 0x72f   :  { %v2798_v32 = vpop.f32.mrb[164].mxu1  ;;  %10707 = vmatpush3.bf16.msra.mxu0 %v10704_v27  ;;  %v2649_v37 = vpop.f32.mrb[146].mxu0 }
 0x730   :  { %v9463_v34 = vpop.f32.mrb[165].mxu1  ;;  %v9416_v2 = vpop.f32.mrb[147].mxu0 }
 0x731   :  { %v7505_v2 = vld [vmem:[%s14567_s6 + $0x118] sm:$0xff] }
 0x733   :  { %v2803_v36 = vpop.f32.mrb[166].mxu1  ;;  %v2654_v38 = vpop.f32.mrb[148].mxu0 }
 0x734   :  { %v10708_v51 = vpack.c.bf16 %v2803_v36, %v2798_v32  ;;  %v9466_v40 = vpop.f32.mrb[167].mxu1  ;;  %v10728_v42 = vpack.c.bf16 %v2654_v38, %v2649_v37  ;;  %v9419_v43 = vpop.f32.mrb[149].mxu0  ;;  %v7504_v32 = vld [vmem:[%s14567_s6 + $0x110] sm:$0xff]  ;;  %v7506_v36 = vld [vmem:[%s14567_s6 + $0x120] sm:$0xff] }
 0x735   :  { %v7508_v43 = vld [vmem:[%s14567_s6 + $0x130] sm:$0xff] }
 0x736   :  { %10709 = vmatprep.subr.bf16.mxu0 %v10708_v51 }
 0x737   :  { %v2808_v49 = vpop.f32.mrb[168].mxu1  ;;  %10711 = vmatpush3.bf16.msra.mxu0 %v10708_v51  ;;  %v2659_v45 = vpop.f32.mrb[150].mxu0 }
 0x738   :  { %v9469_v50 = vpop.f32.mrb[169].mxu1  ;;  %v9422_v44 = vpop.f32.mrb[151].mxu0 }
 0x739   :  { %v7509_v50 = vld [vmem:[%s14567_s6 + $0x138] sm:$0xff]  ;;  %v2502_v44 = vld [vmem:[%s14567_s6] sm:$0xff] }
 0x73b   :  { %v2813_v47 = vpop.f32.mrb[170].mxu1  ;;  %v2664_v46 = vpop.f32.mrb[152].mxu0 }
 0x73c   :  { %v10712_v8 = vpack.c.bf16 %v2813_v47, %v2808_v49  ;;  %v9472_v30 = vpop.f32.mrb[171].mxu1  ;;  %v10732_v56 = vpack.c.bf16 %v2664_v46, %v2659_v45  ;;  %v9425_v54 = vpop.f32.mrb[153].mxu0 }
 0x73d   :  { %v2503_v30 = vld [vmem:[%s14567_s6 + $0x8] sm:$0xff] }
 0x73e   :  { %10713 = vmatprep.subr.bf16.mxu0 %v10712_v8 }
 0x73f   :  { %v2818_v19 = vpop.f32.mrb[172].mxu1  ;;  %10715 = vmatpush3.bf16.msra.mxu0 %v10712_v8  ;;  %v2669_v58 = vpop.f32.mrb[154].mxu0 }
 0x740   :  { %v9475_v14 = vpop.f32.mrb[173].mxu1  ;;  %v9428_v57 = vpop.f32.mrb[155].mxu0 }
 0x741   :  { %v2506_v14 = vld [vmem:[%s14567_s6 + $0x20] sm:$0xff] }
 0x743   :  { %v2823_v61 = vpop.f32.mrb[174].mxu1  ;;  %v2674_v63 = vpop.f32.mrb[156].mxu0 }
 0x744   :  { %v10716_v62 = vpack.c.bf16 %v2823_v61, %v2818_v19  ;;  %v9478_v29 = vpop.f32.mrb[175].mxu1  ;;  %v10736_v26 = vpack.c.bf16 %v2674_v63, %v2669_v58  ;;  %v9431_v1 = vpop.f32.mrb[157].mxu0  ;;  %v2505_v58 = vld [vmem:[%s14567_s6 + $0x18] sm:$0xff]  ;;  %v2507_v63 = vld [vmem:[%s14567_s6 + $0x28] sm:$0xff] }
 0x746   :  { %10717 = vmatprep.subr.bf16.mxu0 %v10716_v62 }
 0x747   :  { %10719 = vmatpush3.bf16.msra.mxu0 %v10716_v62  ;;  %v2828_v48 = vpop.f32.mrb[176].mxu1  ;;  %v2679_v35 = vpop.f32.mrb[158].mxu0  ;;  %v2508_v62 = vld [vmem:[%s14567_s6 + $0x30] sm:$0xff] }
 0x748   :  { %v9481_v33 = vpop.f32.mrb[177].mxu1  ;;  %9502 = vmatprep.subr.msk.mxu0 %vm2893_vm6, %v2828_v48  ;;  %v9434_v0 = vpop.f32.mrb[159].mxu0 }
 0x74b   :  { %9503 = vmatpush3.msk.msra.mxu0 %vm2893_vm6, %v2828_v48  ;;  %v3385_v20 = vpop.f32.mrb[178].mxu1  ;;  %v2509_v48 = vld [vmem:[%s14567_s6 + $0x38] sm:$0xff] }
 0x74c   :  { %9505 = vmatmul.mubr.msk.f32.vlgmr.msra.gmra.mrb[160].mxu0 %vm2832_vm5, %v7491_v4  ;;  %10721 = vmatprep.subr.bf16.mxu0 %v13193_v60  ;;  %v9602_v39 = vpop.f32.mrb[179].mxu1  ;;  %v2511_v4 = vld [vmem:[%s14567_s6 + $0x48] sm:$0xff] }
 0x74d   :  { %10723 = vmatpush3.bf16.msra.mxu0 %v13193_v60  ;;  %9507 = vmatprep.mubr.msk.f32.mxu0 %vm2832_vm5, %v7492_v3  ;;  %v2512_v3 = vld [vmem:[%s14567_s6 + $0x50] sm:$0xff] }
 0x74e   :  { %10725 = vmatprep.subr.bf16.mxu0 %v10724_v28 }
 0x74f   :  { %v3390_v5 = vpop.f32.mrb[180].mxu1 }
 0x750   :  { %v13213_v12 = vpack.c.bf16 %v3390_v5, %v3385_v20  ;;  %9508 = vmatmul.mubr.msk.f32.gmra.mrb[162].mxu0 %vm2832_vm5, %v7493_v6  ;;  %v9605_v55 = vpop.f32.mrb[181].mxu1  ;;  %v2514_v5 = vld [vmem:[%s14567_s6 + $0x60] sm:$0xff] }
 0x751   :  { %10727 = vmatpush3.bf16.msra.mxu0 %v10724_v28  ;;  %9510 = vmatprep.mubr.msk.f32.mxu0 %vm2832_vm5, %v7494_v7  ;;  %v2513_v7 = vld [vmem:[%s14567_s6 + $0x58] sm:$0xff] }
 0x752   :  { %10729 = vmatprep.subr.bf16.mxu0 %v10728_v42 }
 0x753   :  { %v3395_v25 = vpop.f32.mrb[182].mxu1 }
 0x754   :  { %9511 = vmatmul.mubr.msk.f32.gmra.mrb[164].mxu0 %vm2832_vm5, %v7495_v11  ;;  %v9608_v18 = vpop.f32.mrb[183].mxu1  ;;  %v2515_v11 = vld [vmem:[%s14567_s6 + $0x68] sm:$0xff] }
 0x755   :  { %10731 = vmatpush3.bf16.msra.mxu0 %v10728_v42  ;;  %9513 = vmatprep.mubr.msk.f32.mxu0 %vm2832_vm5, %v7496_v13  ;;  %v7507_v42 = vld [vmem:[%s14567_s6 + $0x128] sm:$0xff]  ;;  %v2516_v13 = vld [vmem:[%s14567_s6 + $0x70] sm:$0xff] }
 0x756   :  { %10733 = vmatprep.subr.bf16.mxu0 %v10732_v56 }
 0x757   :  { %v3400_v9 = vpop.f32.mrb[184].mxu1 }
 0x758   :  { %v10753_v60 = vpack.c.bf16 %v3400_v9, %v3395_v25  ;;  %9514 = vmatmul.mubr.msk.f32.gmra.mrb[166].mxu0 %vm2832_vm5, %v7497_v17  ;;  %v9611_v21 = vpop.f32.mrb[185].mxu1  ;;  %v2518_v9 = vld [vmem:[%s14567_s6 + $0x80] sm:$0xff] }
 0x759   :  { %10735 = vmatpush3.bf16.msra.mxu0 %v10732_v56  ;;  %9516 = vmatprep.mubr.msk.f32.mxu0 %vm2832_vm5, %v7498_v10  ;;  %v2504_v56 = vld [vmem:[%s14567_s6 + $0x10] sm:$0xff]  ;;  %v2517_v10 = vld [vmem:[%s14567_s6 + $0x78] sm:$0xff] }
 0x75a   :  { %10737 = vmatprep.subr.bf16.mxu0 %v10736_v26 }
 0x75b   :  { %v3405_v59 = vpop.f32.mrb[186].mxu1 }
 0x75c   :  { %9517 = vmatmul.mubr.msk.f32.gmra.mrb[168].mxu0 %vm2832_vm5, %v7499_v22  ;;  %v9614_v41 = vpop.f32.mrb[187].mxu1  ;;  %v2519_v22 = vld [vmem:[%s14567_s6 + $0x88] sm:$0xff] }
 0x75d   :  { %10739 = vmatpush3.bf16.msra.mxu0 %v10736_v26  ;;  %9519 = vmatprep.mubr.msk.f32.mxu0 %vm2832_vm5, %v7500_v16  ;;  %v2520_v16 = vld [vmem:[%s14567_s6 + $0x90] sm:$0xff] }
 0x75e   :  { %9554 = vmatprep.subr.msk.mxu0 %vm2893_vm6, %v2679_v35 }
 0x75f   :  { %v3410_v27 = vpop.f32.mrb[188].mxu1 }
 0x760   :  { %v10757_v31 = vpack.c.bf16 %v3410_v27, %v3405_v59  ;;  %9520 = vmatmul.mubr.msk.f32.gmra.mrb[170].mxu0 %vm2832_vm5, %v7501_v24  ;;  %v9617_v28 = vpop.f32.mrb[189].mxu1  ;;  %v7570_v27 = vld [vmem:[%s14567_s6 + $0x140] sm:$0xff] }
 0x761   :  { %9555 = vmatpush3.msk.msra.mxu0 %vm2893_vm6, %v2679_v35  ;;  %9522 = vmatprep.mubr.msk.f32.mxu0 %vm2832_vm5, %v7502_v23  ;;  %v2510_v35 = vld [vmem:[%s14567_s6 + $0x40] sm:$0xff]  ;;  %v2521_v23 = vld [vmem:[%s14567_s6 + $0x98] sm:$0xff] }
 0x762   :  { %10750 = vmatprep.subr.bf16.mxu0 %v13213_v12 }
 0x763   :  { %v3415_v37 = vpop.f32.mrb[190].mxu1 }
 0x764   :  { %9523 = vmatmul.mubr.msk.f32.gmra.mrb[172].mxu0 %vm2832_vm5, %v7503_v15  ;;  %v9620_v34 = vpop.f32.mrb[191].mxu1  ;;  %v7571_v15 = vld [vmem:[%s14567_s6 + $0x148] sm:$0xff] }
 0x765   :  { %9525 = vmatprep.mubr.msk.f32.mxu0 %vm2832_vm5, %v7504_v32  ;;  %v7572_v32 = vld [vmem:[%s14567_s6 + $0x150] sm:$0xff] }
 0x767   :  { %v3420_v38 = vpop.f32.mrb[192].mxu1 }
 0x768   :  { %v10761_v51 = vpack.c.bf16 %v3420_v38, %v3415_v37  ;;  %9526 = vmatmul.mubr.msk.f32.gmra.mrb[174].mxu0 %vm2832_vm5, %v7505_v2  ;;  %v9623_v40 = vpop.f32.mrb[193].mxu1  ;;  %v7574_v38 = vld [vmem:[%s14567_s6 + $0x160] sm:$0xff] }
 0x769   :  { %9528 = vmatprep.mubr.msk.f32.mxu0 %vm2832_vm5, %v7506_v36  ;;  %v7573_v36 = vld [vmem:[%s14567_s6 + $0x158] sm:$0xff] }
 0x76b   :  { %v3425_v49 = vpop.f32.mrb[194].mxu1 }
 0x76c   :  { %9529 = vmatmul.mubr.msk.f32.gmra.mrb[176].mxu0 %vm2832_vm5, %v7507_v42  ;;  %v9626_v45 = vpop.f32.mrb[195].mxu1  ;;  %v7575_v42 = vld [vmem:[%s14567_s6 + $0x168] sm:$0xff] }
 0x76d   :  { %9531 = vmatprep.mubr.msk.f32.mxu0 %vm2832_vm5, %v7508_v43  ;;  %v7576_v43 = vld [vmem:[%s14567_s6 + $0x170] sm:$0xff] }
 0x76f   :  { %v3430_v47 = vpop.f32.mrb[196].mxu1 }
 0x770   :  { %v10765_v46 = vpack.c.bf16 %v3430_v47, %v3425_v49  ;;  %9532 = vmatmul.mubr.msk.f32.gmra.mrb[178].mxu0 %vm2832_vm5, %v7509_v50  ;;  %v9629_v8 = vpop.f32.mrb[197].mxu1  ;;  %v7577_v50 = vld [vmem:[%s14567_s6 + $0x178] sm:$0xff] }
 0x771   :  { %9556 = vmatprep.mubr.msk.f32.mxu0 %vm2832_vm5, %v2502_v44  ;;  %v7578_v44 = vld [vmem:[%s14567_s6 + $0x180] sm:$0xff] }
 0x773   :  { %v3435_v54 = vpop.f32.mrb[198].mxu1 }
 0x774   :  { %9557 = vmatmul.mubr.msk.f32.vlgmr.msra.gmra.mrb[160].mxu0 %vm2832_vm5, %v2503_v30  ;;  %v9632_v19 = vpop.f32.mrb[199].mxu1  ;;  %v7579_v30 = vld [vmem:[%s14567_s6 + $0x188] sm:$0xff] }
 0x775   :  { %10752 = vmatpush3.bf16.msra.mxu0 %v13213_v12  ;;  %9559 = vmatprep.mubr.msk.f32.mxu0 %vm2832_vm5, %v2504_v56  ;;  %v7580_v56 = vld [vmem:[%s14567_s6 + $0x190] sm:$0xff] }
 0x776   :  { %10754 = vmatprep.subr.bf16.mxu0 %v10753_v60 }
 0x777   :  { %v3782_v57 = vpop.f32.mrb[200].mxu1 }
 0x778   :  { %9560 = vmatmul.mubr.msk.f32.gmra.mrb[162].mxu0 %vm2832_vm5, %v2505_v58  ;;  %v9701_v61 = vpop.f32.mrb[201].mxu1  ;;  %v7581_v58 = vld [vmem:[%s14567_s6 + $0x198] sm:$0xff] }
 0x779   :  { %10756 = vmatpush3.bf16.msra.mxu0 %v10753_v60  ;;  %9562 = vmatprep.mubr.msk.f32.mxu0 %vm2832_vm5, %v2506_v14  ;;  %v7582_v14 = vld [vmem:[%s14567_s6 + $0x1a0] sm:$0xff] }
 0x77a   :  { %10758 = vmatprep.subr.bf16.mxu0 %v10757_v31 }
 0x77b   :  { %v3787_v29 = vpop.f32.mrb[202].mxu1 }
 0x77c   :  { %v10778_v26 = vpack.c.bf16 %v3787_v29, %v3782_v57  ;;  %9563 = vmatmul.mubr.msk.f32.gmra.mrb[164].mxu0 %vm2832_vm5, %v2507_v63  ;;  %v9704_v1 = vpop.f32.mrb[203].mxu1  ;;  %v7584_v29 = vld [vmem:[%s14567_s6 + $0x1b0] sm:$0xff] }
 0x77d   :  { %10760 = vmatpush3.bf16.msra.mxu0 %v10757_v31  ;;  %9565 = vmatprep.mubr.msk.f32.mxu0 %vm2832_vm5, %v2508_v62  ;;  %v7583_v62 = vld [vmem:[%s14567_s6 + $0x1a8] sm:$0xff] }
 0x77e   :  { %10762 = vmatprep.subr.bf16.mxu0 %v10761_v51 }
 0x77f   :  { %v3792_v33 = vpop.f32.mrb[204].mxu1 }
 0x780   :  { %9566 = vmatmul.mubr.msk.f32.gmra.mrb[166].mxu0 %vm2832_vm5, %v2509_v48  ;;  %v9707_v0 = vpop.f32.mrb[205].mxu1  ;;  %v7585_v48 = vld [vmem:[%s14567_s6 + $0x1b8] sm:$0xff] }
 0x781   :  { %10764 = vmatpush3.bf16.msra.mxu0 %v10761_v51  ;;  %9568 = vmatprep.mubr.msk.f32.mxu0 %vm2832_vm5, %v2510_v35  ;;  %v7586_v35 = vld [vmem:[%s14567_s6 + $0x1c0] sm:$0xff] }
 0x782   :  { %10766 = vmatprep.subr.bf16.mxu0 %v10765_v46 }
 0x783   :  { %v3797_v20 = vpop.f32.mrb[206].mxu1 }
 0x784   :  { %v10782_v39 = vpack.c.bf16 %v3797_v20, %v3792_v33  ;;  %9569 = vmatmul.mubr.msk.f32.gmra.mrb[168].mxu0 %vm2832_vm5, %v2511_v4  ;;  %v9710_v6 = vpop.f32.mrb[207].mxu1  ;;  %v7588_v20 = vld [vmem:[%s14567_s6 + $0x1d0] sm:$0xff] }
 0x785   :  { %10768 = vmatpush3.bf16.msra.mxu0 %v10765_v46  ;;  %9571 = vmatprep.mubr.msk.f32.mxu0 %vm2832_vm5, %v2512_v3  ;;  %v7587_v3 = vld [vmem:[%s14567_s6 + $0x1c8] sm:$0xff] }
 0x786   :  { %9653 = vmatprep.subr.msk.mxu0 %vm2893_vm6, %v3435_v54 }
 0x787   :  { %v3802_v12 = vpop.f32.mrb[208].mxu1 }
 0x788   :  { %9572 = vmatmul.mubr.msk.f32.gmra.mrb[170].mxu0 %vm2832_vm5, %v2513_v7  ;;  %v9713_v55 = vpop.f32.mrb[209].mxu1  ;;  %v7589_v7 = vld [vmem:[%s14567_s6 + $0x1d8] sm:$0xff] }
 0x789   :  { %9654 = vmatpush3.msk.msra.mxu0 %vm2893_vm6, %v3435_v54  ;;  %9574 = vmatprep.mubr.msk.f32.mxu0 %vm2832_vm5, %v2514_v5  ;;  %v7629_v5 = vld [vmem:[%s14567_s6 + $0x1e0] sm:$0xff] }
 0x78a   :  { %10779 = vmatprep.subr.bf16.mxu0 %v10778_v26 }
 0x78b   :  { %v3807_v25 = vpop.f32.mrb[210].mxu1 }
 0x78c   :  { %v10786_v18 = vpack.c.bf16 %v3807_v25, %v3802_v12  ;;  %9575 = vmatmul.mubr.msk.f32.gmra.mrb[172].mxu0 %vm2832_vm5, %v2515_v11  ;;  %v9716_v17 = vpop.f32.mrb[211].mxu1  ;;  %v7631_v25 = vld [vmem:[%s14567_s6 + $0x1f0] sm:$0xff] }
 0x78d   :  { %9577 = vmatprep.mubr.msk.f32.mxu0 %vm2832_vm5, %v2516_v13  ;;  %v7630_v13 = vld [vmem:[%s14567_s6 + $0x1e8] sm:$0xff] }
 0x78f   :  { %v3812_v60 = vpop.f32.mrb[212].mxu1 }
 0x790   :  { %9578 = vmatmul.mubr.msk.f32.gmra.mrb[174].mxu0 %vm2832_vm5, %v2517_v10  ;;  %v9719_v21 = vpop.f32.mrb[213].mxu1  ;;  %v7632_v10 = vld [vmem:[%s14567_s6 + $0x1f8] sm:$0xff] }
 0x791   :  { %9580 = vmatprep.mubr.msk.f32.mxu0 %vm2832_vm5, %v2518_v9  ;;  %v7633_v9 = vld [vmem:[%s14567_s6 + $0x200] sm:$0xff] }
 0x793   :  { %v3817_v59 = vpop.f32.mrb[214].mxu1 }
 0x794   :  { %v10790_v41 = vpack.c.bf16 %v3817_v59, %v3812_v60  ;;  %9581 = vmatmul.mubr.msk.f32.gmra.mrb[176].mxu0 %vm2832_vm5, %v2519_v22  ;;  %v9722_v24 = vpop.f32.mrb[215].mxu1  ;;  %v7635_v59 = vld [vmem:[%s14567_s6 + $0x210] sm:$0xff] }
 0x795   :  { %9583 = vmatprep.mubr.msk.f32.mxu0 %vm2832_vm5, %v2520_v16  ;;  %v7634_v16 = vld [vmem:[%s14567_s6 + $0x208] sm:$0xff] }
 0x797   :  { %v3822_v31 = vpop.f32.mrb[216].mxu1 }
 0x798   :  { %9584 = vmatmul.mubr.msk.f32.gmra.mrb[178].mxu0 %vm2832_vm5, %v2521_v23  ;;  %v9725_v28 = vpop.f32.mrb[217].mxu1  ;;  %v7636_v23 = vld [vmem:[%s14567_s6 + $0x218] sm:$0xff] }
 0x799   :  { %9655 = vmatprep.mubr.msk.f32.mxu0 %vm2832_vm5, %v7570_v27  ;;  %v7637_v27 = vld [vmem:[%s14567_s6 + $0x220] sm:$0xff]  ;;  %v7639_v28 = vld [vmem:[%s14567_s6 + $0x230] sm:$0xff] }
 0x79b   :  { %v3827_v37 = vpop.f32.mrb[218].mxu1 }
 0x79c   :  { %v10794_v34 = vpack.c.bf16 %v3827_v37, %v3822_v31  ;;  %9656 = vmatmul.mubr.msk.f32.vlgmr.msra.gmra.mrb[160].mxu0 %vm2832_vm5, %v7571_v15  ;;  %v9728_v2 = vpop.f32.mrb[219].mxu1  ;;  %v7638_v31 = vld [vmem:[%s14567_s6 + $0x228] sm:$0xff]  ;;  %v7640_v15 = vld [vmem:[%s14567_s6 + $0x238] sm:$0xff] }
 0x79d   :  { %10781 = vmatpush3.bf16.msra.mxu0 %v10778_v26  ;;  %9658 = vmatprep.mubr.msk.f32.mxu0 %vm2832_vm5, %v7572_v32  ;;  %v7641_v32 = vld [vmem:[%s14567_s6 + $0x240] sm:$0xff]  ;;  %v7642_v37 = vld [vmem:[%s14567_s6 + $0x248] sm:$0xff]  ;;  %v7644_v2 = vld [vmem:[%s14567_s6 + $0x258] sm:$0xff] }
 0x79e   :  { %10783 = vmatprep.subr.bf16.mxu0 %v10782_v39 }
 0x79f   :  { %v3832_v51 = vpop.f32.mrb[220].mxu1 }
 0x7a0   :  { %9659 = vmatmul.mubr.msk.f32.gmra.mrb[162].mxu0 %vm2832_vm5, %v7573_v36  ;;  %v9731_v40 = vpop.f32.mrb[221].mxu1  ;;  %v7645_v36 = vld [vmem:[%s14567_s6 + $0x260] sm:$0xff] }
 0x7a1   :  { %10785 = vmatpush3.bf16.msra.mxu0 %v10782_v39  ;;  %9661 = vmatprep.mubr.msk.f32.mxu0 %vm2832_vm5, %v7574_v38  ;;  %v7646_v38 = vld [vmem:[%s14567_s6 + $0x268] sm:$0xff]  ;;  %v7648_v40 = vld [vmem:[%s14567_s6 + $0x278] sm:$0xff] }
 0x7a2   :  { %10787 = vmatprep.subr.bf16.mxu0 %v10786_v18 }
 0x7a3   :  { %v4179_v49 = vpop.f32.mrb[222].mxu1 }
 0x7a4   :  { %9662 = vmatmul.mubr.msk.f32.gmra.mrb[164].mxu0 %vm2832_vm5, %v7575_v42  ;;  %v9800_v45 = vpop.f32.mrb[223].mxu1  ;;  %v7688_v42 = vld [vmem:[%s14567_s6 + $0x280] sm:$0xff] }
 0x7a5   :  { %10789 = vmatpush3.bf16.msra.mxu0 %v10786_v18  ;;  %9664 = vmatprep.mubr.msk.f32.mxu0 %vm2832_vm5, %v7576_v43  ;;  %v7689_v43 = vld [vmem:[%s14567_s6 + $0x288] sm:$0xff]  ;;  %v7691_v45 = vld [vmem:[%s14567_s6 + $0x298] sm:$0xff] }
 0x7a6   :  { %10791 = vmatprep.subr.bf16.mxu0 %v10790_v41 }
 0x7a7   :  { %v4184_v47 = vpop.f32.mrb[224].mxu1 }
 0x7a8   :  { %v10807_v46 = vpack.c.bf16 %v4184_v47, %v4179_v49  ;;  %9665 = vmatmul.mubr.msk.f32.gmra.mrb[166].mxu0 %vm2832_vm5, %v7577_v50  ;;  %v9803_v8 = vpop.f32.mrb[225].mxu1  ;;  %v7690_v49 = vld [vmem:[%s14567_s6 + $0x290] sm:$0xff]  ;;  %v7692_v50 = vld [vmem:[%s14567_s6 + $0x2a0] sm:$0xff] }
 0x7a9   :  { %10793 = vmatpush3.bf16.msra.mxu0 %v10790_v41  ;;  %9667 = vmatprep.mubr.msk.f32.mxu0 %vm2832_vm5, %v7578_v44  ;;  %v7693_v44 = vld [vmem:[%s14567_s6 + $0x2a8] sm:$0xff]  ;;  %v7694_v47 = vld [vmem:[%s14567_s6 + $0x2b0] sm:$0xff]  ;;  %v7696_v8 = vld [vmem:[%s14567_s6 + $0x2c0] sm:$0xff] }
 0x7aa   :  { %10795 = vmatprep.subr.bf16.mxu0 %v10794_v34 }
 0x7ab   :  { %v4189_v54 = vpop.f32.mrb[226].mxu1 }
 0x7ac   :  { %9668 = vmatmul.mubr.msk.f32.gmra.mrb[168].mxu0 %vm2832_vm5, %v7579_v30  ;;  %v9806_v19 = vpop.f32.mrb[227].mxu1  ;;  %v7697_v30 = vld [vmem:[%s14567_s6 + $0x2c8] sm:$0xff] }
 0x7ad   :  { %10797 = vmatpush3.bf16.msra.mxu0 %v10794_v34  ;;  %9670 = vmatprep.mubr.msk.f32.mxu0 %vm2832_vm5, %v7580_v56  ;;  %v7643_v34 = vld [vmem:[%s14567_s6 + $0x250] sm:$0xff]  ;;  %v7700_v19 = vld [vmem:[%s14567_s6 + $0x2e0] sm:$0xff] }
 0x7ae   :  { %9752 = vmatprep.subr.msk.mxu0 %vm2893_vm6, %v3832_v51  ;;  %v7698_v56 = vld [vmem:[%s14567_s6 + $0x2d0] sm:$0xff] }
 0x7af   :  { %v4194_v57 = vpop.f32.mrb[228].mxu1 }
 0x7b0   :  { %v10811_v61 = vpack.c.bf16 %v4194_v57, %v4189_v54  ;;  %9671 = vmatmul.mubr.msk.f32.gmra.mrb[170].mxu0 %vm2832_vm5, %v7581_v58  ;;  %v9809_v63 = vpop.f32.mrb[229].mxu1  ;;  %v7699_v54 = vld [vmem:[%s14567_s6 + $0x2d8] sm:$0xff]  ;;  %v7701_v58 = vld [vmem:[%s14567_s6 + $0x2e8] sm:$0xff] }
 0x7b1   :  { %9753 = vmatpush3.msk.msra.mxu0 %vm2893_vm6, %v3832_v51  ;;  %9673 = vmatprep.mubr.msk.f32.mxu0 %vm2832_vm5, %v7582_v14  ;;  %v7647_v51 = vld [vmem:[%s14567_s6 + $0x270] sm:$0xff]  ;;  %v7703_v57 = vld [vmem:[%s14567_s6 + $0x2f8] sm:$0xff]  ;;  %v7705_v63 = vld [vmem:[%s14567_s6 + $0x308] sm:$0xff] }
 0x7b2   :  { %10808 = vmatprep.subr.bf16.mxu0 %v10807_v46  ;;  %v7702_v14 = vld [vmem:[%s14567_s6 + $0x2f0] sm:$0xff] }
 0x7b3   :  { %v4199_v26 = vpop.f32.mrb[230].mxu1 }
 0x7b4   :  { %9674 = vmatmul.mubr.msk.f32.gmra.mrb[172].mxu0 %vm2832_vm5, %v7583_v62  ;;  %v9812_v1 = vpop.f32.mrb[231].mxu1  ;;  %v7706_v62 = vld [vmem:[%s14567_s6 + $0x310] sm:$0xff] }
 0x7b5   :  { %9676 = vmatprep.mubr.msk.f32.mxu0 %vm2832_vm5, %v7584_v29  ;;  %v7707_v29 = vld [vmem:[%s14567_s6 + $0x318] sm:$0xff]  ;;  %v4662_v1 = vld [vmem:[%s14568_s10 + $0x8] sm:$0xff] }
 0x7b7   :  { %v4204_v33 = vpop.f32.mrb[232].mxu1 }
 0x7b8   :  { %v10815_v0 = vpack.c.bf16 %v4204_v33, %v4199_v26  ;;  %9677 = vmatmul.mubr.msk.f32.gmra.mrb[174].mxu0 %vm2832_vm5, %v7585_v48  ;;  %v9815_v4 = vpop.f32.mrb[233].mxu1  ;;  %v4661_v26 = vld [vmem:[%s14568_s10] sm:$0xff]  ;;  %v4664_v33 = vld [vmem:[%s14568_s10 + $0x18] sm:$0xff] }
 0x7b9   :  { %9679 = vmatprep.mubr.msk.f32.mxu0 %vm2832_vm5, %v7586_v35  ;;  %v10827_v48 = vpack.c.bf16 %v4662_v1, %v4661_v26  ;;  %v4663_v35 = vld [vmem:[%s14568_s10 + $0x10] sm:$0xff]  ;;  %v4665_v4 = vld [vmem:[%s14568_s10 + $0x20] sm:$0xff] }
 0x7bb   :  { %v4209_v39 = vpop.f32.mrb[234].mxu1  ;;  %10828 = vmatprep.subr.bf16.mxu1 %v10827_v48 }
 0x7bc   :  { %9680 = vmatmul.mubr.msk.f32.gmra.mrb[176].mxu0 %vm2832_vm5, %v7587_v3  ;;  %v9818_v6 = vpop.f32.mrb[235].mxu1  ;;  %10830 = vmatpush3.bf16.msra.mxu1 %v10827_v48  ;;  %v4509_v3 = vpop.permute.xlu0 %4508 }
 0x7bd   :  { %9682 = vmatprep.mubr.msk.f32.mxu0 %vm2832_vm5, %v7588_v20  ;;  %v4504_v20 = vpop.permute.xlu1 %4503 }
 0x7bf   :  { %v4214_v12 = vpop.f32.mrb[236].mxu1 }
 0x7c0   :  { %v10819_v55 = vpack.c.bf16 %v4214_v12, %v4209_v39  ;;  %9683 = vmatmul.mubr.msk.f32.gmra.mrb[178].mxu0 %vm2832_vm5, %v7589_v7  ;;  %v9821_v11 = vpop.f32.mrb[237].mxu1  ;;  %v4519_v39 = vpop.permute.xlu0 %4518 }
 0x7c1   :  { %9754 = vmatprep.mubr.msk.f32.mxu0 %vm2832_vm5, %v7629_v5  ;;  %v4514_v6 = vpop.permute.xlu1 %4513 }
 0x7c3   :  { %v4219_v18 = vpop.f32.mrb[238].mxu1 }
 0x7c4   :  { %9755 = vmatmul.mubr.msk.f32.vlgmr.msra.gmra.mrb[160].mxu0 %vm2832_vm5, %v7630_v13  ;;  %v9824_v17 = vpop.f32.mrb[239].mxu1  ;;  %v4529_v7 = vpop.permute.xlu0 %4528 }
 0x7c5   :  { %10810 = vmatpush3.bf16.msra.mxu0 %v10807_v46  ;;  %9757 = vmatprep.mubr.msk.f32.mxu0 %vm2832_vm5, %v7631_v25  ;;  %v7695_v46 = vld [vmem:[%s14567_s6 + $0x2b8] sm:$0xff]  ;;  %v4524_v5 = vpop.permute.xlu1 %4523 }
 0x7c6   :  { %10812 = vmatprep.subr.bf16.mxu0 %v10811_v61 }
 0x7c7   :  { %v4224_v60 = vpop.f32.mrb[240].mxu1 }
 0x7c8   :  { %v10823_v21 = vpack.c.bf16 %v4224_v60, %v4219_v18  ;;  %9758 = vmatmul.mubr.msk.f32.gmra.mrb[162].mxu0 %vm2832_vm5, %v7632_v10  ;;  %v9827_v22 = vpop.f32.mrb[241].mxu1  ;;  %v4539_v12 = vpop.permute.xlu0 %4538 }
 0x7c9   :  { %10814 = vmatpush3.bf16.msra.mxu0 %v10811_v61  ;;  %9760 = vmatprep.mubr.msk.f32.mxu0 %vm2832_vm5, %v7633_v9  ;;  %v7704_v61 = vld [vmem:[%s14567_s6 + $0x300] sm:$0xff]  ;;  %v4534_v11 = vpop.permute.xlu1 %4533 }
 0x7ca   :  { %10816 = vmatprep.subr.bf16.mxu0 %v10815_v0 }
 0x7cb   :  { %v4229_v41 = vpop.f32.mrb[242].mxu1 }
 0x7cc   :  { %9761 = vmatmul.mubr.msk.f32.gmra.mrb[164].mxu0 %vm2832_vm5, %v7634_v16  ;;  %v9830_v24 = vpop.f32.mrb[243].mxu1  ;;  %v4549_v60 = vpop.permute.xlu0 %4548 }
 0x7cd   :  { %10818 = vmatpush3.bf16.msra.mxu0 %v10815_v0  ;;  %9763 = vmatprep.mubr.msk.f32.mxu0 %vm2832_vm5, %v7635_v59  ;;  %v10831_v0 = vpack.c.bf16 %v4664_v33, %v4663_v35  ;;  %v4544_v22 = vpop.permute.xlu1 %4543 }
 0x7ce   :  { %10820 = vmatprep.subr.bf16.mxu0 %v10819_v55 }
 0x7cf   :  { %10832 = vmatprep.subr.bf16.mxu1 %v10831_v0 }
 0x7d0   :  { %9764 = vmatmul.mubr.msk.f32.gmra.mrb[166].mxu0 %vm2832_vm5, %v7636_v23  ;;  %10834 = vmatpush3.bf16.msra.mxu1 %v10831_v0  ;;  %v4559_v23 = vpop.permute.xlu0 %4558 }
 0x7d1   :  { %10822 = vmatpush3.bf16.msra.mxu0 %v10819_v55  ;;  %9766 = vmatprep.mubr.msk.f32.mxu0 %vm2832_vm5, %v7637_v27 }
 0x7d2   :  { %10824 = vmatprep.subr.bf16.mxu0 %v10823_v21  ;;  %9891 = vmatprep.subr.mxu1 %v4665_v4 }
 0x7d4   :  { %9767 = vmatmul.mubr.msk.f32.gmra.mrb[168].mxu0 %vm2832_vm5, %v7638_v31  ;;  %9892 = vmatpush3.msra.mxu1 %v4665_v4  ;;  %v4554_v31 = vpop.permute.xlu1 %4553 }
 0x7d5   :  { %10826 = vmatpush3.bf16.msra.mxu0 %v10823_v21  ;;  %9769 = vmatprep.mubr.msk.f32.mxu0 %vm2832_vm5, %v7639_v28 }
 0x7d6   :  { %9851 = vmatprep.subr.msk.mxu0 %vm2893_vm6, %v4229_v41  ;;  %10835 = vmatprep.subr.bf16.mxu1 %v11225_v52 }
 0x7d8   :  { %9770 = vmatmul.mubr.msk.f32.gmra.mrb[170].mxu0 %vm2832_vm5, %v7640_v15 }
 0x7d9   :  { %9852 = vmatpush3.msk.msra.mxu0 %vm2893_vm6, %v4229_v41  ;;  %9772 = vmatprep.mubr.msk.f32.mxu0 %vm2832_vm5, %v7641_v32 }
 0x7dc   :  { %9773 = vmatmul.mubr.msk.f32.gmra.mrb[172].mxu0 %vm2832_vm5, %v7642_v37 }
 0x7dd   :  { %9775 = vmatprep.mubr.msk.f32.mxu0 %vm2832_vm5, %v7643_v34 }
 0x7e0   :  { %9776 = vmatmul.mubr.msk.f32.gmra.mrb[174].mxu0 %vm2832_vm5, %v7644_v2 }
 0x7e1   :  { %9778 = vmatprep.mubr.msk.f32.mxu0 %vm2832_vm5, %v7645_v36 }
 0x7e4   :  { %9779 = vmatmul.mubr.msk.f32.gmra.mrb[176].mxu0 %vm2832_vm5, %v7646_v38 }
 0x7e5   :  { %9781 = vmatprep.mubr.msk.f32.mxu0 %vm2832_vm5, %v7647_v51 }
 0x7e8   :  { %9782 = vmatmul.mubr.msk.f32.gmra.mrb[178].mxu0 %vm2832_vm5, %v7648_v40  ;;  %v4569_v40 = vpop.permute.xlu0 %4568 }
 0x7e9   :  { %9853 = vmatprep.mubr.msk.f32.mxu0 %vm2832_vm5, %v7688_v42 }
 0x7ec   :  { %9854 = vmatmul.mubr.msk.f32.vlgmr.msra.gmra.mrb[160].mxu0 %vm2832_vm5, %v7689_v43 }
 0x7ed   :  { %9856 = vmatprep.mubr.msk.f32.mxu0 %vm2832_vm5, %v7690_v49  ;;  %v4564_v49 = vpop.permute.xlu1 %4563 }
 0x7f0   :  { %9857 = vmatmul.mubr.msk.f32.gmra.mrb[162].mxu0 %vm2832_vm5, %v7691_v45 }
 0x7f1   :  { %9859 = vmatprep.mubr.msk.f32.mxu0 %vm2832_vm5, %v7692_v50 }
 0x7f4   :  { %9860 = vmatmul.mubr.msk.f32.gmra.mrb[164].mxu0 %vm2832_vm5, %v7693_v44 }
 0x7f5   :  { %9862 = vmatprep.mubr.msk.f32.mxu0 %vm2832_vm5, %v7694_v47 }
 0x7f8   :  { %9863 = vmatmul.mubr.msk.f32.gmra.mrb[166].mxu0 %vm2832_vm5, %v7695_v46 }
 0x7f9   :  { %9865 = vmatprep.mubr.msk.f32.mxu0 %vm2832_vm5, %v7696_v8 }
 0x7fc   :  { %9866 = vmatmul.mubr.msk.f32.gmra.mrb[168].mxu0 %vm2832_vm5, %v7697_v30  ;;  %v4579_v30 = vpop.permute.xlu0 %4578 }
 0x7fd   :  { %9868 = vmatprep.mubr.msk.f32.mxu0 %vm2832_vm5, %v7698_v56 }
 0x800   :  { %9869 = vmatmul.mubr.msk.f32.gmra.mrb[170].mxu0 %vm2832_vm5, %v7699_v54  ;;  %v4574_v54 = vpop.permute.xlu1 %4573  ;;  %v4589_v1 = vpop.permute.xlu0 %4588 }
 0x801   :  { %9871 = vmatprep.mubr.msk.f32.mxu0 %vm2832_vm5, %v7700_v19 }
 0x804   :  { %9872 = vmatmul.mubr.msk.f32.gmra.mrb[172].mxu0 %vm2832_vm5, %v7701_v58  ;;  %v4584_v33 = vpop.permute.xlu1 %4583 }
 0x805   :  { %9874 = vmatprep.mubr.msk.f32.mxu0 %vm2832_vm5, %v7702_v14 }
 0x808   :  { %9875 = vmatmul.mubr.msk.f32.gmra.mrb[174].mxu0 %vm2832_vm5, %v7703_v57 }
 0x809   :  { %9877 = vmatprep.mubr.msk.f32.mxu0 %vm2832_vm5, %v7704_v61 }
 0x80c   :  { %9878 = vmatmul.mubr.msk.f32.gmra.mrb[176].mxu0 %vm2832_vm5, %v7705_v63 }
 0x80d   :  { %9880 = vmatprep.mubr.msk.f32.mxu0 %vm2832_vm5, %v7706_v62 }
 0x810   :  { %9881 = vmatmul.mubr.msk.f32.gmra.mrb[178].mxu0 %vm2832_vm5, %v7707_v29 }
 0x8bf   :  { %v9855_v55 = vpop.f32.mrb[160].mxu0 }
 0x8c0   :  { %v4602_v13 = vadd.f32 %v9855_v55, %v4509_v3  ;;  %v4362_v25 = vpop.f32.mrb[161].mxu0 }
 0x8c1   :  { %v4601_v18 = vadd.f32 %v4504_v20, %v4362_v25 }
 0x8c3   :  { %11129 = vtanh.f32 %v4601_v18  ;;  %v9858_v17 = vpop.f32.mrb[162].mxu0 }
 0x8c4   :  { %11131 = vtanh.f32 %v4602_v13  ;;  %v4604_v10 = vadd.f32 %v9858_v17, %v4519_v39  ;;  %v4372_v9 = vpop.f32.mrb[163].mxu0 }
 0x8c5   :  { %v4603_v21 = vadd.f32 %v4514_v6, %v4372_v9 }
 0x8c7   :  { %11133 = vtanh.f32 %v4603_v21  ;;  %v9861_v16 = vpop.f32.mrb[164].mxu0 }
 0x8c8   :  { %11135 = vtanh.f32 %v4604_v10  ;;  %v4606_v59 = vadd.f32 %v9861_v16, %v4529_v7  ;;  %v4382_v41 = vpop.f32.mrb[165].mxu0  ;;  %v4599_v7 = vpop.permute.xlu0 %4598  ;;  %v4642_v16 = vld [vmem:[%s14569_s9 + $0x8] sm:$0xff] }
 0x8c9   :  { %v4605_v24 = vadd.f32 %v4524_v5, %v4382_v41  ;;  %v5052_v41 = vld [vmem:[%s14570_s12 + $0x8] sm:$0xff] }
 0x8cb   :  { %11137 = vtanh.f32 %v4605_v24  ;;  %v9864_v27 = vpop.f32.mrb[166].mxu0 }
 0x8cc   :  { %11139 = vtanh.f32 %v4606_v59  ;;  %v4608_v28 = vadd.f32 %v9864_v27, %v4539_v12  ;;  %v4392_v15 = vpop.f32.mrb[167].mxu0  ;;  %v4594_v12 = vpop.permute.xlu1 %4593  ;;  %v5051_v59 = vld [vmem:[%s14570_s12] sm:$0xff] }
 0x8cd   :  { %v11130_v32 = vpop.eup %11129  ;;  %v4607_v37 = vadd.f32 %v4534_v11, %v4392_v15  ;;  %v10865_v24 = vpack.c.bf16 %v5052_v41, %v5051_v59 }
 0x8ce   :  { %v11132_v34 = vpop.eup %11131  ;;  %9893 = vmatprep.mubr.msk.f32.mxu1 %vm2348_vm3, %v11130_v32 }
 0x8cf   :  { %11141 = vtanh.f32 %v4607_v37  ;;  %v9867_v2 = vpop.f32.mrb[168].mxu0  ;;  %9894 = vmatmul.mubr.msk.f32.vlgmr.msra.gmra.mrb[244].mxu1 %vm2348_vm3, %v11132_v34  ;;  %10866 = vmatprep.subr.bf16.mxu0 %v10865_v24 }
 0x8d0   :  { %11143 = vtanh.f32 %v4608_v28  ;;  %v4610_v36 = vadd.f32 %v9867_v2, %v4549_v60  ;;  %v4402_v38 = vpop.f32.mrb[169].mxu0  ;;  %10868 = vmatpush3.bf16.msra.mxu0 %v10865_v24 }
 0x8d1   :  { %v11134_v51 = vpop.eup %11133  ;;  %v4609_v42 = vadd.f32 %v4544_v22, %v4402_v38 }
 0x8d2   :  { %v11136_v43 = vpop.eup %11135  ;;  %9896 = vmatprep.mubr.msk.f32.mxu1 %vm2348_vm3, %v11134_v51 }
 0x8d3   :  { %11145 = vtanh.f32 %v4609_v42  ;;  %v9870_v45 = vpop.f32.mrb[170].mxu0  ;;  %9897 = vmatmul.mubr.msk.f32.gmra.mrb[246].mxu1 %vm2348_vm3, %v11136_v43 }
 0x8d4   :  { %11147 = vtanh.f32 %v4610_v36  ;;  %v4612_v50 = vadd.f32 %v9870_v45, %v4559_v23  ;;  %v4412_v44 = vpop.f32.mrb[171].mxu0 }
 0x8d5   :  { %v11138_v47 = vpop.eup %11137  ;;  %v4611_v46 = vadd.f32 %v4554_v31, %v4412_v44 }
 0x8d6   :  { %v11140_v8 = vpop.eup %11139  ;;  %9899 = vmatprep.mubr.msk.f32.mxu1 %vm2348_vm3, %v11138_v47 }
 0x8d7   :  { %11149 = vtanh.f32 %v4611_v46  ;;  %v9873_v56 = vpop.f32.mrb[172].mxu0  ;;  %9900 = vmatmul.mubr.msk.f32.gmra.mrb[248].mxu1 %vm2348_vm3, %v11140_v8 }
 0x8d8   :  { %11151 = vtanh.f32 %v4612_v50  ;;  %v4614_v19 = vadd.f32 %v9873_v56, %v4569_v40  ;;  %v4422_v58 = vpop.f32.mrb[173].mxu0 }
 0x8d9   :  { %v11142_v14 = vpop.eup %11141  ;;  %v4613_v57 = vadd.f32 %v4564_v49, %v4422_v58 }
 0x8da   :  { %v11144_v61 = vpop.eup %11143  ;;  %9902 = vmatprep.mubr.msk.f32.mxu1 %vm2348_vm3, %v11142_v14 }
 0x8db   :  { %11153 = vtanh.f32 %v4613_v57  ;;  %v9876_v63 = vpop.f32.mrb[174].mxu0  ;;  %9903 = vmatmul.mubr.msk.f32.gmra.mrb[250].mxu1 %vm2348_vm3, %v11144_v61 }
 0x8dc   :  { %11155 = vtanh.f32 %v4614_v19  ;;  %v4616_v62 = vadd.f32 %v9876_v63, %v4579_v30  ;;  %v4432_v29 = vpop.f32.mrb[175].mxu0  ;;  %v4641_v63 = vld [vmem:[%s14569_s9] sm:$0xff] }
 0x8dd   :  { %v11146_v26 = vpop.eup %11145  ;;  %v4615_v48 = vadd.f32 %v4574_v54, %v4432_v29  ;;  %v4643_v29 = vld [vmem:[%s14569_s9 + $0x10] sm:$0xff] }
 0x8de   :  { %v11148_v35 = vpop.eup %11147  ;;  %9905 = vmatprep.mubr.msk.f32.mxu1 %vm2348_vm3, %v11146_v26  ;;  %v4646_v26 = vld [vmem:[%s14569_s9 + $0x28] sm:$0xff] }
 0x8df   :  { %11157 = vtanh.f32 %v4615_v48  ;;  %v9879_v0 = vpop.f32.mrb[176].mxu0  ;;  %9906 = vmatmul.mubr.msk.f32.gmra.mrb[252].mxu1 %vm2348_vm3, %v11148_v35  ;;  %v4648_v48 = vld [vmem:[%s14569_s9 + $0x38] sm:$0xff]  ;;  %v4647_v35 = vld [vmem:[%s14569_s9 + $0x30] sm:$0xff] }
 0x8e0   :  { %11159 = vtanh.f32 %v4616_v62  ;;  %v4618_v4 = vadd.f32 %v9879_v0, %v4589_v1  ;;  %v4442_v3 = vpop.f32.mrb[177].mxu0  ;;  %v4644_v62 = vld [vmem:[%s14569_s9 + $0x18] sm:$0xff]  ;;  %v4645_v1 = vld [vmem:[%s14569_s9 + $0x20] sm:$0xff] }
 0x8e1   :  { %v11150_v20 = vpop.eup %11149  ;;  %v4617_v39 = vadd.f32 %v4584_v33, %v4442_v3  ;;  %v4650_v33 = vld [vmem:[%s14569_s9 + $0x48] sm:$0xff]  ;;  %v4649_v0 = vld [vmem:[%s14569_s9 + $0x40] sm:$0xff]  ;;  %v4651_v3 = vld [vmem:[%s14569_s9 + $0x50] sm:$0xff] }
 0x8e2   :  { %v11152_v6 = vpop.eup %11151  ;;  %9908 = vmatprep.mubr.msk.f32.mxu1 %vm2348_vm3, %v11150_v20  ;;  %v4654_v20 = vld [vmem:[%s14569_s9 + $0x68] sm:$0xff] }
 0x8e3   :  { %11161 = vtanh.f32 %v4617_v39  ;;  %v9882_v5 = vpop.f32.mrb[178].mxu0  ;;  %9909 = vmatmul.mubr.msk.f32.gmra.mrb[254].mxu1 %vm2348_vm3, %v11152_v6  ;;  %v4653_v39 = vld [vmem:[%s14569_s9 + $0x60] sm:$0xff]  ;;  %v4656_v6 = vld [vmem:[%s14569_s9 + $0x78] sm:$0xff] }
 0x8e4   :  { %11163 = vtanh.f32 %v4618_v4  ;;  %v4620_v55 = vadd.f32 %v9882_v5, %v4599_v7  ;;  %v4452_v11 = vpop.f32.mrb[179].mxu0  ;;  %v4652_v4 = vld [vmem:[%s14569_s9 + $0x58] sm:$0xff]  ;;  %v4655_v7 = vld [vmem:[%s14569_s9 + $0x70] sm:$0xff]  ;;  %v4658_v5 = vld [vmem:[%s14569_s9 + $0x88] sm:$0xff] }
 0x8e5   :  { %v11154_v13 = vpop.eup %11153  ;;  %v4619_v25 = vadd.f32 %v4594_v12, %v4452_v11  ;;  %v4657_v12 = vld [vmem:[%s14569_s9 + $0x80] sm:$0xff]  ;;  %v4659_v11 = vld [vmem:[%s14569_s9 + $0x90] sm:$0xff] }
 0x8e6   :  { %v11156_v18 = vpop.eup %11155  ;;  %9911 = vmatprep.mubr.msk.f32.mxu1 %vm2348_vm3, %v11154_v13  ;;  %v5053_v13 = vld [vmem:[%s14570_s12 + $0x10] sm:$0xf] }
 0x8e7   :  { %11165 = vtanh.f32 %v4619_v25  ;;  %9912 = vmatmul.mubr.msk.f32.gmra.mrb[0].mxu1 %vm2348_vm3, %v11156_v18  ;;  %9927 = vmatprep.subr.msk.mxu0 %vm2893_vm6, %v5053_v13  ;;  %v7803_v25 = vld [vmem:[%s14570_s12 + $0x18] sm:$0xff]  ;;  %v7804_v18 = vld [vmem:[%s14570_s12 + $0x20] sm:$0xff] }
 0x8e8   :  { %11167 = vtanh.f32 %v4620_v55  ;;  %v4660_v55 = vld [vmem:[%s14569_s9 + $0x98] sm:$0xff]  ;;  %9928 = vmatpush3.msk.msra.mxu0 %vm2893_vm6, %v5053_v13 }
 0x8e9   :  { %v11158_v17 = vpop.eup %11157 }
 0x8ea   :  { %v11160_v10 = vpop.eup %11159  ;;  %9914 = vmatprep.mubr.msk.f32.mxu1 %vm2348_vm3, %v11158_v17  ;;  %v10869_v17 = vpack.c.bf16 %v7804_v18, %v7803_v25  ;;  %v7788_v25 = vld [vmem:[%s14571_s11 + $0x78] sm:$0xff]  ;;  %v5041_v18 = vld [vmem:[%s14571_s11 + $0x28] sm:$0xff] }
 0x8eb   :  { %9915 = vmatmul.mubr.msk.f32.gmra.mrb[2].mxu1 %vm2348_vm3, %v11160_v10 }
 0x8ec   :  { %10870 = vmatprep.subr.bf16.mxu0 %v10869_v17 }
 0x8ed   :  { %v11162_v9 = vpop.eup %11161 }
 0x8ee   :  { %v11164_v60 = vpop.eup %11163  ;;  %9917 = vmatprep.mubr.msk.f32.mxu1 %vm2348_vm3, %v11162_v9 }
 0x8ef   :  { %9918 = vmatmul.mubr.msk.f32.gmra.mrb[4].mxu1 %vm2348_vm3, %v11164_v60 }
 0x8f1   :  { %v11166_v21 = vpop.eup %11165 }
 0x8f2   :  { %v11168_v22 = vpop.eup %11167  ;;  %9920 = vmatprep.mubr.msk.f32.mxu1 %vm2348_vm3, %v11166_v21  ;;  %v7805_v21 = vld [vmem:[%s14570_s12 + $0x28] sm:$0xf] }
 0x8f3   :  { %9921 = vmatmul.mubr.msk.f32.gmra.mrb[6].mxu1 %vm2348_vm3, %v11168_v22 }
 0x8f4   :  { %7767 = vmatprep.mubr.msk.f32.mxu1 %vm309_vm1, %v4642_v16 }
 0x9a2   :  { %v9895_v23 = vpop.f32.mrb[244].mxu1 }
 0x9a3   :  { %v4792_v27 = vpop.f32.mrb[245].mxu1 }
 0x9a4   :  { %v10836_v31 = vpack.c.bf16 %v9895_v23, %v4792_v27 }
 0x9a6   :  { %v9898_v28 = vpop.f32.mrb[246].mxu1  ;;  %10837 = vmatpush1.bf16.msra.mxu1 %v10836_v31 }
 0x9a7   :  { %v4802_v15 = vpop.f32.mrb[247].mxu1  ;;  %10838 = vmatprep.subr.bf16.mxu1 %v11225_v52 }
 0x9a8   :  { %v10839_v32 = vpack.c.bf16 %v9898_v28, %v4802_v15 }
 0x9aa   :  { %v9901_v37 = vpop.f32.mrb[248].mxu1  ;;  %10840 = vmatpush1.bf16.msra.mxu1 %v10839_v32 }
 0x9ab   :  { %v4812_v34 = vpop.f32.mrb[249].mxu1  ;;  %10841 = vmatprep.subr.bf16.mxu1 %v11225_v52 }
 0x9ac   :  { %v10842_v2 = vpack.c.bf16 %v9901_v37, %v4812_v34 }
 0x9ae   :  { %v9904_v36 = vpop.f32.mrb[250].mxu1  ;;  %10843 = vmatpush1.bf16.msra.mxu1 %v10842_v2 }
 0x9af   :  { %v4822_v38 = vpop.f32.mrb[251].mxu1  ;;  %10844 = vmatprep.subr.bf16.mxu1 %v11225_v52 }
 0x9b0   :  { %v10845_v51 = vpack.c.bf16 %v9904_v36, %v4822_v38 }
 0x9b2   :  { %v9907_v40 = vpop.f32.mrb[252].mxu1  ;;  %10846 = vmatpush1.bf16.msra.mxu1 %v10845_v51 }
 0x9b3   :  { %v4832_v42 = vpop.f32.mrb[253].mxu1  ;;  %10847 = vmatprep.subr.bf16.mxu1 %v11225_v52 }
 0x9b4   :  { %v10848_v43 = vpack.c.bf16 %v9907_v40, %v4832_v42 }
 0x9b6   :  { %v9910_v49 = vpop.f32.mrb[254].mxu1  ;;  %10849 = vmatpush1.bf16.msra.mxu1 %v10848_v43 }
 0x9b7   :  { %v4842_v45 = vpop.f32.mrb[255].mxu1  ;;  %10850 = vmatprep.subr.bf16.mxu1 %v11225_v52 }
 0x9b8   :  { %v10851_v50 = vpack.c.bf16 %v9910_v49, %v4842_v45 }
 0x9ba   :  { %v9913_v44 = vpop.f32.mrb[0].mxu1  ;;  %10852 = vmatpush1.bf16.msra.mxu1 %v10851_v50 }
 0x9bb   :  { %v4852_v47 = vpop.f32.mrb[1].mxu1  ;;  %10853 = vmatprep.subr.bf16.mxu1 %v11225_v52 }
 0x9bc   :  { %v10854_v46 = vpack.c.bf16 %v9913_v44, %v4852_v47 }
 0x9be   :  { %v9916_v8 = vpop.f32.mrb[2].mxu1  ;;  %10855 = vmatpush1.bf16.msra.mxu1 %v10854_v46 }
 0x9bf   :  { %v4862_v30 = vpop.f32.mrb[3].mxu1  ;;  %10856 = vmatprep.subr.bf16.mxu1 %v11225_v52 }
 0x9c0   :  { %v10857_v56 = vpack.c.bf16 %v9916_v8, %v4862_v30 }
 0x9c2   :  { %v9919_v54 = vpop.f32.mrb[4].mxu1  ;;  %10858 = vmatpush1.bf16.msra.mxu1 %v10857_v56 }
 0x9c3   :  { %v4872_v19 = vpop.f32.mrb[5].mxu1  ;;  %10859 = vmatprep.subr.bf16.mxu1 %v11225_v52 }
 0x9c4   :  { %v10860_v58 = vpack.c.bf16 %v9919_v54, %v4872_v19 }
 0x9c6   :  { %v9922_v14 = vpop.f32.mrb[6].mxu1  ;;  %10861 = vmatpush1.bf16.msra.mxu1 %v10860_v58 }
 0x9c7   :  { %v4882_v57 = vpop.f32.mrb[7].mxu1  ;;  %10862 = vmatprep.subr.bf16.mxu1 %v11225_v52 }
 0x9c8   :  { %v10863_v61 = vpack.c.bf16 %v9922_v14, %v4882_v57  ;;  %v5036_v57 = vld [vmem:[%s14571_s11] sm:$0xff] }
 0x9ca   :  { %10864 = vmatpush1.bf16.msra.mxu1 %v10863_v61 }
 0x9cb   :  { %10873 = vmatprep.subr.bf16.mxu1 %v11225_v52 }
 0x9cd   :  { %4986 = vmatmul.mubr.f32.vlgmr.msra.gmra.mrb[8].mxu1 %v4641_v63 }
 0x9ce   :  { %7768 = vmatprep.mubr.msk.f32.mxu1 %vm309_vm1, %v4644_v62 }
 0x9d1   :  { %4991 = vmatmul.mubr.f32.gmra.mrb[10].mxu1 %v4643_v29  ;;  %v5037_v29 = vld [vmem:[%s14571_s11 + $0x8] sm:$0xff] }
 0x9d2   :  { %7769 = vmatprep.mubr.msk.f32.mxu1 %vm309_vm1, %v4646_v26 }
 0x9d5   :  { %4996 = vmatmul.mubr.f32.gmra.mrb[12].mxu1 %v4645_v1 }
 0x9d6   :  { %7770 = vmatprep.mubr.msk.f32.mxu1 %vm309_vm1, %v4648_v48 }
 0x9d9   :  { %5001 = vmatmul.mubr.f32.gmra.mrb[14].mxu1 %v4647_v35  ;;  %v5038_v35 = vld [vmem:[%s14571_s11 + $0x10] sm:$0xff] }
 0x9da   :  { %7771 = vmatprep.mubr.msk.f32.mxu1 %vm309_vm1, %v4650_v33 }
 0x9dd   :  { %5006 = vmatmul.mubr.f32.gmra.mrb[16].mxu1 %v4649_v0 }
 0x9de   :  { %7772 = vmatprep.mubr.msk.f32.mxu1 %vm309_vm1, %v4652_v4 }
 0x9e1   :  { %5011 = vmatmul.mubr.f32.gmra.mrb[18].mxu1 %v4651_v3  ;;  %v5039_v3 = vld [vmem:[%s14571_s11 + $0x18] sm:$0xff] }
 0x9e2   :  { %7773 = vmatprep.mubr.msk.f32.mxu1 %vm309_vm1, %v4654_v20 }
 0x9e5   :  { %5016 = vmatmul.mubr.f32.gmra.mrb[20].mxu1 %v4653_v39 }
 0x9e6   :  { %7774 = vmatprep.mubr.msk.f32.mxu1 %vm309_vm1, %v4656_v6  ;;  %v7862_v6 = vld [vmem:[%s14570_s12 + $0x30] sm:$0xff] }
 0x9e9   :  { %5021 = vmatmul.mubr.f32.gmra.mrb[22].mxu1 %v4655_v7  ;;  %v7863_v7 = vld [vmem:[%s14570_s12 + $0x38] sm:$0xff] }
 0x9ea   :  { %7775 = vmatprep.mubr.msk.f32.mxu1 %vm309_vm1, %v4658_v5 }
 0x9ed   :  { %5026 = vmatmul.mubr.f32.gmra.mrb[24].mxu1 %v4657_v12  ;;  %v5040_v12 = vld [vmem:[%s14571_s11 + $0x20] sm:$0xff] }
 0x9ee   :  { %7776 = vmatprep.mubr.msk.f32.mxu1 %vm309_vm1, %v4660_v55 }
 0x9f1   :  { %5031 = vmatmul.mubr.f32.gmra.mrb[26].mxu1 %v4659_v11  ;;  %v10903_v11 = vpack.c.bf16 %v7863_v7, %v7862_v6 }
 0x9f2   :  { %9985 = vmatprep.mubr.msk.f32.mxu1 %vm11226_vm0, %v11227_v53 }
 0xaa0   :  { %v13742_v10 = vpop.f32.mrb[8].mxu1 }
 0xaa1   :  { %v4989_v9 = vpop.f32.mrb[9].mxu1  ;;  %9929 = vmatprep.mubr.msk.f32.mxu0 %vm5054_vm7, %v13742_v10 }
 0xaa2   :  { %v7906_v9 = vld [vmem:[%s14570_s12 + $0x48] sm:$0xff] }
 0xaa4   :  { %v13746_v60 = vpop.f32.mrb[10].mxu1 }
 0xaa5   :  { %v4994_v22 = vpop.f32.mrb[11].mxu1  ;;  %9930 = vmatmul.mubr.msk.f32.vlgmr.msra.gmra.mrb[180].mxu0 %vm5054_vm7, %v13746_v60 }
 0xaa6   :  { %10872 = vmatpush3.bf16.msra.mxu0 %v10869_v17  ;;  %v7864_v17 = vld [vmem:[%s14570_s12 + $0x40] sm:$0xf] }
 0xaa7   :  { %9948 = vmatprep.subr.msk.mxu0 %vm2893_vm6, %v7805_v21  ;;  %v7789_v22 = vld [vmem:[%s14571_s11 + $0x80] sm:$0xff] }
 0xaa8   :  { %v13754_v16 = vpop.f32.mrb[12].mxu1 }
 0xaa9   :  { %v4999_v59 = vpop.f32.mrb[13].mxu1  ;;  %9932 = vmatprep.mubr.msk.f32.mxu0 %vm5054_vm7, %v13754_v16 }
 0xaaa   :  { %9949 = vmatpush3.msk.msra.mxu0 %vm2893_vm6, %v7805_v21  ;;  %v7907_v21 = vld [vmem:[%s14570_s12 + $0x50] sm:$0xff] }
 0xaab   :  { %10888 = vmatprep.subr.bf16.mxu0 %v11225_v52  ;;  %v5042_v59 = vld [vmem:[%s14571_s11 + $0x30] sm:$0xff] }
 0xaac   :  { %v13760_v41 = vpop.f32.mrb[14].mxu1 }
 0xaad   :  { %v5004_v24 = vpop.f32.mrb[15].mxu1  ;;  %9933 = vmatmul.mubr.msk.f32.gmra.mrb[182].mxu0 %vm5054_vm7, %v13760_v41 }
 0xaae   :  { %v13883_v24 = vpack.c.bf16 %v7907_v21, %v7906_v9 }
 0xab0   :  { %v13764_v23 = vpop.f32.mrb[16].mxu1 }
 0xab1   :  { %v5009_v27 = vpop.f32.mrb[17].mxu1  ;;  %9935 = vmatprep.mubr.msk.f32.mxu0 %vm5054_vm7, %v13764_v23 }
 0xab2   :  { %v7790_v27 = vld [vmem:[%s14571_s11 + $0x88] sm:$0xff] }
 0xab4   :  { %v13768_v31 = vpop.f32.mrb[18].mxu1 }
 0xab5   :  { %v5014_v28 = vpop.f32.mrb[19].mxu1  ;;  %9936 = vmatmul.mubr.msk.f32.gmra.mrb[184].mxu0 %vm5054_vm7, %v13768_v31 }
 0xab6   :  { %v5043_v28 = vld [vmem:[%s14571_s11 + $0x38] sm:$0xff] }
 0xab8   :  { %v13772_v15 = vpop.f32.mrb[20].mxu1 }
 0xab9   :  { %v5019_v32 = vpop.f32.mrb[21].mxu1  ;;  %9938 = vmatprep.mubr.msk.f32.mxu0 %vm5054_vm7, %v13772_v15 }
 0xaba   :  { %v7791_v32 = vld [vmem:[%s14571_s11 + $0x90] sm:$0xff] }
 0xabc   :  { %v13776_v37 = vpop.f32.mrb[22].mxu1 }
 0xabd   :  { %v5024_v34 = vpop.f32.mrb[23].mxu1  ;;  %9939 = vmatmul.mubr.msk.f32.gmra.mrb[186].mxu0 %vm5054_vm7, %v13776_v37 }
 0xabe   :  { %v5044_v34 = vld [vmem:[%s14571_s11 + $0x40] sm:$0xff] }
 0xac0   :  { %v13780_v2 = vpop.f32.mrb[24].mxu1 }
 0xac1   :  { %v5029_v36 = vpop.f32.mrb[25].mxu1  ;;  %9941 = vmatprep.mubr.msk.f32.mxu0 %vm5054_vm7, %v13780_v2 }
 0xac2   :  { %v7792_v36 = vld [vmem:[%s14571_s11 + $0x98] sm:$0xff] }
 0xac4   :  { %v13784_v38 = vpop.f32.mrb[26].mxu1 }
 0xac5   :  { %9942 = vmatmul.mubr.msk.f32.gmra.mrb[188].mxu0 %vm5054_vm7, %v13784_v38  ;;  %v5034_v51 = vpop.f32.mrb[27].mxu1 }
 0xac6   :  { %9950 = vmatprep.mubr.msk.f32.mxu0 %vm5054_vm7, %v13742_v10  ;;  %v5045_v51 = vld [vmem:[%s14571_s11 + $0x48] sm:$0xff] }
 0xac9   :  { %9951 = vmatmul.mubr.msk.f32.vlgmr.msra.gmra.mrb[190].mxu0 %vm5054_vm7, %v13746_v60 }
 0xaca   :  { %9953 = vmatprep.mubr.msk.f32.mxu0 %vm5054_vm7, %v13754_v16 }
 0xacd   :  { %9954 = vmatmul.mubr.msk.f32.gmra.mrb[192].mxu0 %vm5054_vm7, %v13760_v41 }
 0xace   :  { %9956 = vmatprep.mubr.msk.f32.mxu0 %vm5054_vm7, %v13764_v23 }
 0xad1   :  { %9957 = vmatmul.mubr.msk.f32.gmra.mrb[194].mxu0 %vm5054_vm7, %v13768_v31 }
 0xad2   :  { %9959 = vmatprep.mubr.msk.f32.mxu0 %vm5054_vm7, %v13772_v15 }
 0xad5   :  { %9960 = vmatmul.mubr.msk.f32.gmra.mrb[196].mxu0 %vm5054_vm7, %v13776_v37 }
 0xad6   :  { %9962 = vmatprep.mubr.msk.f32.mxu0 %vm5054_vm7, %v13780_v2 }
 0xad9   :  { %9963 = vmatmul.mubr.msk.f32.gmra.mrb[198].mxu0 %vm5054_vm7, %v13784_v38 }
 0xada   :  { %10050 = vmatprep.mubr.msk.f32.mxu0 %vm11226_vm0, %v11227_v53 }
 0xb78   :  { %v9931_v40 = vpop.f32.mrb[180].mxu0 }
 0xb79   :  { %v5154_v42 = vpop.f32.mrb[181].mxu0 }
 0xb7a   :  { %v10889_v43 = vpack.c.bf16 %v9931_v40, %v5154_v42  ;;  %v7793_v40 = vld [vmem:[%s14571_s11 + $0xa0] sm:$0xff]  ;;  %v5046_v42 = vld [vmem:[%s14571_s11 + $0x50] sm:$0xff] }
 0xb7c   :  { %10890 = vmatpush3.bf16.msra.mxu0 %v10889_v43  ;;  %v7794_v43 = vld [vmem:[%s14571_s11 + $0xa8] sm:$0xff] }
 0xb7d   :  { %10891 = vmatprep.subr.bf16.mxu0 %v11225_v52 }
 0xb80   :  { %v9934_v49 = vpop.f32.mrb[182].mxu0 }
 0xb81   :  { %v5164_v45 = vpop.f32.mrb[183].mxu0 }
 0xb82   :  { %v10892_v50 = vpack.c.bf16 %v9934_v49, %v5164_v45  ;;  %v5047_v49 = vld [vmem:[%s14571_s11 + $0x58] sm:$0xff]  ;;  %v7795_v45 = vld [vmem:[%s14571_s11 + $0xb0] sm:$0xff] }
 0xb84   :  { %10893 = vmatpush3.bf16.msra.mxu0 %v10892_v50  ;;  %v5048_v50 = vld [vmem:[%s14571_s11 + $0x60] sm:$0xff] }
 0xb85   :  { %10894 = vmatprep.subr.bf16.mxu0 %v11225_v52 }
 0xb88   :  { %v9937_v44 = vpop.f32.mrb[184].mxu0 }
 0xb89   :  { %v5174_v47 = vpop.f32.mrb[185].mxu0 }
 0xb8a   :  { %v10895_v46 = vpack.c.bf16 %v9937_v44, %v5174_v47  ;;  %v7796_v44 = vld [vmem:[%s14571_s11 + $0xb8] sm:$0xff]  ;;  %v5049_v47 = vld [vmem:[%s14571_s11 + $0x68] sm:$0xff] }
 0xb8c   :  { %10896 = vmatpush3.bf16.msra.mxu0 %v10895_v46  ;;  %v7797_v46 = vld [vmem:[%s14571_s11 + $0xc0] sm:$0xff] }
 0xb8d   :  { %10897 = vmatprep.subr.bf16.mxu0 %v11225_v52 }
 0xb90   :  { %v9940_v8 = vpop.f32.mrb[186].mxu0 }
 0xb91   :  { %v5184_v30 = vpop.f32.mrb[187].mxu0 }
 0xb92   :  { %v10898_v56 = vpack.c.bf16 %v9940_v8, %v5184_v30  ;;  %v5050_v8 = vld [vmem:[%s14571_s11 + $0x70] sm:$0xff]  ;;  %v7798_v30 = vld [vmem:[%s14571_s11 + $0xc8] sm:$0xff] }
 0xb94   :  { %10899 = vmatpush3.bf16.msra.mxu0 %v10898_v56  ;;  %v7799_v56 = vld [vmem:[%s14571_s11 + $0xd0] sm:$0xff] }
 0xb95   :  { %10900 = vmatprep.subr.bf16.mxu0 %v11225_v52 }
 0xb98   :  { %v9943_v54 = vpop.f32.mrb[188].mxu0 }
 0xb99   :  { %v5194_v19 = vpop.f32.mrb[189].mxu0 }
 0xb9a   :  { %v10901_v58 = vpack.c.bf16 %v9943_v54, %v5194_v19  ;;  %v7800_v54 = vld [vmem:[%s14571_s11 + $0xd8] sm:$0xff]  ;;  %v7801_v19 = vld [vmem:[%s14571_s11 + $0xe0] sm:$0xff] }
 0xb9c   :  { %v9952_v14 = vpop.f32.mrb[190].mxu0  ;;  %10902 = vmatpush3.bf16.msra.mxu0 %v10901_v58  ;;  %v7802_v58 = vld [vmem:[%s14571_s11 + $0xe8] sm:$0xff] }
 0xb9d   :  { %v5292_v61 = vpop.f32.mrb[191].mxu0  ;;  %10907 = vmatprep.subr.bf16.mxu0 %v11225_v52 }
 0xb9e   :  { %v10874_v63 = vpack.c.bf16 %v9952_v14, %v5292_v61  ;;  %v7908_v14 = vld [vmem:[%s14570_s12 + $0x58] sm:$0xf] }
 0xb9f   :  { %10051 = vmatmul.mubr.msk.f32.vlgmr.msra.gmra.mrb[200].mxu0 %vm5341_vm8, %v5036_v57 }
 0xba0   :  { %v9955_v62 = vpop.f32.mrb[192].mxu0  ;;  %10875 = vmatpush3.bf16.msra.mxu1 %v10874_v63  ;;  %10053 = vmatprep.mubr.msk.f32.mxu0 %vm11226_vm0, %v11227_v53 }
 0xba1   :  { %v5302_v26 = vpop.f32.mrb[193].mxu0  ;;  %10876 = vmatprep.subr.bf16.mxu1 %v11225_v52 }
 0xba2   :  { %v10877_v1 = vpack.c.bf16 %v9955_v62, %v5302_v26 }
 0xba3   :  { %10054 = vmatmul.mubr.msk.f32.gmra.mrb[202].mxu0 %vm5341_vm8, %v5037_v29 }
 0xba4   :  { %v9958_v48 = vpop.f32.mrb[194].mxu0  ;;  %10878 = vmatpush3.bf16.msra.mxu1 %v10877_v1  ;;  %10056 = vmatprep.mubr.msk.f32.mxu0 %vm11226_vm0, %v11227_v53 }
 0xba5   :  { %v5312_v33 = vpop.f32.mrb[195].mxu0  ;;  %10879 = vmatprep.subr.bf16.mxu1 %v11225_v52 }
 0xba6   :  { %v10880_v0 = vpack.c.bf16 %v9958_v48, %v5312_v33 }
 0xba7   :  { %10057 = vmatmul.mubr.msk.f32.gmra.mrb[204].mxu0 %vm5341_vm8, %v5038_v35 }
 0xba8   :  { %v9961_v4 = vpop.f32.mrb[196].mxu0  ;;  %10881 = vmatpush3.bf16.msra.mxu1 %v10880_v0  ;;  %10059 = vmatprep.mubr.msk.f32.mxu0 %vm11226_vm0, %v11227_v53 }
 0xba9   :  { %v5322_v20 = vpop.f32.mrb[197].mxu0  ;;  %10882 = vmatprep.subr.bf16.mxu1 %v11225_v52 }
 0xbaa   :  { %v10883_v39 = vpack.c.bf16 %v9961_v4, %v5322_v20 }
 0xbab   :  { %10060 = vmatmul.mubr.msk.f32.gmra.mrb[206].mxu0 %vm5341_vm8, %v5039_v3 }
 0xbac   :  { %v9964_v5 = vpop.f32.mrb[198].mxu0  ;;  %10884 = vmatpush3.bf16.msra.mxu1 %v10883_v39  ;;  %10062 = vmatprep.mubr.msk.f32.mxu0 %vm11226_vm0, %v11227_v53 }
 0xbad   :  { %v5332_v55 = vpop.f32.mrb[199].mxu0  ;;  %10885 = vmatprep.subr.bf16.mxu1 %v11225_v52 }
 0xbae   :  { %v10886_v13 = vpack.c.bf16 %v9964_v5, %v5332_v55 }
 0xbaf   :  { %10063 = vmatmul.mubr.msk.f32.gmra.mrb[208].mxu0 %vm5341_vm8, %v5040_v12 }
 0xbb0   :  { %10887 = vmatpush3.bf16.msra.mxu1 %v10886_v13  ;;  %10065 = vmatprep.mubr.msk.f32.mxu0 %vm11226_vm0, %v11227_v53 }
 0xbb1   :  { %10904 = vmatprep.subr.bf16.mxu1 %v10903_v11 }
 0xbb3   :  { %9986 = vmatmul.mubr.msk.f32.vlgmr.msra.gmra.mrb[28].mxu1 %vm5341_vm8, %v7788_v25  ;;  %10066 = vmatmul.mubr.msk.f32.gmra.mrb[210].mxu0 %vm5341_vm8, %v5041_v18 }
 0xbb4   :  { %9988 = vmatprep.mubr.msk.f32.mxu1 %vm11226_vm0, %v11227_v53  ;;  %10906 = vmatpush3.bf16.msra.mxu1 %v10903_v11 }
 0xbb5   :  { %10099 = vmatprep.subr.msk.mxu1 %vm2893_vm6, %v7864_v17  ;;  %10068 = vmatprep.mubr.msk.f32.mxu0 %vm11226_vm0, %v11227_v53 }
 0xbb7   :  { %9989 = vmatmul.mubr.msk.f32.gmra.mrb[30].mxu1 %vm5341_vm8, %v7789_v22  ;;  %10069 = vmatmul.mubr.msk.f32.gmra.mrb[212].mxu0 %vm5341_vm8, %v5042_v59 }
 0xbb8   :  { %9991 = vmatprep.mubr.msk.f32.mxu1 %vm11226_vm0, %v11227_v53  ;;  %10100 = vmatpush3.msk.msra.mxu1 %vm2893_vm6, %v7864_v17 }
 0xbb9   :  { %10071 = vmatprep.mubr.msk.f32.mxu0 %vm11226_vm0, %v11227_v53  ;;  %10923 = vmatprep.subr.bf16.mxu1 %v13883_v24 }
 0xbbb   :  { %9992 = vmatmul.mubr.msk.f32.gmra.mrb[32].mxu1 %vm5341_vm8, %v7790_v27  ;;  %10072 = vmatmul.mubr.msk.f32.gmra.mrb[214].mxu0 %vm5341_vm8, %v5043_v28 }
 0xbbc   :  { %9994 = vmatprep.mubr.msk.f32.mxu1 %vm11226_vm0, %v11227_v53  ;;  %10074 = vmatprep.mubr.msk.f32.mxu0 %vm11226_vm0, %v11227_v53 }
 0xbbf   :  { %9995 = vmatmul.mubr.msk.f32.gmra.mrb[34].mxu1 %vm5341_vm8, %v7791_v32  ;;  %10075 = vmatmul.mubr.msk.f32.gmra.mrb[216].mxu0 %vm5341_vm8, %v5044_v34 }
 0xbc0   :  { %9997 = vmatprep.mubr.msk.f32.mxu1 %vm11226_vm0, %v11227_v53  ;;  %10077 = vmatprep.mubr.msk.f32.mxu0 %vm11226_vm0, %v11227_v53 }
 0xbc3   :  { %9998 = vmatmul.mubr.msk.f32.gmra.mrb[36].mxu1 %vm5341_vm8, %v7792_v36  ;;  %10078 = vmatmul.mubr.msk.f32.gmra.mrb[218].mxu0 %vm5341_vm8, %v5045_v51 }
 0xbc4   :  { %10000 = vmatprep.mubr.msk.f32.mxu1 %vm11226_vm0, %v11227_v53  ;;  %10080 = vmatprep.mubr.msk.f32.mxu0 %vm11226_vm0, %v11227_v53 }
 0xbc7   :  { %10001 = vmatmul.mubr.msk.f32.gmra.mrb[38].mxu1 %vm5341_vm8, %v7793_v40  ;;  %10081 = vmatmul.mubr.msk.f32.gmra.mrb[220].mxu0 %vm5341_vm8, %v5046_v42 }
 0xbc8   :  { %10003 = vmatprep.mubr.msk.f32.mxu1 %vm11226_vm0, %v11227_v53  ;;  %10083 = vmatprep.mubr.msk.f32.mxu0 %vm11226_vm0, %v11227_v53 }
 0xbcb   :  { %10004 = vmatmul.mubr.msk.f32.gmra.mrb[40].mxu1 %vm5341_vm8, %v7794_v43  ;;  %10084 = vmatmul.mubr.msk.f32.gmra.mrb[222].mxu0 %vm5341_vm8, %v5047_v49 }
 0xbcc   :  { %10006 = vmatprep.mubr.msk.f32.mxu1 %vm11226_vm0, %v11227_v53  ;;  %10086 = vmatprep.mubr.msk.f32.mxu0 %vm11226_vm0, %v11227_v53 }
 0xbcf   :  { %10007 = vmatmul.mubr.msk.f32.gmra.mrb[42].mxu1 %vm5341_vm8, %v7795_v45  ;;  %10087 = vmatmul.mubr.msk.f32.gmra.mrb[224].mxu0 %vm5341_vm8, %v5048_v50 }
 0xbd0   :  { %10009 = vmatprep.mubr.msk.f32.mxu1 %vm11226_vm0, %v11227_v53  ;;  %10089 = vmatprep.mubr.msk.f32.mxu0 %vm11226_vm0, %v11227_v53 }
 0xbd3   :  { %10010 = vmatmul.mubr.msk.f32.gmra.mrb[44].mxu1 %vm5341_vm8, %v7796_v44  ;;  %10090 = vmatmul.mubr.msk.f32.gmra.mrb[226].mxu0 %vm5341_vm8, %v5049_v47 }
 0xbd4   :  { %10012 = vmatprep.mubr.msk.f32.mxu1 %vm11226_vm0, %v11227_v53  ;;  %10092 = vmatprep.mubr.msk.f32.mxu0 %vm11226_vm0, %v11227_v53 }
 0xbd7   :  { %10013 = vmatmul.mubr.msk.f32.gmra.mrb[46].mxu1 %vm5341_vm8, %v7797_v46  ;;  %10093 = vmatmul.mubr.msk.f32.gmra.mrb[228].mxu0 %vm5341_vm8, %v5050_v8 }
 0xbd8   :  { %10015 = vmatprep.mubr.msk.f32.mxu1 %vm11226_vm0, %v11227_v53  ;;  %10136 = vmatprep.mubr.msk.f32.mxu0 %vm11226_vm0, %v11227_v53 }
 0xbdb   :  { %10016 = vmatmul.mubr.msk.f32.gmra.mrb[48].mxu1 %vm5341_vm8, %v7798_v30 }
 0xbdc   :  { %10018 = vmatprep.mubr.msk.f32.mxu1 %vm11226_vm0, %v11227_v53 }
 0xbdf   :  { %10019 = vmatmul.mubr.msk.f32.gmra.mrb[50].mxu1 %vm5341_vm8, %v7799_v56 }
 0xbe0   :  { %10021 = vmatprep.mubr.msk.f32.mxu1 %vm11226_vm0, %v11227_v53 }
 0xbe3   :  { %10022 = vmatmul.mubr.msk.f32.gmra.mrb[52].mxu1 %vm5341_vm8, %v7800_v54 }
 0xbe4   :  { %10024 = vmatprep.mubr.msk.f32.mxu1 %vm11226_vm0, %v11227_v53 }
 0xbe7   :  { %10025 = vmatmul.mubr.msk.f32.gmra.mrb[54].mxu1 %vm5341_vm8, %v7801_v19 }
 0xbe8   :  { %10027 = vmatprep.mubr.msk.f32.mxu1 %vm11226_vm0, %v11227_v53 }
 0xbeb   :  { %10028 = vmatmul.mubr.msk.f32.gmra.mrb[56].mxu1 %vm5341_vm8, %v7802_v58 }
 0xbec   :  { %10101 = vmatprep.mubr.msk.f32.mxu1 %vm5054_vm7, %v13742_v10 }
 0xbef   :  { %10102 = vmatmul.mubr.msk.f32.vlgmr.msra.gmra.mrb[58].mxu1 %vm5054_vm7, %v13746_v60 }
 0xbf0   :  { %10104 = vmatprep.mubr.msk.f32.mxu1 %vm5054_vm7, %v13754_v16  ;;  %10925 = vmatpush3.bf16.msra.mxu1 %v13883_v24 }
 0xbf1   :  { %10185 = vmatprep.subr.msk.mxu1 %vm2893_vm6, %v7908_v14 }
 0xbf3   :  { %10105 = vmatmul.mubr.msk.f32.gmra.mrb[60].mxu1 %vm5054_vm7, %v13760_v41 }
 0xbf4   :  { %10107 = vmatprep.mubr.msk.f32.mxu1 %vm5054_vm7, %v13764_v23  ;;  %10186 = vmatpush3.msk.msra.mxu1 %vm2893_vm6, %v7908_v14 }
 0xbf5   :  { %10926 = vmatprep.subr.bf16.mxu1 %v11225_v52 }
 0xbf7   :  { %10108 = vmatmul.mubr.msk.f32.gmra.mrb[62].mxu1 %vm5054_vm7, %v13768_v31 }
 0xbf8   :  { %10110 = vmatprep.mubr.msk.f32.mxu1 %vm5054_vm7, %v13772_v15 }
 0xbfb   :  { %10111 = vmatmul.mubr.msk.f32.gmra.mrb[64].mxu1 %vm5054_vm7, %v13776_v37 }
 0xbfc   :  { %10113 = vmatprep.mubr.msk.f32.mxu1 %vm5054_vm7, %v13780_v2 }
 0xbff   :  { %10114 = vmatmul.mubr.msk.f32.gmra.mrb[66].mxu1 %vm5054_vm7, %v13784_v38 }
 0xc00   :  { %10187 = vmatprep.mubr.msk.f32.mxu1 %vm5054_vm7, %v13742_v10 }
 0xc03   :  { %10188 = vmatmul.mubr.msk.f32.vlgmr.msra.gmra.mrb[68].mxu1 %vm5054_vm7, %v13746_v60 }
 0xc04   :  { %10190 = vmatprep.mubr.msk.f32.mxu1 %vm5054_vm7, %v13754_v16 }
 0xc07   :  { %10191 = vmatmul.mubr.msk.f32.gmra.mrb[70].mxu1 %vm5054_vm7, %v13760_v41 }
 0xc08   :  { %10193 = vmatprep.mubr.msk.f32.mxu1 %vm5054_vm7, %v13764_v23 }
 0xc0b   :  { %10194 = vmatmul.mubr.msk.f32.gmra.mrb[72].mxu1 %vm5054_vm7, %v13768_v31 }
 0xc0c   :  { %10196 = vmatprep.mubr.msk.f32.mxu1 %vm5054_vm7, %v13772_v15 }
 0xc0f   :  { %10197 = vmatmul.mubr.msk.f32.gmra.mrb[74].mxu1 %vm5054_vm7, %v13776_v37 }
 0xc10   :  { %10199 = vmatprep.mubr.msk.f32.mxu1 %vm5054_vm7, %v13780_v2 }
 0xc13   :  { %10200 = vmatmul.mubr.msk.f32.gmra.mrb[76].mxu1 %vm5054_vm7, %v13784_v38 }
 0xc14   :  { %10222 = vmatprep.mubr.msk.f32.mxu1 %vm11226_vm0, %v11227_v53 }
 0xc72   :  { %v5638_v57 = vpop.f32.mrb[200].mxu0 }
 0xc73   :  { %v10052_v61 = vpop.f32.mrb[201].mxu0 }
 0xc76   :  { %v5643_v63 = vpop.f32.mrb[202].mxu0 }
 0xc77   :  { %v10055_v62 = vpop.f32.mrb[203].mxu0 }
 0xc7a   :  { %v5648_v29 = vpop.f32.mrb[204].mxu0 }
 0xc7b   :  { %v10058_v26 = vpop.f32.mrb[205].mxu0 }
 0xc7e   :  { %v5653_v1 = vpop.f32.mrb[206].mxu0 }
 0xc7f   :  { %v10061_v48 = vpop.f32.mrb[207].mxu0 }
 0xc82   :  { %v5658_v35 = vpop.f32.mrb[208].mxu0 }
 0xc83   :  { %v10064_v33 = vpop.f32.mrb[209].mxu0 }
 0xc86   :  { %v5453_v0 = vpop.f32.mrb[28].mxu1  ;;  %v5663_v4 = vpop.f32.mrb[210].mxu0 }
 0xc87   :  { %v9987_v3 = vpop.f32.mrb[29].mxu1  ;;  %v14066_v20 = vadd.f32 %v5638_v57, %v5453_v0  ;;  %v10067_v39 = vpop.f32.mrb[211].mxu0 }
 0xc8a   :  { %v5458_v6 = vpop.f32.mrb[30].mxu1  ;;  %v5668_v7 = vpop.f32.mrb[212].mxu0 }
 0xc8b   :  { %v9990_v5 = vpop.f32.mrb[31].mxu1  ;;  %v14068_v12 = vadd.f32 %v5643_v63, %v5458_v6  ;;  %v10070_v55 = vpop.f32.mrb[213].mxu0 }
 0xc8e   :  { %v5463_v11 = vpop.f32.mrb[32].mxu1  ;;  %v5673_v13 = vpop.f32.mrb[214].mxu0 }
 0xc8f   :  { %v9993_v25 = vpop.f32.mrb[33].mxu1  ;;  %v14070_v18 = vadd.f32 %v5648_v29, %v5463_v11  ;;  %v10073_v17 = vpop.f32.mrb[215].mxu0 }
 0xc92   :  { %v5468_v9 = vpop.f32.mrb[34].mxu1  ;;  %v5678_v21 = vpop.f32.mrb[216].mxu0 }
 0xc93   :  { %v9996_v22 = vpop.f32.mrb[35].mxu1  ;;  %v14072_v59 = vadd.f32 %v5653_v1, %v5468_v9  ;;  %v10076_v24 = vpop.f32.mrb[217].mxu0 }
 0xc96   :  { %v5473_v27 = vpop.f32.mrb[36].mxu1  ;;  %v5683_v28 = vpop.f32.mrb[218].mxu0 }
 0xc97   :  { %v9999_v32 = vpop.f32.mrb[37].mxu1  ;;  %v14074_v34 = vadd.f32 %v5658_v35, %v5473_v27  ;;  %v10079_v36 = vpop.f32.mrb[219].mxu0 }
 0xc9a   :  { %v5478_v51 = vpop.f32.mrb[38].mxu1  ;;  %v5688_v40 = vpop.f32.mrb[220].mxu0 }
 0xc9b   :  { %v10002_v42 = vpop.f32.mrb[39].mxu1  ;;  %v14076_v43 = vadd.f32 %v5663_v4, %v5478_v51  ;;  %v10082_v49 = vpop.f32.mrb[221].mxu0 }
 0xc9e   :  { %v5483_v45 = vpop.f32.mrb[40].mxu1  ;;  %v5693_v50 = vpop.f32.mrb[222].mxu0 }
 0xc9f   :  { %v10005_v44 = vpop.f32.mrb[41].mxu1  ;;  %v14078_v47 = vadd.f32 %v5668_v7, %v5483_v45  ;;  %v10085_v46 = vpop.f32.mrb[223].mxu0 }
 0xca0   :  { %v7951_v44 = vld [vmem:[%s14570_s12 + $0x68] sm:$0xff] }
 0xca2   :  { %v5488_v8 = vpop.f32.mrb[42].mxu1  ;;  %v5698_v30 = vpop.f32.mrb[224].mxu0 }
 0xca3   :  { %v10008_v56 = vpop.f32.mrb[43].mxu1  ;;  %v14080_v54 = vadd.f32 %v5673_v13, %v5488_v8  ;;  %v10088_v19 = vpop.f32.mrb[225].mxu0 }
 0xca6   :  { %v5493_v58 = vpop.f32.mrb[44].mxu1  ;;  %v5703_v14 = vpop.f32.mrb[226].mxu0 }
 0xca7   :  { %v10011_v57 = vpop.f32.mrb[45].mxu1  ;;  %v14082_v61 = vadd.f32 %v5678_v21, %v5493_v58  ;;  %v10091_v63 = vpop.f32.mrb[227].mxu0  ;;  %v7847_v58 = vld [vmem:[%s14571_s11 + $0xf0] sm:$0xff] }
 0xca8   :  { %v7952_v63 = vld [vmem:[%s14570_s12 + $0x70] sm:$0xf] }
 0xcaa   :  { %v5498_v62 = vpop.f32.mrb[46].mxu1  ;;  %v5708_v29 = vpop.f32.mrb[228].mxu0 }
 0xcab   :  { %v10014_v26 = vpop.f32.mrb[47].mxu1  ;;  %v14084_v1 = vadd.f32 %v5683_v28, %v5498_v62  ;;  %v10094_v48 = vpop.f32.mrb[229].mxu0 }
 0xcae   :  { %v5503_v35 = vpop.f32.mrb[48].mxu1 }
 0xcaf   :  { %v10017_v33 = vpop.f32.mrb[49].mxu1  ;;  %v14086_v0 = vadd.f32 %v5688_v40, %v5503_v35 }
 0xcb0   :  { %v7849_v33 = vld [vmem:[%s14571_s11 + $0x100] sm:$0xff] }
 0xcb2   :  { %v5508_v4 = vpop.f32.mrb[50].mxu1 }
 0xcb3   :  { %v10020_v3 = vpop.f32.mrb[51].mxu1  ;;  %v14088_v39 = vadd.f32 %v5693_v50, %v5508_v4  ;;  %v7950_v50 = vld [vmem:[%s14570_s12 + $0x60] sm:$0xff] }
 0xcb6   :  { %v5513_v6 = vpop.f32.mrb[52].mxu1 }
 0xcb7   :  { %v10023_v7 = vpop.f32.mrb[53].mxu1  ;;  %v14090_v5 = vadd.f32 %v5698_v30, %v5513_v6  ;;  %v10941_v30 = vpack.c.bf16 %v7951_v44, %v7950_v50  ;;  %v7857_v50 = vld [vmem:[%s14571_s11 + $0x140] sm:$0xff]  ;;  %v7896_v44 = vld [vmem:[%s14571_s11 + $0x190] sm:$0xff] }
 0xcb8   :  { %v7850_v7 = vld [vmem:[%s14571_s11 + $0x108] sm:$0xff] }
 0xcba   :  { %v5518_v55 = vpop.f32.mrb[54].mxu1 }
 0xcbb   :  { %v10026_v11 = vpop.f32.mrb[55].mxu1  ;;  %v14092_v13 = vadd.f32 %v5703_v14, %v5518_v55 }
 0xcbe   :  { %v5523_v25 = vpop.f32.mrb[56].mxu1 }
 0xcbf   :  { %v10029_v17 = vpop.f32.mrb[57].mxu1  ;;  %v14094_v9 = vadd.f32 %v5708_v29, %v5523_v25  ;;  %v7848_v29 = vld [vmem:[%s14571_s11 + $0xf8] sm:$0xff] }
 0xcc0   :  { %v7851_v17 = vld [vmem:[%s14571_s11 + $0x110] sm:$0xff] }
 0xcc2   :  { %v10103_v21 = vpop.f32.mrb[58].mxu1 }
 0xcc3   :  { %v5801_v22 = vpop.f32.mrb[59].mxu1 }
 0xcc4   :  { %v10908_v24 = vpack.c.bf16 %v10103_v21, %v5801_v22 }
 0xcc6   :  { %v10106_v27 = vpop.f32.mrb[60].mxu1  ;;  %10909 = vmatpush3.bf16.msra.mxu0 %v10908_v24  ;;  %v7852_v24 = vld [vmem:[%s14571_s11 + $0x118] sm:$0xff] }
 0xcc7   :  { %v5811_v28 = vpop.f32.mrb[61].mxu1  ;;  %10910 = vmatprep.subr.bf16.mxu0 %v11225_v52 }
 0xcc8   :  { %v10911_v32 = vpack.c.bf16 %v10106_v27, %v5811_v28  ;;  %v7891_v27 = vld [vmem:[%s14571_s11 + $0x168] sm:$0xff]  ;;  %v7853_v28 = vld [vmem:[%s14571_s11 + $0x120] sm:$0xff] }
 0xcca   :  { %v10109_v36 = vpop.f32.mrb[62].mxu1  ;;  %10912 = vmatpush3.bf16.msra.mxu0 %v10911_v32  ;;  %v7892_v32 = vld [vmem:[%s14571_s11 + $0x170] sm:$0xff] }
 0xccb   :  { %v5821_v51 = vpop.f32.mrb[63].mxu1  ;;  %10913 = vmatprep.subr.bf16.mxu0 %v11225_v52 }
 0xccc   :  { %v10914_v40 = vpack.c.bf16 %v10109_v36, %v5821_v51  ;;  %v7854_v36 = vld [vmem:[%s14571_s11 + $0x128] sm:$0xff]  ;;  %v7893_v51 = vld [vmem:[%s14571_s11 + $0x178] sm:$0xff] }
 0xcce   :  { %v10112_v42 = vpop.f32.mrb[64].mxu1  ;;  %10915 = vmatpush3.bf16.msra.mxu0 %v10914_v40  ;;  %v7855_v40 = vld [vmem:[%s14571_s11 + $0x130] sm:$0xff] }
 0xccf   :  { %v5831_v49 = vpop.f32.mrb[65].mxu1  ;;  %10916 = vmatprep.subr.bf16.mxu0 %v11225_v52 }
 0xcd0   :  { %v10917_v45 = vpack.c.bf16 %v10112_v42, %v5831_v49  ;;  %v7894_v42 = vld [vmem:[%s14571_s11 + $0x180] sm:$0xff]  ;;  %v7856_v49 = vld [vmem:[%s14571_s11 + $0x138] sm:$0xff] }
 0xcd2   :  { %v10115_v46 = vpop.f32.mrb[66].mxu1  ;;  %10918 = vmatpush3.bf16.msra.mxu0 %v10917_v45  ;;  %v7895_v45 = vld [vmem:[%s14571_s11 + $0x188] sm:$0xff] }
 0xcd3   :  { %v5841_v8 = vpop.f32.mrb[67].mxu1  ;;  %10919 = vmatprep.subr.bf16.mxu0 %v11225_v52 }
 0xcd4   :  { %v10920_v56 = vpack.c.bf16 %v10115_v46, %v5841_v8  ;;  %v7858_v46 = vld [vmem:[%s14571_s11 + $0x148] sm:$0xff]  ;;  %v7897_v8 = vld [vmem:[%s14571_s11 + $0x198] sm:$0xff] }
 0xcd6   :  { %10921 = vmatpush3.bf16.msra.mxu0 %v10920_v56  ;;  %v10189_v19 = vpop.f32.mrb[68].mxu1  ;;  %v7898_v56 = vld [vmem:[%s14571_s11 + $0x1a0] sm:$0xff] }
 0xcd7   :  { %v6139_v14 = vpop.f32.mrb[69].mxu1  ;;  %10942 = vmatprep.subr.bf16.mxu0 %v10941_v30 }
 0xcd8   :  { %v10927_v57 = vpack.c.bf16 %v10189_v19, %v6139_v14  ;;  %v7860_v19 = vld [vmem:[%s14571_s11 + $0x158] sm:$0xff]  ;;  %v7861_v14 = vld [vmem:[%s14571_s11 + $0x160] sm:$0xff] }
 0xcd9   :  { %10137 = vmatmul.mubr.msk.f32.vlgmr.msra.gmra.mrb[230].mxu0 %vm5341_vm8, %v7847_v58  ;;  %v7899_v58 = vld [vmem:[%s14571_s11 + $0x1a8] sm:$0xff] }
 0xcda   :  { %v10192_v62 = vpop.f32.mrb[70].mxu1  ;;  %10928 = vmatpush3.bf16.msra.mxu1 %v10927_v57  ;;  %10139 = vmatprep.mubr.msk.f32.mxu0 %vm11226_vm0, %v11227_v53  ;;  %v7900_v57 = vld [vmem:[%s14571_s11 + $0x1b0] sm:$0xff] }
 0xcdb   :  { %v6149_v26 = vpop.f32.mrb[71].mxu1  ;;  %10929 = vmatprep.subr.bf16.mxu1 %v11225_v52  ;;  %10944 = vmatpush3.bf16.msra.mxu0 %v10941_v30  ;;  %v7859_v30 = vld [vmem:[%s14571_s11 + $0x150] sm:$0xff] }
 0xcdc   :  { %v10930_v48 = vpack.c.bf16 %v10192_v62, %v6149_v26  ;;  %10271 = vmatprep.subr.msk.mxu0 %vm2893_vm6, %v7952_v63 }
 0xcdd   :  { %10140 = vmatmul.mubr.msk.f32.gmra.mrb[232].mxu0 %vm5341_vm8, %v7848_v29 }
 0xcde   :  { %v10195_v35 = vpop.f32.mrb[72].mxu1  ;;  %10931 = vmatpush3.bf16.msra.mxu1 %v10930_v48  ;;  %10142 = vmatprep.mubr.msk.f32.mxu0 %vm11226_vm0, %v11227_v53 }
 0xcdf   :  { %v6159_v4 = vpop.f32.mrb[73].mxu1  ;;  %10932 = vmatprep.subr.bf16.mxu1 %v11225_v52  ;;  %10272 = vmatpush3.msk.msra.mxu0 %vm2893_vm6, %v7952_v63  ;;  %v7901_v63 = vld [vmem:[%s14571_s11 + $0x1b8] sm:$0xff] }
 0xce0   :  { %v10933_v3 = vpack.c.bf16 %v10195_v35, %v6159_v4  ;;  %10945 = vmatprep.subr.bf16.mxu0 %v11225_v52 }
 0xce1   :  { %10143 = vmatmul.mubr.msk.f32.gmra.mrb[234].mxu0 %vm5341_vm8, %v7849_v33 }
 0xce2   :  { %v10198_v6 = vpop.f32.mrb[74].mxu1  ;;  %10934 = vmatpush3.bf16.msra.mxu1 %v10933_v3  ;;  %10145 = vmatprep.mubr.msk.f32.mxu0 %vm11226_vm0, %v11227_v53 }
 0xce3   :  { %v6169_v55 = vpop.f32.mrb[75].mxu1  ;;  %10935 = vmatprep.subr.bf16.mxu1 %v11225_v52 }
 0xce4   :  { %v10936_v11 = vpack.c.bf16 %v10198_v6, %v6169_v55 }
 0xce5   :  { %10146 = vmatmul.mubr.msk.f32.gmra.mrb[236].mxu0 %vm5341_vm8, %v7850_v7 }
 0xce6   :  { %v10201_v25 = vpop.f32.mrb[76].mxu1  ;;  %10937 = vmatpush3.bf16.msra.mxu1 %v10936_v11  ;;  %10148 = vmatprep.mubr.msk.f32.mxu0 %vm11226_vm0, %v11227_v53 }
 0xce7   :  { %v6179_v21 = vpop.f32.mrb[77].mxu1  ;;  %10938 = vmatprep.subr.bf16.mxu1 %v11225_v52 }
 0xce8   :  { %v10939_v22 = vpack.c.bf16 %v10201_v25, %v6179_v21 }
 0xce9   :  { %10149 = vmatmul.mubr.msk.f32.gmra.mrb[238].mxu0 %vm5341_vm8, %v7851_v17 }
 0xcea   :  { %10940 = vmatpush3.bf16.msra.mxu1 %v10939_v22  ;;  %10151 = vmatprep.mubr.msk.f32.mxu0 %vm11226_vm0, %v11227_v53 }
 0xceb   :  { %10960 = vmatprep.subr.bf16.mxu1 %v11225_v52 }
 0xced   :  { %10152 = vmatmul.mubr.msk.f32.gmra.mrb[240].mxu0 %vm5341_vm8, %v7852_v24  ;;  %10223 = vmatmul.mubr.msk.f32.vlgmr.msra.gmra.mrb[78].mxu1 %vm5341_vm8, %v7891_v27 }
 0xcee   :  { %10154 = vmatprep.mubr.msk.f32.mxu0 %vm11226_vm0, %v11227_v53  ;;  %10225 = vmatprep.mubr.msk.f32.mxu1 %vm11226_vm0, %v11227_v53 }
 0xcf1   :  { %10155 = vmatmul.mubr.msk.f32.gmra.mrb[242].mxu0 %vm5341_vm8, %v7853_v28  ;;  %10226 = vmatmul.mubr.msk.f32.gmra.mrb[80].mxu1 %vm5341_vm8, %v7892_v32 }
 0xcf2   :  { %10157 = vmatprep.mubr.msk.f32.mxu0 %vm11226_vm0, %v11227_v53  ;;  %10228 = vmatprep.mubr.msk.f32.mxu1 %vm11226_vm0, %v11227_v53 }
 0xcf5   :  { %10158 = vmatmul.mubr.msk.f32.gmra.mrb[244].mxu0 %vm5341_vm8, %v7854_v36  ;;  %10229 = vmatmul.mubr.msk.f32.gmra.mrb[82].mxu1 %vm5341_vm8, %v7893_v51 }
 0xcf6   :  { %10160 = vmatprep.mubr.msk.f32.mxu0 %vm11226_vm0, %v11227_v53  ;;  %10231 = vmatprep.mubr.msk.f32.mxu1 %vm11226_vm0, %v11227_v53 }
 0xcf9   :  { %10161 = vmatmul.mubr.msk.f32.gmra.mrb[246].mxu0 %vm5341_vm8, %v7855_v40  ;;  %10232 = vmatmul.mubr.msk.f32.gmra.mrb[84].mxu1 %vm5341_vm8, %v7894_v42 }
 0xcfa   :  { %10163 = vmatprep.mubr.msk.f32.mxu0 %vm11226_vm0, %v11227_v53  ;;  %10234 = vmatprep.mubr.msk.f32.mxu1 %vm11226_vm0, %v11227_v53 }
 0xcfd   :  { %10164 = vmatmul.mubr.msk.f32.gmra.mrb[248].mxu0 %vm5341_vm8, %v7856_v49  ;;  %10235 = vmatmul.mubr.msk.f32.gmra.mrb[86].mxu1 %vm5341_vm8, %v7895_v45 }
 0xcfe   :  { %10166 = vmatprep.mubr.msk.f32.mxu0 %vm11226_vm0, %v11227_v53  ;;  %10237 = vmatprep.mubr.msk.f32.mxu1 %vm11226_vm0, %v11227_v53 }
 0xd01   :  { %10167 = vmatmul.mubr.msk.f32.gmra.mrb[250].mxu0 %vm5341_vm8, %v7857_v50  ;;  %10238 = vmatmul.mubr.msk.f32.gmra.mrb[88].mxu1 %vm5341_vm8, %v7896_v44 }
 0xd02   :  { %10169 = vmatprep.mubr.msk.f32.mxu0 %vm11226_vm0, %v11227_v53  ;;  %10240 = vmatprep.mubr.msk.f32.mxu1 %vm11226_vm0, %v11227_v53 }
 0xd05   :  { %10170 = vmatmul.mubr.msk.f32.gmra.mrb[252].mxu0 %vm5341_vm8, %v7858_v46  ;;  %10241 = vmatmul.mubr.msk.f32.gmra.mrb[90].mxu1 %vm5341_vm8, %v7897_v8 }
 0xd06   :  { %10172 = vmatprep.mubr.msk.f32.mxu0 %vm11226_vm0, %v11227_v53  ;;  %10243 = vmatprep.mubr.msk.f32.mxu1 %vm11226_vm0, %v11227_v53 }
 0xd09   :  { %10173 = vmatmul.mubr.msk.f32.gmra.mrb[254].mxu0 %vm5341_vm8, %v7859_v30  ;;  %10244 = vmatmul.mubr.msk.f32.gmra.mrb[92].mxu1 %vm5341_vm8, %v7898_v56 }
 0xd0a   :  { %10175 = vmatprep.mubr.msk.f32.mxu0 %vm11226_vm0, %v11227_v53  ;;  %10246 = vmatprep.mubr.msk.f32.mxu1 %vm11226_vm0, %v11227_v53 }
 0xd0d   :  { %10176 = vmatmul.mubr.msk.f32.gmra.mrb[0].mxu0 %vm5341_vm8, %v7860_v19  ;;  %10247 = vmatmul.mubr.msk.f32.gmra.mrb[94].mxu1 %vm5341_vm8, %v7899_v58 }
 0xd0e   :  { %10178 = vmatprep.mubr.msk.f32.mxu0 %vm11226_vm0, %v11227_v53  ;;  %10249 = vmatprep.mubr.msk.f32.mxu1 %vm11226_vm0, %v11227_v53 }
 0xd11   :  { %10179 = vmatmul.mubr.msk.f32.gmra.mrb[2].mxu0 %vm5341_vm8, %v7861_v14  ;;  %10250 = vmatmul.mubr.msk.f32.gmra.mrb[96].mxu1 %vm5341_vm8, %v7900_v57 }
 0xd12   :  { %10273 = vmatprep.mubr.msk.f32.mxu0 %vm5054_vm7, %v13742_v10  ;;  %10252 = vmatprep.mubr.msk.f32.mxu1 %vm11226_vm0, %v11227_v53  ;;  %v7902_v10 = vld [vmem:[%s14571_s11 + $0x1c0] sm:$0xff] }
 0xd15   :  { %10253 = vmatmul.mubr.msk.f32.gmra.mrb[98].mxu1 %vm5341_vm8, %v7901_v63  ;;  %10274 = vmatmul.mubr.msk.f32.vlgmr.msra.gmra.mrb[4].mxu0 %vm5054_vm7, %v13746_v60  ;;  %v7903_v60 = vld [vmem:[%s14571_s11 + $0x1c8] sm:$0xff] }
 0xd16   :  { %10276 = vmatprep.mubr.msk.f32.mxu0 %vm5054_vm7, %v13754_v16  ;;  %10255 = vmatprep.mubr.msk.f32.mxu1 %vm11226_vm0, %v11227_v53  ;;  %v7904_v16 = vld [vmem:[%s14571_s11 + $0x1d0] sm:$0xff] }
 0xd19   :  { %10256 = vmatmul.mubr.msk.f32.gmra.mrb[100].mxu1 %vm5341_vm8, %v7902_v10  ;;  %10277 = vmatmul.mubr.msk.f32.gmra.mrb[6].mxu0 %vm5054_vm7, %v13760_v41  ;;  %v7905_v41 = vld [vmem:[%s14571_s11 + $0x1d8] sm:$0xff] }
 0xd1a   :  { %10279 = vmatprep.mubr.msk.f32.mxu0 %vm5054_vm7, %v13764_v23  ;;  %10258 = vmatprep.mubr.msk.f32.mxu1 %vm11226_vm0, %v11227_v53 }
 0xd1d   :  { %10259 = vmatmul.mubr.msk.f32.gmra.mrb[102].mxu1 %vm5341_vm8, %v7903_v60  ;;  %10280 = vmatmul.mubr.msk.f32.gmra.mrb[8].mxu0 %vm5054_vm7, %v13768_v31 }
 0xd1e   :  { %10282 = vmatprep.mubr.msk.f32.mxu0 %vm5054_vm7, %v13772_v15  ;;  %10261 = vmatprep.mubr.msk.f32.mxu1 %vm11226_vm0, %v11227_v53 }
 0xd21   :  { %10262 = vmatmul.mubr.msk.f32.gmra.mrb[104].mxu1 %vm5341_vm8, %v7904_v16  ;;  %10283 = vmatmul.mubr.msk.f32.gmra.mrb[10].mxu0 %vm5054_vm7, %v13776_v37 }
 0xd22   :  { %10285 = vmatprep.mubr.msk.f32.mxu0 %vm5054_vm7, %v13780_v2  ;;  %10264 = vmatprep.mubr.msk.f32.mxu1 %vm11226_vm0, %v11227_v53 }
 0xd25   :  { %10265 = vmatmul.mubr.msk.f32.gmra.mrb[106].mxu1 %vm5341_vm8, %v7905_v41  ;;  %10286 = vmatmul.mubr.msk.f32.gmra.mrb[12].mxu0 %vm5054_vm7, %v13784_v38 }
 0xd26   :  { %10308 = vmatprep.mubr.msk.f32.mxu0 %vm11226_vm0, %v11227_v53  ;;  %10383 = vmatprep.mubr.msk.f32.mxu1 %vm11226_vm0, %v11227_v53 }
 0xdac   :  { %v5961_v23 = vpop.f32.mrb[230].mxu0 }
 0xdad   :  { %v6035_v31 = vadd.f32 %v5961_v23, %v14066_v20  ;;  %v10138_v15 = vpop.f32.mrb[231].mxu0 }
 0xdb0   :  { %v5966_v37 = vpop.f32.mrb[232].mxu0 }
 0xdb1   :  { %v6036_v2 = vadd.f32 %v5966_v37, %v14068_v12  ;;  %v10141_v62 = vpop.f32.mrb[233].mxu0 }
 0xdb4   :  { %v5971_v29 = vpop.f32.mrb[234].mxu0 }
 0xdb5   :  { %v6037_v26 = vadd.f32 %v5971_v29, %v14070_v18  ;;  %v10144_v48 = vpop.f32.mrb[235].mxu0 }
 0xdb8   :  { %v5976_v35 = vpop.f32.mrb[236].mxu0 }
 0xdb9   :  { %v6038_v38 = vadd.f32 %v5976_v35, %v14072_v59  ;;  %v10147_v33 = vpop.f32.mrb[237].mxu0 }
 0xdbc   :  { %v5981_v4 = vpop.f32.mrb[238].mxu0 }
 0xdbd   :  { %v6039_v3 = vadd.f32 %v5981_v4, %v14074_v34  ;;  %v10150_v6 = vpop.f32.mrb[239].mxu0 }
 0xdc0   :  { %v5986_v7 = vpop.f32.mrb[240].mxu0  ;;  %v6299_v55 = vpop.f32.mrb[78].mxu1 }
 0xdc1   :  { %v6040_v20 = vadd.f32 %v5986_v7, %v14076_v43  ;;  %v14323_v11 = vadd.f32 %v6299_v55, %v6035_v31  ;;  %v10153_v12 = vpop.f32.mrb[241].mxu0  ;;  %v10224_v25 = vpop.f32.mrb[79].mxu1 }
 0xdc4   :  { %v5991_v17 = vpop.f32.mrb[242].mxu0  ;;  %v6304_v21 = vpop.f32.mrb[80].mxu1 }
 0xdc5   :  { %v6041_v18 = vadd.f32 %v5991_v17, %v14078_v47  ;;  %v14326_v22 = vadd.f32 %v6304_v21, %v6036_v2  ;;  %v10156_v59 = vpop.f32.mrb[243].mxu0  ;;  %v10227_v24 = vpop.f32.mrb[81].mxu1 }
 0xdc8   :  { %v5996_v27 = vpop.f32.mrb[244].mxu0  ;;  %v6309_v28 = vpop.f32.mrb[82].mxu1 }
 0xdc9   :  { %v6042_v34 = vadd.f32 %v5996_v27, %v14080_v54  ;;  %v14329_v32 = vadd.f32 %v6309_v28, %v6037_v26  ;;  %v10159_v36 = vpop.f32.mrb[245].mxu0  ;;  %v10230_v43 = vpop.f32.mrb[83].mxu1 }
 0xdcc   :  { %v6001_v51 = vpop.f32.mrb[246].mxu0  ;;  %v6314_v40 = vpop.f32.mrb[84].mxu1 }
 0xdcd   :  { %v6043_v42 = vadd.f32 %v6001_v51, %v14082_v61  ;;  %v14332_v49 = vadd.f32 %v6314_v40, %v6038_v38  ;;  %v10162_v45 = vpop.f32.mrb[247].mxu0  ;;  %v10233_v47 = vpop.f32.mrb[85].mxu1 }
 0xdd0   :  { %v6006_v50 = vpop.f32.mrb[248].mxu0  ;;  %v6319_v44 = vpop.f32.mrb[86].mxu1 }
 0xdd1   :  { %v6044_v46 = vadd.f32 %v6006_v50, %v14084_v1  ;;  %v14335_v8 = vadd.f32 %v6319_v44, %v6039_v3  ;;  %v10165_v30 = vpop.f32.mrb[249].mxu0  ;;  %v10236_v54 = vpop.f32.mrb[87].mxu1 }
 0xdd4   :  { %v6011_v56 = vpop.f32.mrb[250].mxu0  ;;  %v6324_v19 = vpop.f32.mrb[88].mxu1 }
 0xdd5   :  { %v6045_v58 = vadd.f32 %v6011_v56, %v14086_v0  ;;  %v14338_v14 = vadd.f32 %v6324_v19, %v6040_v20  ;;  %v10168_v57 = vpop.f32.mrb[251].mxu0  ;;  %v10239_v61 = vpop.f32.mrb[89].mxu1 }
 0xdd6   :  { %v7935_v57 = vld [vmem:[%s14571_s11 + $0x1e0] sm:$0xff]  ;;  %v7936_v61 = vld [vmem:[%s14571_s11 + $0x1e8] sm:$0xff] }
 0xdd8   :  { %v6016_v63 = vpop.f32.mrb[252].mxu0  ;;  %v6329_v10 = vpop.f32.mrb[90].mxu1 }
 0xdd9   :  { %v6046_v60 = vadd.f32 %v6016_v63, %v14088_v39  ;;  %v14341_v16 = vadd.f32 %v6329_v10, %v6041_v18  ;;  %v10171_v41 = vpop.f32.mrb[253].mxu0  ;;  %v10242_v1 = vpop.f32.mrb[91].mxu1  ;;  %v7937_v63 = vld [vmem:[%s14571_s11 + $0x1f0] sm:$0xff]  ;;  %v7938_v10 = vld [vmem:[%s14571_s11 + $0x1f8] sm:$0xff] }
 0xdda   :  { %v7940_v41 = vld [vmem:[%s14571_s11 + $0x208] sm:$0xff]  ;;  %v7941_v1 = vld [vmem:[%s14571_s11 + $0x210] sm:$0xff] }
 0xddc   :  { %v6021_v23 = vpop.f32.mrb[254].mxu0  ;;  %v6334_v31 = vpop.f32.mrb[92].mxu1 }
 0xddd   :  { %v6047_v15 = vadd.f32 %v6021_v23, %v14090_v5  ;;  %v14344_v37 = vadd.f32 %v6334_v31, %v6042_v34  ;;  %v10174_v2 = vpop.f32.mrb[255].mxu0  ;;  %v10245_v0 = vpop.f32.mrb[93].mxu1  ;;  %v7942_v23 = vld [vmem:[%s14571_s11 + $0x218] sm:$0xff]  ;;  %v7943_v31 = vld [vmem:[%s14571_s11 + $0x220] sm:$0xff] }
 0xdde   :  { %v7945_v2 = vld [vmem:[%s14571_s11 + $0x230] sm:$0xff]  ;;  %v7946_v0 = vld [vmem:[%s14571_s11 + $0x238] sm:$0xff] }
 0xde0   :  { %v6026_v62 = vpop.f32.mrb[0].mxu0  ;;  %v6339_v29 = vpop.f32.mrb[94].mxu1 }
 0xde1   :  { %v6048_v26 = vadd.f32 %v6026_v62, %v14092_v13  ;;  %v14347_v48 = vadd.f32 %v6339_v29, %v6043_v42  ;;  %v10177_v35 = vpop.f32.mrb[1].mxu0  ;;  %v10248_v39 = vpop.f32.mrb[95].mxu1  ;;  %v7947_v62 = vld [vmem:[%s14571_s11 + $0x240] sm:$0xff]  ;;  %v7948_v29 = vld [vmem:[%s14571_s11 + $0x248] sm:$0xff] }
 0xde4   :  { %v6031_v38 = vpop.f32.mrb[2].mxu0  ;;  %v6344_v33 = vpop.f32.mrb[96].mxu1 }
 0xde5   :  { %v6049_v4 = vadd.f32 %v6031_v38, %v14094_v9  ;;  %v14350_v3 = vadd.f32 %v6344_v33, %v6044_v46  ;;  %v10180_v6 = vpop.f32.mrb[3].mxu0  ;;  %v10251_v5 = vpop.f32.mrb[97].mxu1 }
 0xde6   :  { %v6744_v33 = vpop.permute.xlu1 %6743 }
 0xde8   :  { %v6349_v7 = vpop.f32.mrb[98].mxu1  ;;  %v10275_v55 = vpop.f32.mrb[4].mxu0 }
 0xde9   :  { %v14352_v20 = vadd.f32 %v6349_v7, %v6045_v58  ;;  %v6477_v12 = vpop.f32.mrb[5].mxu0  ;;  %v10254_v25 = vpop.f32.mrb[99].mxu1 }
 0xdea   :  { %v10946_v17 = vpack.c.bf16 %v10275_v55, %v6477_v12  ;;  %v6749_v55 = vpop.permute.xlu0 %6748 }
 0xdec   :  { %v6354_v13 = vpop.f32.mrb[100].mxu1  ;;  %v10278_v21 = vpop.f32.mrb[6].mxu0  ;;  %10947 = vmatpush3.bf16.msra.mxu0 %v10946_v17 }
 0xded   :  { %v14354_v18 = vadd.f32 %v6354_v13, %v6046_v60  ;;  %v6487_v59 = vpop.f32.mrb[7].mxu0  ;;  %v10257_v24 = vpop.f32.mrb[101].mxu1  ;;  %10948 = vmatprep.subr.bf16.mxu0 %v11225_v52  ;;  %v7939_v60 = vld [vmem:[%s14571_s11 + $0x200] sm:$0xff] }
 0xdee   :  { %v10949_v9 = vpack.c.bf16 %v10278_v21, %v6487_v59  ;;  %v6754_v21 = vpop.permute.xlu1 %6753 }
 0xdf0   :  { %v6359_v27 = vpop.f32.mrb[102].mxu1  ;;  %v10281_v28 = vpop.f32.mrb[8].mxu0  ;;  %10950 = vmatpush3.bf16.msra.mxu0 %v10949_v9 }
 0xdf1   :  { %v14357_v34 = vadd.f32 %v6359_v27, %v6047_v15  ;;  %v6497_v36 = vpop.f32.mrb[9].mxu0  ;;  %v10260_v43 = vpop.f32.mrb[103].mxu1  ;;  %10951 = vmatprep.subr.bf16.mxu0 %v11225_v52  ;;  %v7944_v15 = vld [vmem:[%s14571_s11 + $0x228] sm:$0xff] }
 0xdf2   :  { %v10952_v51 = vpack.c.bf16 %v10281_v28, %v6497_v36  ;;  %v6759_v27 = vpop.permute.xlu0 %6758 }
 0xdf4   :  { %v6364_v40 = vpop.f32.mrb[104].mxu1  ;;  %v10284_v42 = vpop.f32.mrb[10].mxu0  ;;  %10953 = vmatpush3.bf16.msra.mxu0 %v10952_v51 }
 0xdf5   :  { %v14360_v45 = vadd.f32 %v6364_v40, %v6048_v26  ;;  %v6507_v47 = vpop.f32.mrb[11].mxu0  ;;  %v10263_v50 = vpop.f32.mrb[105].mxu1  ;;  %10954 = vmatprep.subr.bf16.mxu0 %v11225_v52  ;;  %v7949_v26 = vld [vmem:[%s14571_s11 + $0x250] sm:$0xff] }
 0xdf6   :  { %v10955_v44 = vpack.c.bf16 %v10284_v42, %v6507_v47  ;;  %v6764_v42 = vpop.permute.xlu1 %6763 }
 0xdf8   :  { %v6369_v46 = vpop.f32.mrb[106].mxu1  ;;  %v10287_v30 = vpop.f32.mrb[12].mxu0  ;;  %10956 = vmatpush3.bf16.msra.mxu0 %v10955_v44 }
 0xdf9   :  { %v14363_v54 = vadd.f32 %v6369_v46, %v6049_v4  ;;  %v6517_v56 = vpop.f32.mrb[13].mxu0  ;;  %10957 = vmatprep.subr.bf16.mxu0 %v11225_v52  ;;  %v10266_v19 = vpop.f32.mrb[107].mxu1 }
 0xdfa   :  { %v10958_v58 = vpack.c.bf16 %v10287_v30, %v6517_v56  ;;  %v6769_v30 = vpop.permute.xlu0 %6768 }
 0xdfc   :  { %10959 = vmatpush3.bf16.msra.mxu0 %v10958_v58 }
 0xdff   :  { %10309 = vmatmul.mubr.msk.f32.vlgmr.msra.gmra.mrb[14].mxu0 %vm5341_vm8, %v7935_v57 }
 0xe00   :  { %10311 = vmatprep.mubr.msk.f32.mxu0 %vm11226_vm0, %v11227_v53 }
 0xe03   :  { %10312 = vmatmul.mubr.msk.f32.gmra.mrb[16].mxu0 %vm5341_vm8, %v7936_v61  ;;  %v6774_v61 = vpop.permute.xlu1 %6773 }
 0xe04   :  { %10314 = vmatprep.mubr.msk.f32.mxu0 %vm11226_vm0, %v11227_v53 }
 0xe07   :  { %10315 = vmatmul.mubr.msk.f32.gmra.mrb[18].mxu0 %vm5341_vm8, %v7937_v63 }
 0xe08   :  { %10317 = vmatprep.mubr.msk.f32.mxu0 %vm11226_vm0, %v11227_v53 }
 0xe0b   :  { %10318 = vmatmul.mubr.msk.f32.gmra.mrb[20].mxu0 %vm5341_vm8, %v7938_v10 }
 0xe0c   :  { %10320 = vmatprep.mubr.msk.f32.mxu0 %vm11226_vm0, %v11227_v53 }
 0xe0f   :  { %10321 = vmatmul.mubr.msk.f32.gmra.mrb[22].mxu0 %vm5341_vm8, %v7939_v60 }
 0xe10   :  { %10323 = vmatprep.mubr.msk.f32.mxu0 %vm11226_vm0, %v11227_v53 }
 0xe13   :  { %10324 = vmatmul.mubr.msk.f32.gmra.mrb[24].mxu0 %vm5341_vm8, %v7940_v41 }
 0xe14   :  { %10326 = vmatprep.mubr.msk.f32.mxu0 %vm11226_vm0, %v11227_v53 }
 0xe17   :  { %10327 = vmatmul.mubr.msk.f32.gmra.mrb[26].mxu0 %vm5341_vm8, %v7941_v1  ;;  %v6779_v1 = vpop.permute.xlu0 %6778 }
 0xe18   :  { %10329 = vmatprep.mubr.msk.f32.mxu0 %vm11226_vm0, %v11227_v53 }
 0xe1b   :  { %10330 = vmatmul.mubr.msk.f32.gmra.mrb[28].mxu0 %vm5341_vm8, %v7942_v23 }
 0xe1c   :  { %10332 = vmatprep.mubr.msk.f32.mxu0 %vm11226_vm0, %v11227_v53 }
 0xe1f   :  { %10333 = vmatmul.mubr.msk.f32.gmra.mrb[30].mxu0 %vm5341_vm8, %v7943_v31 }
 0xe20   :  { %10335 = vmatprep.mubr.msk.f32.mxu0 %vm11226_vm0, %v11227_v53 }
 0xe23   :  { %10336 = vmatmul.mubr.msk.f32.gmra.mrb[32].mxu0 %vm5341_vm8, %v7944_v15 }
 0xe24   :  { %10338 = vmatprep.mubr.msk.f32.mxu0 %vm11226_vm0, %v11227_v53 }
 0xe27   :  { %10339 = vmatmul.mubr.msk.f32.gmra.mrb[34].mxu0 %vm5341_vm8, %v7945_v2 }
 0xe28   :  { %10341 = vmatprep.mubr.msk.f32.mxu0 %vm11226_vm0, %v11227_v53 }
 0xe2b   :  { %10342 = vmatmul.mubr.msk.f32.gmra.mrb[36].mxu0 %vm5341_vm8, %v7946_v0 }
 0xe2c   :  { %10344 = vmatprep.mubr.msk.f32.mxu0 %vm11226_vm0, %v11227_v53 }
 0xe2f   :  { %10345 = vmatmul.mubr.msk.f32.gmra.mrb[38].mxu0 %vm5341_vm8, %v7947_v62  ;;  %v6784_v62 = vpop.permute.xlu1 %6783 }
 0xe30   :  { %10347 = vmatprep.mubr.msk.f32.mxu0 %vm11226_vm0, %v11227_v53 }
 0xe33   :  { %10348 = vmatmul.mubr.msk.f32.gmra.mrb[40].mxu0 %vm5341_vm8, %v7948_v29 }
 0xe34   :  { %10350 = vmatprep.mubr.msk.f32.mxu0 %vm11226_vm0, %v11227_v53 }
 0xe37   :  { %10351 = vmatmul.mubr.msk.f32.gmra.mrb[42].mxu0 %vm5341_vm8, %v7949_v26 }
 0xed2   :  { %v6637_v35 = vpop.f32.mrb[14].mxu0 }
 0xed3   :  { %v6711_v39 = vadd.f32 %v6637_v35, %v14323_v11  ;;  %v10310_v38 = vpop.f32.mrb[15].mxu0 }
 0xed4   :  { %v6789_v38 = vpop.permute.xlu0 %6788 }
 0xed5   :  { %v6816_v4 = vadd.f32 %v6744_v33, %v6711_v39 }
 0xed6   :  { %v6642_v6 = vpop.f32.mrb[16].mxu0 }
 0xed7   :  { %v6712_v5 = vadd.f32 %v6642_v6, %v14326_v22  ;;  %v10313_v7 = vpop.f32.mrb[17].mxu0  ;;  %11169 = vtanh.f32 %v6816_v4 }
 0xed9   :  { %v6817_v12 = vadd.f32 %v6749_v55, %v6712_v5  ;;  %v6794_v55 = vpop.permute.xlu1 %6793 }
 0xeda   :  { %v6647_v25 = vpop.f32.mrb[18].mxu0 }
 0xedb   :  { %11171 = vtanh.f32 %v6817_v12  ;;  %v6713_v17 = vadd.f32 %v6647_v25, %v14329_v32  ;;  %v10316_v13 = vpop.f32.mrb[19].mxu0 }
 0xedd   :  { %v6818_v59 = vadd.f32 %v6754_v21, %v6713_v17  ;;  %v6799_v21 = vpop.permute.xlu0 %6798 }
 0xede   :  { %v6652_v24 = vpop.f32.mrb[20].mxu0 }
 0xedf   :  { %v6714_v11 = vadd.f32 %v6652_v24, %v14332_v49  ;;  %v10319_v9 = vpop.f32.mrb[21].mxu0  ;;  %11173 = vtanh.f32 %v6818_v59 }
 0xee1   :  { %v6819_v28 = vadd.f32 %v6759_v27, %v6714_v11  ;;  %v11170_v51 = vpop.eup %11169 }
 0xee2   :  { %v6657_v36 = vpop.f32.mrb[22].mxu0 }
 0xee3   :  { %11175 = vtanh.f32 %v6819_v28  ;;  %v6715_v22 = vadd.f32 %v6657_v36, %v14335_v8  ;;  %v10322_v43 = vpop.f32.mrb[23].mxu0  ;;  %v6804_v28 = vpop.permute.xlu1 %6803 }
 0xee5   :  { %v11172_v40 = vpop.eup %11171  ;;  %v6820_v47 = vadd.f32 %v6764_v42, %v6715_v22 }
 0xee6   :  { %v6662_v32 = vpop.f32.mrb[24].mxu0  ;;  %v10961_v50 = vpack.c.bf16 %v11172_v40, %v11170_v51  ;;  %v6809_v40 = vpop.permute.xlu0 %6808 }
 0xee7   :  { %v6716_v44 = vadd.f32 %v6662_v32, %v14338_v14  ;;  %v10325_v46 = vpop.f32.mrb[25].mxu0  ;;  %11177 = vtanh.f32 %v6820_v47 }
 0xee8   :  { %10962 = vmatpush3.bf16.msra.mxu1 %v10961_v50 }
 0xee9   :  { %v6821_v49 = vadd.f32 %v6769_v30, %v6716_v44  ;;  %10963 = vmatprep.subr.bf16.mxu1 %v11225_v52  ;;  %v11174_v58 = vpop.eup %11173  ;;  %v6814_v44 = vpop.permute.xlu1 %6813 }
 0xeea   :  { %v6667_v56 = vpop.f32.mrb[26].mxu0 }
 0xeeb   :  { %11179 = vtanh.f32 %v6821_v49  ;;  %v6717_v8 = vadd.f32 %v6667_v56, %v14341_v16  ;;  %v10328_v19 = vpop.f32.mrb[27].mxu0 }
 0xeed   :  { %v11176_v57 = vpop.eup %11175  ;;  %v6822_v63 = vadd.f32 %v6774_v61, %v6717_v8  ;;  %v6850_v61 = vld [vmem:[%s14572_s14 + $0x20] sm:$0xff] }
 0xeee   :  { %v6672_v10 = vpop.f32.mrb[28].mxu0  ;;  %v10964_v60 = vpack.c.bf16 %v11176_v57, %v11174_v58  ;;  %v6848_v58 = vld [vmem:[%s14572_s14 + $0x10] sm:$0xff]  ;;  %v6849_v57 = vld [vmem:[%s14572_s14 + $0x18] sm:$0xff] }
 0xeef   :  { %v6718_v14 = vadd.f32 %v6672_v10, %v14344_v37  ;;  %v10331_v41 = vpop.f32.mrb[29].mxu0  ;;  %11181 = vtanh.f32 %v6822_v63  ;;  %v6851_v63 = vld [vmem:[%s14572_s14 + $0x28] sm:$0xff]  ;;  %v6852_v10 = vld [vmem:[%s14572_s14 + $0x30] sm:$0xff] }
 0xef0   :  { %10965 = vmatpush3.bf16.msra.mxu1 %v10964_v60  ;;  %v6853_v60 = vld [vmem:[%s14572_s14 + $0x38] sm:$0xff]  ;;  %v6855_v41 = vld [vmem:[%s14572_s14 + $0x48] sm:$0xff] }
 0xef1   :  { %v6823_v23 = vadd.f32 %v6779_v1, %v6718_v14  ;;  %10966 = vmatprep.subr.bf16.mxu1 %v11225_v52  ;;  %v11178_v2 = vpop.eup %11177  ;;  %v6854_v14 = vld [vmem:[%s14572_s14 + $0x40] sm:$0xff]  ;;  %v6856_v1 = vld [vmem:[%s14572_s14 + $0x50] sm:$0xf] }
 0xef2   :  { %v6677_v31 = vpop.f32.mrb[30].mxu0 }
 0xef3   :  { %11183 = vtanh.f32 %v6823_v23  ;;  %v6719_v16 = vadd.f32 %v6677_v31, %v14347_v48  ;;  %v10334_v15 = vpop.f32.mrb[31].mxu0  ;;  %v7088_v23 = vld [vmem:[%s14573_s16] sm:$0xff] }
 0xef5   :  { %v11180_v0 = vpop.eup %11179  ;;  %v6824_v29 = vadd.f32 %v6784_v62, %v6719_v16  ;;  %v6871_v16 = vpop.permute.xlu0 %6870 }
 0xef6   :  { %v6682_v26 = vpop.f32.mrb[32].mxu0  ;;  %v10967_v35 = vpack.c.bf16 %v11180_v0, %v11178_v2  ;;  %v6876_v0 = vpop.permute.xlu1 %6875 }
 0xef7   :  { %v6720_v37 = vadd.f32 %v6682_v26, %v14350_v3  ;;  %v10337_v39 = vpop.f32.mrb[33].mxu0  ;;  %11185 = vtanh.f32 %v6824_v29 }
 0xef8   :  { %10968 = vmatpush3.bf16.msra.mxu1 %v10967_v35 }
 0xef9   :  { %v6825_v33 = vadd.f32 %v6789_v38, %v6720_v37  ;;  %10969 = vmatprep.subr.bf16.mxu1 %v11225_v52  ;;  %v11182_v5 = vpop.eup %11181  ;;  %v6881_v35 = vpop.permute.xlu0 %6880 }
 0xefa   :  { %v6687_v4 = vpop.f32.mrb[34].mxu0  ;;  %v6886_v38 = vpop.permute.xlu1 %6885 }
 0xefb   :  { %11187 = vtanh.f32 %v6825_v33  ;;  %v6721_v48 = vadd.f32 %v6687_v4, %v14352_v20  ;;  %v10340_v6 = vpop.f32.mrb[35].mxu0 }
 0xefd   :  { %v11184_v7 = vpop.eup %11183  ;;  %v6826_v12 = vadd.f32 %v6794_v55, %v6721_v48  ;;  %v6891_v55 = vpop.permute.xlu0 %6890 }
 0xefe   :  { %v6692_v25 = vpop.f32.mrb[36].mxu0  ;;  %v10970_v17 = vpack.c.bf16 %v11184_v7, %v11182_v5 }
 0xeff   :  { %v6722_v3 = vadd.f32 %v6692_v25, %v14354_v18  ;;  %v10343_v13 = vpop.f32.mrb[37].mxu0  ;;  %11189 = vtanh.f32 %v6826_v12 }
 0xf00   :  { %10971 = vmatpush3.bf16.msra.mxu1 %v10970_v17 }
 0xf01   :  { %v6827_v59 = vadd.f32 %v6799_v21, %v6722_v3  ;;  %10972 = vmatprep.subr.bf16.mxu1 %v11225_v52  ;;  %v11186_v9 = vpop.eup %11185  ;;  %v6896_v3 = vpop.permute.xlu1 %6895 }
 0xf02   :  { %v6697_v24 = vpop.f32.mrb[38].mxu0 }
 0xf03   :  { %11191 = vtanh.f32 %v6827_v59  ;;  %v6723_v20 = vadd.f32 %v6697_v24, %v14357_v34  ;;  %v10346_v11 = vpop.f32.mrb[39].mxu0 }
 0xf05   :  { %v11188_v27 = vpop.eup %11187  ;;  %v6828_v36 = vadd.f32 %v6804_v28, %v6723_v20 }
 0xf06   :  { %v6702_v22 = vpop.f32.mrb[40].mxu0  ;;  %v10973_v43 = vpack.c.bf16 %v11188_v27, %v11186_v9  ;;  %v6901_v9 = vpop.permute.xlu0 %6900 }
 0xf07   :  { %v6724_v18 = vadd.f32 %v6702_v22, %v14360_v45  ;;  %v10349_v51 = vpop.f32.mrb[41].mxu0  ;;  %11193 = vtanh.f32 %v6828_v36  ;;  %v6906_v22 = vpop.permute.xlu1 %6905 }
 0xf08   :  { %10974 = vmatpush3.bf16.msra.mxu1 %v10973_v43 }
 0xf09   :  { %v6829_v42 = vadd.f32 %v6809_v40, %v6724_v18  ;;  %10975 = vmatprep.subr.bf16.mxu1 %v11225_v52  ;;  %v11190_v50 = vpop.eup %11189 }
 0xf0a   :  { %v6707_v47 = vpop.f32.mrb[42].mxu0 }
 0xf0b   :  { %11195 = vtanh.f32 %v6829_v42  ;;  %v6725_v34 = vadd.f32 %v6707_v47, %v14363_v54  ;;  %v10352_v32 = vpop.f32.mrb[43].mxu0  ;;  %v6846_v54 = vld [vmem:[%s14572_s14] sm:$0xff] }
 0xf0d   :  { %v11192_v46 = vpop.eup %11191  ;;  %v6830_v30 = vadd.f32 %v6814_v44, %v6725_v34  ;;  %v6911_v34 = vpop.permute.xlu0 %6910 }
 0xf0e   :  { %v10976_v49 = vpack.c.bf16 %v11192_v46, %v11190_v50  ;;  %v6916_v46 = vpop.permute.xlu1 %6915 }
 0xf0f   :  { %11197 = vtanh.f32 %v6830_v30 }
 0xf10   :  { %10977 = vmatpush3.bf16.msra.mxu1 %v10976_v49 }
 0xf11   :  { %10978 = vmatprep.subr.bf16.mxu1 %v11225_v52  ;;  %v11194_v45 = vpop.eup %11193  ;;  %v6847_v52 = vld [vmem:[%s14572_s14 + $0x8] sm:$0xff] }
 0xf15   :  { %v11196_v56 = vpop.eup %11195 }
 0xf16   :  { %v10979_v8 = vpack.c.bf16 %v11196_v56, %v11194_v45 }
 0xf18   :  { %10980 = vmatpush3.bf16.msra.mxu1 %v10979_v8  ;;  %v6921_v8 = vpop.permute.xlu0 %6920 }
 0xf19   :  { %10381 = vmatprep.subr.mxu1 %v11227_v53  ;;  %v11198_v19 = vpop.eup %11197 }
 0xf1c   :  { %10382 = vmatpush3.msra.mxu1 %v11198_v19 }
 0xf1d   :  { %10384 = vmatmul.mubr.msk.f32.vlgmr.msra.gmra.mrb[108].mxu1 %vm6923_vm9, %v6846_v54 }
 0xf1e   :  { %10386 = vmatprep.mubr.msk.f32.mxu1 %vm11226_vm0, %v11227_v53 }
 0xf21   :  { %10387 = vmatmul.mubr.msk.f32.gmra.mrb[110].mxu1 %vm6923_vm9, %v6847_v52 }
 0xf22   :  { %10389 = vmatprep.mubr.msk.f32.mxu1 %vm11226_vm0, %v11227_v53 }
 0xf25   :  { %10390 = vmatmul.mubr.msk.f32.gmra.mrb[112].mxu1 %vm6923_vm9, %v6848_v58 }
 0xf26   :  { %10392 = vmatprep.mubr.msk.f32.mxu1 %vm11226_vm0, %v11227_v53 }
 0xf29   :  { %10393 = vmatmul.mubr.msk.f32.gmra.mrb[114].mxu1 %vm6923_vm9, %v6849_v57 }
 0xf2a   :  { %10395 = vmatprep.mubr.msk.f32.mxu1 %vm11226_vm0, %v11227_v53 }
 0xf2d   :  { %10396 = vmatmul.mubr.msk.f32.gmra.mrb[116].mxu1 %vm6923_vm9, %v6850_v61 }
 0xf2e   :  { %10398 = vmatprep.mubr.msk.f32.mxu1 %vm11226_vm0, %v11227_v53 }
 0xf31   :  { %10399 = vmatmul.mubr.msk.f32.gmra.mrb[118].mxu1 %vm6923_vm9, %v6851_v63 }
 0xf32   :  { %10401 = vmatprep.mubr.msk.f32.mxu1 %vm11226_vm0, %v11227_v53 }
 0xf35   :  { %10402 = vmatmul.mubr.msk.f32.gmra.mrb[120].mxu1 %vm6923_vm9, %v6852_v10 }
 0xf36   :  { %10404 = vmatprep.mubr.msk.f32.mxu1 %vm11226_vm0, %v11227_v53 }
 0xf39   :  { %10405 = vmatmul.mubr.msk.f32.gmra.mrb[122].mxu1 %vm6923_vm9, %v6853_v60 }
 0xf3a   :  { %10407 = vmatprep.mubr.msk.f32.mxu1 %vm11226_vm0, %v11227_v53 }
 0xf3d   :  { %10408 = vmatmul.mubr.msk.f32.gmra.mrb[124].mxu1 %vm6923_vm9, %v6854_v14  ;;  %v7089_v14 = vld [vmem:[%s14573_s16 + $0x8] sm:$0x3] }
 0xf3e   :  { %10410 = vmatprep.mubr.msk.f32.mxu1 %vm11226_vm0, %v11227_v53 }
 0xf41   :  { %10411 = vmatmul.mubr.msk.f32.gmra.mrb[126].mxu1 %vm6923_vm9, %v6855_v41  ;;  %v7100_v41 = vpop.permute.xlu0 %7099 }
 0xf42   :  { %10413 = vmatprep.mubr.msk.f32.mxu1 %vm11226_vm0, %v11227_v53 }
 0xf45   :  { %10414 = vmatmul.mubr.msk.f32.gmra.mrb[128].mxu1 %vm6923_vm9, %v6856_v1 }
 0xf46   :  { %10438 = vmatprep.mubr.msk.f32.mxu1 %vm2832_vm5, %v7088_v23  ;;  %v7095_v23 = vpop.permute.xlu1 %7094 }
 0xff0   :  { %v7023_v31 = vpop.f32.mrb[108].mxu1 }
 0xff1   :  { %v10385_v15 = vpop.f32.mrb[109].mxu1  ;;  %v7024_v2 = vadd.f32 %v7023_v31, %v6871_v16 }
 0xff3   :  { %11199 = vtanh.f32 %v7024_v2 }
 0xff4   :  { %v7028_v62 = vpop.f32.mrb[110].mxu1 }
 0xff5   :  { %v7029_v29 = vadd.f32 %v7028_v62, %v6876_v0  ;;  %v10388_v53 = vpop.f32.mrb[111].mxu1 }
 0xff7   :  { %11201 = vtanh.f32 %v7029_v29 }
 0xff8   :  { %v7033_v26 = vpop.f32.mrb[112].mxu1 }
 0xff9   :  { %v10391_v37 = vpop.f32.mrb[113].mxu1  ;;  %v7034_v39 = vadd.f32 %v7033_v26, %v6881_v35 }
 0xffb   :  { %11203 = vtanh.f32 %v7034_v39 }
 0xffc   :  { %v7038_v33 = vpop.f32.mrb[114].mxu1 }
 0xffd   :  { %v7039_v4 = vadd.f32 %v7038_v33, %v6886_v38  ;;  %v10394_v48 = vpop.f32.mrb[115].mxu1  ;;  %v11200_v6 = vpop.eup %11199 }
 0xfff   :  { %11205 = vtanh.f32 %v7039_v4 }
0x1000   :  { %v7043_v5 = vpop.f32.mrb[116].mxu1 }
0x1001   :  { %v11202_v7 = vpop.eup %11201  ;;  %v10397_v12 = vpop.f32.mrb[117].mxu1  ;;  %v7044_v25 = vadd.f32 %v7043_v5, %v6891_v55 }
0x1002   :  { %v10981_v17 = vpack.c.bf16 %v11202_v7, %v11200_v6 }
0x1003   :  { %11207 = vtanh.f32 %v7044_v25 }
0x1004   :  { %v7048_v13 = vpop.f32.mrb[118].mxu1  ;;  %10982 = vmatprep.subr.bf16.mxu1 %v10981_v17 }
0x1005   :  { %v7049_v21 = vadd.f32 %v7048_v13, %v6896_v3  ;;  %10984 = vmatpush3.bf16.msra.mxu1 %v10981_v17  ;;  %v10400_v59 = vpop.f32.mrb[119].mxu1  ;;  %v11204_v24 = vpop.eup %11203 }
0x1007   :  { %11209 = vtanh.f32 %v7049_v21 }
0x1008   :  { %v7053_v20 = vpop.f32.mrb[120].mxu1 }
0x1009   :  { %v11206_v11 = vpop.eup %11205  ;;  %v10403_v27 = vpop.f32.mrb[121].mxu1  ;;  %v7054_v28 = vadd.f32 %v7053_v20, %v6901_v9 }
0x100a   :  { %v10985_v36 = vpack.c.bf16 %v11206_v11, %v11204_v24 }
0x100b   :  { %11211 = vtanh.f32 %v7054_v28 }
0x100c   :  { %v7058_v43 = vpop.f32.mrb[122].mxu1  ;;  %10986 = vmatprep.subr.bf16.mxu1 %v10985_v36 }
0x100d   :  { %v7059_v18 = vadd.f32 %v7058_v43, %v6906_v22  ;;  %10988 = vmatpush3.bf16.msra.mxu1 %v10985_v36  ;;  %v10406_v51 = vpop.f32.mrb[123].mxu1  ;;  %v11208_v40 = vpop.eup %11207 }
0x100f   :  { %11213 = vtanh.f32 %v7059_v18 }
0x1010   :  { %v7063_v42 = vpop.f32.mrb[124].mxu1 }
0x1011   :  { %v11210_v47 = vpop.eup %11209  ;;  %v10409_v32 = vpop.f32.mrb[125].mxu1  ;;  %v7064_v50 = vadd.f32 %v7063_v42, %v6911_v34 }
0x1012   :  { %v10989_v44 = vpack.c.bf16 %v11210_v47, %v11208_v40 }
0x1013   :  { %11215 = vtanh.f32 %v7064_v50 }
0x1014   :  { %v7068_v30 = vpop.f32.mrb[126].mxu1  ;;  %10990 = vmatprep.subr.bf16.mxu1 %v10989_v44 }
0x1015   :  { %v7069_v49 = vadd.f32 %v7068_v30, %v6916_v46  ;;  %10992 = vmatpush3.bf16.msra.mxu1 %v10989_v44  ;;  %v10412_v45 = vpop.f32.mrb[127].mxu1  ;;  %v11212_v56 = vpop.eup %11211 }
0x1017   :  { %11217 = vtanh.f32 %v7069_v49 }
0x1018   :  { %v7073_v54 = vpop.f32.mrb[128].mxu1 }
0x1019   :  { %v11214_v19 = vpop.eup %11213  ;;  %v7074_v52 = vadd.f32 %v7073_v54, %v6921_v8  ;;  %v10415_v58 = vpop.f32.mrb[129].mxu1 }
0x101a   :  { %v10993_v57 = vpack.c.bf16 %v11214_v19, %v11212_v56 }
0x101b   :  { %11219 = vtanh.f32 %v7074_v52 }
0x101c   :  { %10994 = vmatprep.subr.bf16.mxu1 %v10993_v57 }
0x101d   :  { %10996 = vmatpush3.bf16.msra.mxu1 %v10993_v57  ;;  %v11216_v61 = vpop.eup %11215 }
0x1021   :  { %v11218_v63 = vpop.eup %11217 }
0x1022   :  { %v10997_v10 = vpack.c.bf16 %v11218_v63, %v11216_v61 }
0x1024   :  { %10998 = vmatprep.subr.bf16.mxu1 %v10997_v10 }
0x1025   :  { %v11220_v60 = vpop.eup %11219  ;;  %11000 = vmatpush3.bf16.msra.mxu1 %v10997_v10 }
0x1026   :  { %10436 = vmatprep.subr.msk.mxu1 %vm2893_vm6, %v11220_v60 }
0x1029   :  { %10437 = vmatpush3.msk.msra.mxu1 %vm2893_vm6, %v11220_v60 }
0x102a   :  { %10439 = vmatmul.mubr.msk.f32.vlgmr.msra.gmra.mrb[130].mxu1 %vm2832_vm5, %v7089_v14 }
0x10fd   :  { %v10440_v1 = vpop.f32.mrb[130].mxu1 }
0x10fe   :  { %v7183_v31 = vadd.f32 %v10440_v1, %v7100_v41  ;;  %v7177_v16 = vpop.f32.mrb[131].mxu1 }
0x10ff   :  { %v7178_v15 = vadd.f32 %v7177_v16, %v7095_v23 }
0x1100   :  { %7189 = vst.msk [vmem:[%s14574_s18 + $0x8] sm:$0x3] %vm7188_vm10, %v7183_v31 }
0x1101   :  { %7187 = vst.msk [vmem:[%s14574_s18] sm:$0xff] %vm7186_vm11, %v7178_v15 }

</bundles_post_ra>
